<compile_context>
chip_gen: v7x
topology: tpu7x:2x2x1
jax: 0.10.0
libtpu: 0.0.40
codegen_flags: <defaults>
</compile_context>

<pallas_src>
import functools
import random

import numpy as np
import jax
import jax.numpy as jnp
from jax import lax
from jax.experimental import pallas as pl
from jax.experimental.pallas import tpu as pltpu


# ----------------------------------------------------------------------------
# in-kernel helpers
# ----------------------------------------------------------------------------
def _pair_sim(a, b):
    """a @ b.T without materializing a transpose (contract last dims)."""
    return lax.dot_general(
        a.astype(jnp.bfloat16), b.astype(jnp.bfloat16),
        dimension_numbers=(((1,), (1,)), ((), ())),
        preferred_element_type=jnp.float32)


def _graph_conv(f, w, k):
    """kNN graph + one graph-conv layer: relu(rownorm(A) @ f @ w).

    f : (N, D) float32, w : (D, D) float32, k small static int.
    """
    fb = f.astype(jnp.bfloat16)
    # pairwise similarities on the MXU, contracting last dims (no .T)
    sims = lax.dot_general(fb, fb,
                           dimension_numbers=(((1,), (1,)), ((), ())),
                           preferred_element_type=jnp.float32)      # (N, N)

    # k-th largest value per row (k is a small static int -> unrolled).
    # TODO(synk): torch.topk tie-breaking is not reproduced exactly; the
    # threshold form below admits >k neighbours on exact ties.
    neg = jnp.float32(-1e30)
    masked = sims
    for _ in range(k - 1):
        cur = jnp.max(masked, axis=-1, keepdims=True)
        masked = jnp.where(masked >= cur, neg, masked)
    kth = jnp.max(masked, axis=-1, keepdims=True)                   # (N, 1)

    # kNN adjacency; row-normalisation folded AFTER the propagation matmul
    # ((N, D) scale via EUP reciprocal instead of an (N, N) divide).
    adj = (sims >= kth).astype(jnp.float32)                         # (N, N)
    inv = pl.reciprocal(jnp.sum(adj, axis=-1, keepdims=True), approx=True)

    agg = jnp.dot(adj.astype(jnp.bfloat16), fb,
                  preferred_element_type=jnp.float32) * inv         # (N, D)
    out = jnp.dot(agg.astype(jnp.bfloat16), w.astype(jnp.bfloat16),
                  preferred_element_type=jnp.float32)               # (N, D)
    return jnp.maximum(out, 0.0)


# ----------------------------------------------------------------------------
# fused per-(q_batch, g_batch) kernel
# ----------------------------------------------------------------------------
def fused_pair_kernel(qb_ref, gb_ref, w1_ref, w2_ref,      # inputs
                      s0_ref, sl_ref,                      # outputs
                      joint_ref,                           # VMEM scratch
                      *, k, bq, bg):
    w1 = w1_ref[...]
    w2 = w2_ref[...]

    # per-set graph conv (stand-in for compute_feat)
    q1 = _graph_conv(qb_ref[...], w1, k)                   # (Bq, D)
    g1 = _graph_conv(gb_ref[...], w1, k)                   # (Bg, D)

    # joint graph conv (stand-in for compute_pair's model call)
    joint_ref[pl.ds(0, bq), :] = q1
    joint_ref[pl.ds(bq, bg), :] = g1
    prop = _graph_conv(joint_ref[...], w2, k)              # (Bq+Bg, D)

    # pairwise similarity outputs (lane-dense blocks)
    s0_ref[...] = _pair_sim(q1, g1)
    sl_ref[...] = _pair_sim(prop[:bq], prop[bq:])


def make_step_fn(bq, bg, d, k):
    """Build one fused, jitted device step for batch sizes (bq, bg)."""
    fused = pl.pallas_call(
        functools.partial(fused_pair_kernel, k=k, bq=bq, bg=bg),
        out_shape=(jax.ShapeDtypeStruct((bq, bg), jnp.float32),
                   jax.ShapeDtypeStruct((bq, bg), jnp.float32)),
        grid=(1,),
        in_specs=[
            pl.BlockSpec((bq, d), lambda i: (0, 0)),
            pl.BlockSpec((bg, d), lambda i: (0, 0)),
            pl.BlockSpec((d, d), lambda i: (0, 0)),
            pl.BlockSpec((d, d), lambda i: (0, 0)),
        ],
        out_specs=(pl.BlockSpec((bq, bg), lambda i: (0, 0)),
                   pl.BlockSpec((bq, bg), lambda i: (0, 0))),
        scratch_shapes=[pltpu.VMEM((bq + bg, d), jnp.float32)],
        compiler_params=pltpu.CompilerParams(
            dimension_semantics=("arbitrary",)),
    )

    @jax.jit
    def step(qf, gf, w1, w2, q_idx, g_idx, s0_acc, sl_acc):
        # device-side gather of the batch rows (no host fancy-indexing)
        qb = jnp.take(qf, q_idx, axis=0)
        gb = jnp.take(gf, g_idx, axis=0)
        s0, sl = fused(qb, gb, w1, w2)
        # device-side scatter into the running similarity matrices
        s0_acc = s0_acc.at[q_idx[:, None], g_idx[None, :]].set(s0)
        sl_acc = sl_acc.at[q_idx[:, None], g_idx[None, :]].set(sl)
        return s0_acc, sl_acc

    return step


# ----------------------------------------------------------------------------
# host-side orchestration (same control structure as the PyTorch module)
# ----------------------------------------------------------------------------
def random_id(ids, num, batch_num):
    random.shuffle(ids)
    rem_len = num % batch_num
    if rem_len == 0:
        return ids.reshape(-1, batch_num).tolist()
    rem = ids[:rem_len].tolist()
    rest = ids[rem_len:].reshape(-1, batch_num).tolist()
    rest.append(rem)
    return rest


class GraphTestPallas:
    def __init__(self, w1, w2, q_batch, g_batch, graphconv_test_epoch, k):
        self.w1 = w1
        self.w2 = w2
        self.q_batch = q_batch
        self.g_batch = g_batch
        self.graphconv_test_epoch = graphconv_test_epoch
        self.k = k
        self._step_cache = {}

    def _get_step(self, bq, bg):
        key = (bq, bg)
        if key not in self._step_cache:
            self._step_cache[key] = make_step_fn(bq, bg,
                                                 self.w1.shape[0], self.k)
        return self._step_cache[key]

    def forward(self, qf, gf):
        qf = jnp.asarray(qf, jnp.float32)
        gf = jnp.asarray(gf, jnp.float32)
        q_num, g_num = qf.shape[0], gf.shape[0]
        q_ids, g_ids = np.arange(q_num), np.arange(g_num)

        S_0 = jnp.zeros((q_num, g_num), jnp.float32)
        S_L = jnp.zeros((q_num, g_num), jnp.float32)

        for i in range(self.graphconv_test_epoch):
            q_id = random_id(q_ids, q_num, self.q_batch)
            g_id = random_id(g_ids, g_num, self.g_batch)
            S_0_temp = jnp.zeros_like(S_0)
            S_L_temp = jnp.zeros_like(S_L)
            for q_id_batch in q_id:
                q_idx = jnp.asarray(np.asarray(q_id_batch), jnp.int32)
                for g_id_batch in g_id:
                    g_idx = jnp.asarray(np.asarray(g_id_batch), jnp.int32)
                    step = self._get_step(len(q_id_batch), len(g_id_batch))
                    if i == 0:
                        S_0, S_L = step(qf, gf, self.w1, self.w2,
                                        q_idx, g_idx, S_0, S_L)
                    else:
                        S_0_temp, S_L_temp = step(qf, gf, self.w1, self.w2,
                                                  q_idx, g_idx,
                                                  S_0_temp, S_L_temp)
            if i != 0:
                S_0 = (S_0 + S_0_temp) * 0.5
                S_L = (S_L + S_L_temp) * 0.5
        return S_0, S_L


# ----------------------------------------------------------------------------
if __name__ == "__main__":
    random.seed(0)

    # small deterministic problem (lane-dense: D and batch sizes = 128)
    q_num, g_num, D = 256, 256, 128
    q_batch, g_batch = 128, 128
    epochs, k = 2, 4

    key = jax.random.PRNGKey(0)
    kq, kg, kw1, kw2 = jax.random.split(key, 4)
    qf = jax.random.normal(kq, (q_num, D), dtype=jnp.float32)
    gf = jax.random.normal(kg, (g_num, D), dtype=jnp.float32)
    w1 = 0.05 * jax.random.normal(kw1, (D, D), dtype=jnp.float32)
    w2 = 0.05 * jax.random.normal(kw2, (D, D), dtype=jnp.float32)

    module = GraphTestPallas(w1, w2, q_batch, g_batch, epochs, k)
    S_0, S_L = module.forward(qf, gf)

    S_0 = np.asarray(jax.block_until_ready(S_0))
    S_L = np.asarray(jax.block_until_ready(S_L))
    assert S_0.shape == (q_num, g_num) and S_L.shape == (q_num, g_num)
    assert np.all(np.isfinite(S_0)) and np.all(np.isfinite(S_L))
    print("KERNEL_OK")
</pallas_src>

<mosaic_0001>
module attributes {stable_mosaic.version = 11 : i64} {
  func.func @fused_pair_kernel(%arg0: i32, %arg1: memref<128x128xf32, #tpu.memory_space<vmem>>, %arg2: memref<128x128xf32, #tpu.memory_space<vmem>>, %arg3: memref<128x128xf32, #tpu.memory_space<vmem>>, %arg4: memref<128x128xf32, #tpu.memory_space<vmem>>, %arg5: memref<128x128xf32, #tpu.memory_space<vmem>>, %arg6: memref<128x128xf32, #tpu.memory_space<vmem>>, %arg7: memref<256x128xf32, #tpu.memory_space<vmem>>) attributes {dimension_semantics = [#tpu.dimension_semantics<arbitrary>], iteration_bounds = array<i64: 1>, scalar_prefetch = 0 : i64, scratch_operands = 1 : i64, tpu.core_type = #tpu.core_type<tc>, window_params = [{pipeline_mode = #tpu.pipeline_mode<synchronous>, transform_indices = @transform_0, window_bounds = array<i64: 128, 128>}, {pipeline_mode = #tpu.pipeline_mode<synchronous>, transform_indices = @transform_1, window_bounds = array<i64: 128, 128>}, {pipeline_mode = #tpu.pipeline_mode<synchronous>, transform_indices = @transform_2, window_bounds = array<i64: 128, 128>}, {pipeline_mode = #tpu.pipeline_mode<synchronous>, transform_indices = @transform_3, window_bounds = array<i64: 128, 128>}, {pipeline_mode = #tpu.pipeline_mode<synchronous>, transform_indices = @transform_4, window_bounds = array<i64: 128, 128>}, {pipeline_mode = #tpu.pipeline_mode<synchronous>, transform_indices = @transform_5, window_bounds = array<i64: 128, 128>}]} {
    %c0 = arith.constant 0 : index
    %c0_0 = arith.constant 0 : index
    %0 = vector.load %arg3[%c0, %c0_0] : memref<128x128xf32, #tpu.memory_space<vmem>>, vector<128x128xf32>
    %c0_1 = arith.constant 0 : index
    %c0_2 = arith.constant 0 : index
    %1 = vector.load %arg4[%c0_1, %c0_2] : memref<128x128xf32, #tpu.memory_space<vmem>>, vector<128x128xf32>
    %c0_3 = arith.constant 0 : index
    %c0_4 = arith.constant 0 : index
    %2 = vector.load %arg1[%c0_3, %c0_4] : memref<128x128xf32, #tpu.memory_space<vmem>>, vector<128x128xf32>
    %3 = arith.truncf %2 : vector<128x128xf32> to vector<128x128xbf16>
    %cst = arith.constant dense<0.000000e+00> : vector<128x128xf32>
    %4 = tpu.matmul %3, %3, %cst {dimension_numbers = #tpu.dot_dimension_numbers<[1], [1], [0], [0], [0, 0, 1, 0], [], []>} : vector<128x128xbf16>, vector<128x128xbf16>, vector<128x128xf32> -> vector<128x128xf32>
    %cst_5 = arith.constant dense<0xFF800000> : vector<128xf32>
    %5 = vector.multi_reduction <maximumf>, %4, %cst_5 [1] : vector<128x128xf32> to vector<128xf32>
    %6 = vector.shape_cast %5 : vector<128xf32> to vector<128x1xf32>
    %7 = vector.broadcast %6 : vector<128x1xf32> to vector<128x128xf32>
    %8 = arith.cmpf oge, %4, %7 : vector<128x128xf32>
    %cst_6 = arith.constant -1.000000e+30 : f32
    %9 = vector.broadcast %cst_6 : f32 to vector<128x128xf32>
    %10 = arith.select %8, %9, %4 : vector<128x128xi1>, vector<128x128xf32>
    %cst_7 = arith.constant dense<0xFF800000> : vector<128xf32>
    %11 = vector.multi_reduction <maximumf>, %10, %cst_7 [1] : vector<128x128xf32> to vector<128xf32>
    %12 = vector.shape_cast %11 : vector<128xf32> to vector<128x1xf32>
    %13 = vector.broadcast %12 : vector<128x1xf32> to vector<128x128xf32>
    %14 = arith.cmpf oge, %10, %13 : vector<128x128xf32>
    %cst_8 = arith.constant -1.000000e+30 : f32
    %15 = vector.broadcast %cst_8 : f32 to vector<128x128xf32>
    %16 = arith.select %14, %15, %10 : vector<128x128xi1>, vector<128x128xf32>
    %cst_9 = arith.constant dense<0xFF800000> : vector<128xf32>
    %17 = vector.multi_reduction <maximumf>, %16, %cst_9 [1] : vector<128x128xf32> to vector<128xf32>
    %18 = vector.shape_cast %17 : vector<128xf32> to vector<128x1xf32>
    %19 = vector.broadcast %18 : vector<128x1xf32> to vector<128x128xf32>
    %20 = arith.cmpf oge, %16, %19 : vector<128x128xf32>
    %cst_10 = arith.constant -1.000000e+30 : f32
    %21 = vector.broadcast %cst_10 : f32 to vector<128x128xf32>
    %22 = arith.select %20, %21, %16 : vector<128x128xi1>, vector<128x128xf32>
    %cst_11 = arith.constant dense<0xFF800000> : vector<128xf32>
    %23 = vector.multi_reduction <maximumf>, %22, %cst_11 [1] : vector<128x128xf32> to vector<128xf32>
    %24 = vector.shape_cast %23 : vector<128xf32> to vector<128x1xf32>
    %25 = vector.broadcast %24 : vector<128x1xf32> to vector<128x128xf32>
    %26 = arith.cmpf oge, %4, %25 : vector<128x128xf32>
    %27 = arith.extui %26 : vector<128x128xi1> to vector<128x128xi32>
    %28 = arith.sitofp %27 : vector<128x128xi32> to vector<128x128xf32>
    %cst_12 = arith.constant dense<0.000000e+00> : vector<128xf32>
    %29 = vector.multi_reduction <add>, %28, %cst_12 [1] : vector<128x128xf32> to vector<128xf32>
    %30 = vector.shape_cast %29 : vector<128xf32> to vector<128x1xf32>
    %31 = tpu.reciprocal %30 {approx = true} : vector<128x1xf32> -> vector<128x1xf32>
    %32 = arith.truncf %28 : vector<128x128xf32> to vector<128x128xbf16>
    %cst_13 = arith.constant dense<0.000000e+00> : vector<128x128xf32>
    %33 = tpu.matmul %32, %3, %cst_13 {dimension_numbers = #tpu.dot_dimension_numbers<[1], [0], [0], [1], [0, 0, 1, 1], [], []>} : vector<128x128xbf16>, vector<128x128xbf16>, vector<128x128xf32> -> vector<128x128xf32>
    %34 = vector.broadcast %31 : vector<128x1xf32> to vector<128x128xf32>
    %35 = arith.mulf %33, %34 : vector<128x128xf32>
    %36 = arith.truncf %35 : vector<128x128xf32> to vector<128x128xbf16>
    %37 = arith.truncf %0 : vector<128x128xf32> to vector<128x128xbf16>
    %cst_14 = arith.constant dense<0.000000e+00> : vector<128x128xf32>
    %38 = tpu.matmul %36, %37, %cst_14 {dimension_numbers = #tpu.dot_dimension_numbers<[1], [0], [0], [1], [0, 0, 1, 1], [], []>} : vector<128x128xbf16>, vector<128x128xbf16>, vector<128x128xf32> -> vector<128x128xf32>
    %cst_15 = arith.constant 0.000000e+00 : f32
    %39 = vector.broadcast %cst_15 : f32 to vector<128x128xf32>
    %40 = arith.maximumf %38, %39 : vector<128x128xf32>
    %c0_16 = arith.constant 0 : index
    %c0_17 = arith.constant 0 : index
    %41 = vector.load %arg2[%c0_16, %c0_17] : memref<128x128xf32, #tpu.memory_space<vmem>>, vector<128x128xf32>
    %42 = arith.truncf %41 : vector<128x128xf32> to vector<128x128xbf16>
    %cst_18 = arith.constant dense<0.000000e+00> : vector<128x128xf32>
    %43 = tpu.matmul %42, %42, %cst_18 {dimension_numbers = #tpu.dot_dimension_numbers<[1], [1], [0], [0], [0, 0, 1, 0], [], []>} : vector<128x128xbf16>, vector<128x128xbf16>, vector<128x128xf32> -> vector<128x128xf32>
    %cst_19 = arith.constant dense<0xFF800000> : vector<128xf32>
    %44 = vector.multi_reduction <maximumf>, %43, %cst_19 [1] : vector<128x128xf32> to vector<128xf32>
    %45 = vector.shape_cast %44 : vector<128xf32> to vector<128x1xf32>
    %46 = vector.broadcast %45 : vector<128x1xf32> to vector<128x128xf32>
    %47 = arith.cmpf oge, %43, %46 : vector<128x128xf32>
    %cst_20 = arith.constant -1.000000e+30 : f32
    %48 = vector.broadcast %cst_20 : f32 to vector<128x128xf32>
    %49 = arith.select %47, %48, %43 : vector<128x128xi1>, vector<128x128xf32>
    %cst_21 = arith.constant dense<0xFF800000> : vector<128xf32>
    %50 = vector.multi_reduction <maximumf>, %49, %cst_21 [1] : vector<128x128xf32> to vector<128xf32>
    %51 = vector.shape_cast %50 : vector<128xf32> to vector<128x1xf32>
    %52 = vector.broadcast %51 : vector<128x1xf32> to vector<128x128xf32>
    %53 = arith.cmpf oge, %49, %52 : vector<128x128xf32>
    %cst_22 = arith.constant -1.000000e+30 : f32
    %54 = vector.broadcast %cst_22 : f32 to vector<128x128xf32>
    %55 = arith.select %53, %54, %49 : vector<128x128xi1>, vector<128x128xf32>
    %cst_23 = arith.constant dense<0xFF800000> : vector<128xf32>
    %56 = vector.multi_reduction <maximumf>, %55, %cst_23 [1] : vector<128x128xf32> to vector<128xf32>
    %57 = vector.shape_cast %56 : vector<128xf32> to vector<128x1xf32>
    %58 = vector.broadcast %57 : vector<128x1xf32> to vector<128x128xf32>
    %59 = arith.cmpf oge, %55, %58 : vector<128x128xf32>
    %cst_24 = arith.constant -1.000000e+30 : f32
    %60 = vector.broadcast %cst_24 : f32 to vector<128x128xf32>
    %61 = arith.select %59, %60, %55 : vector<128x128xi1>, vector<128x128xf32>
    %cst_25 = arith.constant dense<0xFF800000> : vector<128xf32>
    %62 = vector.multi_reduction <maximumf>, %61, %cst_25 [1] : vector<128x128xf32> to vector<128xf32>
    %63 = vector.shape_cast %62 : vector<128xf32> to vector<128x1xf32>
    %64 = vector.broadcast %63 : vector<128x1xf32> to vector<128x128xf32>
    %65 = arith.cmpf oge, %43, %64 : vector<128x128xf32>
    %66 = arith.extui %65 : vector<128x128xi1> to vector<128x128xi32>
    %67 = arith.sitofp %66 : vector<128x128xi32> to vector<128x128xf32>
    %cst_26 = arith.constant dense<0.000000e+00> : vector<128xf32>
    %68 = vector.multi_reduction <add>, %67, %cst_26 [1] : vector<128x128xf32> to vector<128xf32>
    %69 = vector.shape_cast %68 : vector<128xf32> to vector<128x1xf32>
    %70 = tpu.reciprocal %69 {approx = true} : vector<128x1xf32> -> vector<128x1xf32>
    %71 = arith.truncf %67 : vector<128x128xf32> to vector<128x128xbf16>
    %cst_27 = arith.constant dense<0.000000e+00> : vector<128x128xf32>
    %72 = tpu.matmul %71, %42, %cst_27 {dimension_numbers = #tpu.dot_dimension_numbers<[1], [0], [0], [1], [0, 0, 1, 1], [], []>} : vector<128x128xbf16>, vector<128x128xbf16>, vector<128x128xf32> -> vector<128x128xf32>
    %73 = vector.broadcast %70 : vector<128x1xf32> to vector<128x128xf32>
    %74 = arith.mulf %72, %73 : vector<128x128xf32>
    %75 = arith.truncf %74 : vector<128x128xf32> to vector<128x128xbf16>
    %76 = arith.truncf %0 : vector<128x128xf32> to vector<128x128xbf16>
    %cst_28 = arith.constant dense<0.000000e+00> : vector<128x128xf32>
    %77 = tpu.matmul %75, %76, %cst_28 {dimension_numbers = #tpu.dot_dimension_numbers<[1], [0], [0], [1], [0, 0, 1, 1], [], []>} : vector<128x128xbf16>, vector<128x128xbf16>, vector<128x128xf32> -> vector<128x128xf32>
    %cst_29 = arith.constant 0.000000e+00 : f32
    %78 = vector.broadcast %cst_29 : f32 to vector<128x128xf32>
    %79 = arith.maximumf %77, %78 : vector<128x128xf32>
    %c0_30 = arith.constant 0 : index
    %c0_31 = arith.constant 0 : index
    %80 = vector.load %arg7[%c0_30, %c0_31] : memref<256x128xf32, #tpu.memory_space<vmem>>, vector<128x128xf32>
    tpu.vector_store %arg7[%c0_30, %c0_31], %40 {strides = array<i32>} : memref<256x128xf32, #tpu.memory_space<vmem>>, vector<128x128xf32>,
    %c128 = arith.constant 128 : index
    %c0_32 = arith.constant 0 : index
    %81 = vector.load %arg7[%c128, %c0_32] : memref<256x128xf32, #tpu.memory_space<vmem>>, vector<128x128xf32>
    tpu.vector_store %arg7[%c128, %c0_32], %79 {strides = array<i32>} : memref<256x128xf32, #tpu.memory_space<vmem>>, vector<128x128xf32>,
    %c0_33 = arith.constant 0 : index
    %c0_34 = arith.constant 0 : index
    %82 = vector.load %arg7[%c0_33, %c0_34] : memref<256x128xf32, #tpu.memory_space<vmem>>, vector<256x128xf32>
    %83 = arith.truncf %82 : vector<256x128xf32> to vector<256x128xbf16>
    %cst_35 = arith.constant dense<0.000000e+00> : vector<256x256xf32>
    %84 = tpu.matmul %83, %83, %cst_35 {dimension_numbers = #tpu.dot_dimension_numbers<[1], [1], [0], [0], [0, 0, 1, 0], [], []>} : vector<256x128xbf16>, vector<256x128xbf16>, vector<256x256xf32> -> vector<256x256xf32>
    %cst_36 = arith.constant dense<0xFF800000> : vector<256xf32>
    %85 = vector.multi_reduction <maximumf>, %84, %cst_36 [1] : vector<256x256xf32> to vector<256xf32>
    %86 = vector.shape_cast %85 : vector<256xf32> to vector<256x1xf32>
    %87 = vector.broadcast %86 : vector<256x1xf32> to vector<256x256xf32>
    %88 = arith.cmpf oge, %84, %87 : vector<256x256xf32>
    %cst_37 = arith.constant -1.000000e+30 : f32
    %89 = vector.broadcast %cst_37 : f32 to vector<256x256xf32>
    %90 = arith.select %88, %89, %84 : vector<256x256xi1>, vector<256x256xf32>
    %cst_38 = arith.constant dense<0xFF800000> : vector<256xf32>
    %91 = vector.multi_reduction <maximumf>, %90, %cst_38 [1] : vector<256x256xf32> to vector<256xf32>
    %92 = vector.shape_cast %91 : vector<256xf32> to vector<256x1xf32>
    %93 = vector.broadcast %92 : vector<256x1xf32> to vector<256x256xf32>
    %94 = arith.cmpf oge, %90, %93 : vector<256x256xf32>
    %cst_39 = arith.constant -1.000000e+30 : f32
    %95 = vector.broadcast %cst_39 : f32 to vector<256x256xf32>
    %96 = arith.select %94, %95, %90 : vector<256x256xi1>, vector<256x256xf32>
    %cst_40 = arith.constant dense<0xFF800000> : vector<256xf32>
    %97 = vector.multi_reduction <maximumf>, %96, %cst_40 [1] : vector<256x256xf32> to vector<256xf32>
    %98 = vector.shape_cast %97 : vector<256xf32> to vector<256x1xf32>
    %99 = vector.broadcast %98 : vector<256x1xf32> to vector<256x256xf32>
    %100 = arith.cmpf oge, %96, %99 : vector<256x256xf32>
    %cst_41 = arith.constant -1.000000e+30 : f32
    %101 = vector.broadcast %cst_41 : f32 to vector<256x256xf32>
    %102 = arith.select %100, %101, %96 : vector<256x256xi1>, vector<256x256xf32>
    %cst_42 = arith.constant dense<0xFF800000> : vector<256xf32>
    %103 = vector.multi_reduction <maximumf>, %102, %cst_42 [1] : vector<256x256xf32> to vector<256xf32>
    %104 = vector.shape_cast %103 : vector<256xf32> to vector<256x1xf32>
    %105 = vector.broadcast %104 : vector<256x1xf32> to vector<256x256xf32>
    %106 = arith.cmpf oge, %84, %105 : vector<256x256xf32>
    %107 = arith.extui %106 : vector<256x256xi1> to vector<256x256xi32>
    %108 = arith.sitofp %107 : vector<256x256xi32> to vector<256x256xf32>
    %cst_43 = arith.constant dense<0.000000e+00> : vector<256xf32>
    %109 = vector.multi_reduction <add>, %108, %cst_43 [1] : vector<256x256xf32> to vector<256xf32>
    %110 = vector.shape_cast %109 : vector<256xf32> to vector<256x1xf32>
    %111 = tpu.reciprocal %110 {approx = true} : vector<256x1xf32> -> vector<256x1xf32>
    %112 = arith.truncf %108 : vector<256x256xf32> to vector<256x256xbf16>
    %cst_44 = arith.constant dense<0.000000e+00> : vector<256x128xf32>
    %113 = tpu.matmul %112, %83, %cst_44 {dimension_numbers = #tpu.dot_dimension_numbers<[1], [0], [0], [1], [0, 0, 1, 1], [], []>} : vector<256x256xbf16>, vector<256x128xbf16>, vector<256x128xf32> -> vector<256x128xf32>
    %114 = vector.broadcast %111 : vector<256x1xf32> to vector<256x128xf32>
    %115 = arith.mulf %113, %114 : vector<256x128xf32>
    %116 = arith.truncf %115 : vector<256x128xf32> to vector<256x128xbf16>
    %117 = arith.truncf %1 : vector<128x128xf32> to vector<128x128xbf16>
    %cst_45 = arith.constant dense<0.000000e+00> : vector<256x128xf32>
    %118 = tpu.matmul %116, %117, %cst_45 {dimension_numbers = #tpu.dot_dimension_numbers<[1], [0], [0], [1], [0, 0, 1, 1], [], []>} : vector<256x128xbf16>, vector<128x128xbf16>, vector<256x128xf32> -> vector<256x128xf32>
    %cst_46 = arith.constant 0.000000e+00 : f32
    %119 = vector.broadcast %cst_46 : f32 to vector<256x128xf32>
    %120 = arith.maximumf %118, %119 : vector<256x128xf32>
    %121 = arith.truncf %40 : vector<128x128xf32> to vector<128x128xbf16>
    %122 = arith.truncf %79 : vector<128x128xf32> to vector<128x128xbf16>
    %cst_47 = arith.constant dense<0.000000e+00> : vector<128x128xf32>
    %123 = tpu.matmul %121, %122, %cst_47 {dimension_numbers = #tpu.dot_dimension_numbers<[1], [1], [0], [0], [0, 0, 1, 0], [], []>} : vector<128x128xbf16>, vector<128x128xbf16>, vector<128x128xf32> -> vector<128x128xf32>
    %c0_48 = arith.constant 0 : index
    %c0_49 = arith.constant 0 : index
    %124 = vector.load %arg5[%c0_48, %c0_49] : memref<128x128xf32, #tpu.memory_space<vmem>>, vector<128x128xf32>
    tpu.vector_store %arg5[%c0_48, %c0_49], %123 {strides = array<i32>} : memref<128x128xf32, #tpu.memory_space<vmem>>, vector<128x128xf32>,
    %125 = vector.extract_strided_slice %120 {offsets = [0, 0], sizes = [128, 128], strides = [1, 1]} : vector<256x128xf32> to vector<128x128xf32>
    %126 = vector.extract_strided_slice %120 {offsets = [128, 0], sizes = [128, 128], strides = [1, 1]} : vector<256x128xf32> to vector<128x128xf32>
    %127 = arith.truncf %125 : vector<128x128xf32> to vector<128x128xbf16>
    %128 = arith.truncf %126 : vector<128x128xf32> to vector<128x128xbf16>
    %cst_50 = arith.constant dense<0.000000e+00> : vector<128x128xf32>
    %129 = tpu.matmul %127, %128, %cst_50 {dimension_numbers = #tpu.dot_dimension_numbers<[1], [1], [0], [0], [0, 0, 1, 0], [], []>} : vector<128x128xbf16>, vector<128x128xbf16>, vector<128x128xf32> -> vector<128x128xf32>
    %c0_51 = arith.constant 0 : index
    %c0_52 = arith.constant 0 : index
    %130 = vector.load %arg6[%c0_51, %c0_52] : memref<128x128xf32, #tpu.memory_space<vmem>>, vector<128x128xf32>
    tpu.vector_store %arg6[%c0_51, %c0_52], %129 {strides = array<i32>} : memref<128x128xf32, #tpu.memory_space<vmem>>, vector<128x128xf32>,
    return
  }
  func.func @transform_0(%arg0: i32) -> (i32, i32) {
    %c0_i32 = arith.constant 0 : i32
    %c0_i32_0 = arith.constant 0 : i32
    %c0_i32_1 = arith.constant 0 : i32
    return %c0_i32, %c0_i32_0 : i32, i32
  }
  func.func @transform_1(%arg0: i32) -> (i32, i32) {
    %c0_i32 = arith.constant 0 : i32
    %c0_i32_0 = arith.constant 0 : i32
    %c0_i32_1 = arith.constant 0 : i32
    return %c0_i32, %c0_i32_0 : i32, i32
  }
  func.func @transform_2(%arg0: i32) -> (i32, i32) {
    %c0_i32 = arith.constant 0 : i32
    %c0_i32_0 = arith.constant 0 : i32
    %c0_i32_1 = arith.constant 0 : i32
    return %c0_i32, %c0_i32_0 : i32, i32
  }
  func.func @transform_3(%arg0: i32) -> (i32, i32) {
    %c0_i32 = arith.constant 0 : i32
    %c0_i32_0 = arith.constant 0 : i32
    %c0_i32_1 = arith.constant 0 : i32
    return %c0_i32, %c0_i32_0 : i32, i32
  }
  func.func @transform_4(%arg0: i32) -> (i32, i32) {
    %c0_i32 = arith.constant 0 : i32
    %c0_i32_0 = arith.constant 0 : i32
    %c0_i32_1 = arith.constant 0 : i32
    return %c0_i32, %c0_i32_0 : i32, i32
  }
  func.func @transform_5(%arg0: i32) -> (i32, i32) {
    %c0_i32 = arith.constant 0 : i32
    %c0_i32_0 = arith.constant 0 : i32
    %c0_i32_1 = arith.constant 0 : i32
    return %c0_i32, %c0_i32_0 : i32, i32
  }
}

</mosaic_0001>

<bundles_post_ra>
// kernel: step.1
= control target key start
LH: loop header
LB: loop body
LE: loop exit
PB: predicated region body
PF: predicated region fallthrough
CT: control target
= control target key end

     0   :  { %s6965_s0 = inlined_call_operand.vmem [shape: f32[128,128], index: 0, kind: input, shape index: {}]   ;;  %s6966_s1 = inlined_call_operand.vmem [shape: f32[128,128], index: 1, kind: input, shape index: {}]   ;;  %s6967_s2 = inlined_call_operand.vmem [shape: f32[128,128], index: 2, kind: input, shape index: {}]   ;;  %s6968_s4 = inlined_call_operand.vmem [shape: f32[128,128], index: 4, kind: output, shape index: {0}]   ;;  %s6969_s3 = inlined_call_operand.vmem [shape: f32[128,128], index: 3, kind: input, shape index: {}]   ;;  %s6970_s5 = inlined_call_operand.vmem [shape: f32[128,128], index: 5, kind: output, shape index: {1}]  }
   0x1   :  { %v52_v0 = vld [vmem:[%s6965_s0] sm:$0xff]  ;;  %v53_v1 = vld [vmem:[%s6965_s0 + $0x8] sm:$0xff]  ;;  %v54_v2 = vld [vmem:[%s6965_s0 + $0x10] sm:$0xff] }
   0x2   :  { %v68_v3 = vpack.c.bf16 %v53_v1, %v52_v0  ;;  %v55_v4 = vld [vmem:[%s6965_s0 + $0x18] sm:$0xff]  ;;  %v56_v6 = vld [vmem:[%s6965_s0 + $0x20] sm:$0xff]  ;;  %v57_v7 = vld [vmem:[%s6965_s0 + $0x28] sm:$0xff] }
   0x3   :  { %v69_v5 = vpack.c.bf16 %v55_v4, %v54_v2  ;;  %v70_v8 = vpack.c.bf16 %v57_v7, %v56_v6  ;;  %v58_v9 = vld [vmem:[%s6965_s0 + $0x30] sm:$0xff]  ;;  %v59_v10 = vld [vmem:[%s6965_s0 + $0x38] sm:$0xff]  ;;  %v60_v12 = vld [vmem:[%s6965_s0 + $0x40] sm:$0xff] }
   0x4   :  { %3999 = vmatprep.subr.bf16.mxu0 %v68_v3  ;;  %4015 = vmatprep.mubr.bf16.mxu0 %v68_v3  ;;  %v71_v11 = vpack.c.bf16 %v59_v10, %v58_v9  ;;  %v61_v13 = vld [vmem:[%s6965_s0 + $0x48] sm:$0xff]  ;;  %v62_v15 = vld [vmem:[%s6965_s0 + $0x50] sm:$0xff]  ;;  %v63_v16 = vld [vmem:[%s6965_s0 + $0x58] sm:$0xff] }
   0x5   :  { %4000 = vmatpush3.bf16.xpose.msra.mxu0 %v68_v3  ;;  %4031 = vmatprep.subr.bf16.mxu1 %v68_v3  ;;  %v72_v14 = vpack.c.bf16 %v61_v13, %v60_v12  ;;  %v73_v17 = vpack.c.bf16 %v63_v16, %v62_v15  ;;  %v64_v18 = vld [vmem:[%s6965_s0 + $0x60] sm:$0xff]  ;;  %v65_v19 = vld [vmem:[%s6965_s0 + $0x68] sm:$0xff]  ;;  %v66_v21 = vld [vmem:[%s6965_s0 + $0x70] sm:$0xff] }
   0x6   :  { %4001 = vmatprep.subr.bf16.mxu0 %v69_v5  ;;  %4032 = vmatpush3.bf16.msra.mxu1 %v68_v3  ;;  %v74_v20 = vpack.c.bf16 %v65_v19, %v64_v18  ;;  %v67_v22 = vld [vmem:[%s6965_s0 + $0x78] sm:$0xff]  ;;  %v743_v40 = vld [vmem:[%s6966_s1] sm:$0xff]  ;;  %v744_v41 = vld [vmem:[%s6966_s1 + $0x8] sm:$0xff] }
   0x7   :  { %4033 = vmatprep.subr.bf16.mxu1 %v69_v5  ;;  %v75_v23 = vpack.c.bf16 %v67_v22, %v66_v21  ;;  %v745_v42 = vld [vmem:[%s6966_s1 + $0x10] sm:$0xff]  ;;  %v4570_v43 = vpack.c.bf16 %v744_v41, %v743_v40  ;;  %v746_v44 = vld [vmem:[%s6966_s1 + $0x18] sm:$0xff]  ;;  %v747_v46 = vld [vmem:[%s6966_s1 + $0x20] sm:$0xff] }
   0x8   :  { %v4575_v45 = vpack.c.bf16 %v746_v44, %v745_v42  ;;  %v748_v47 = vld [vmem:[%s6966_s1 + $0x28] sm:$0xff]  ;;  %v749_v49 = vld [vmem:[%s6966_s1 + $0x30] sm:$0xff]  ;;  %v750_v50 = vld [vmem:[%s6966_s1 + $0x38] sm:$0xff] }
   0x9   :  { %v4587_v48 = vpack.c.bf16 %v748_v47, %v747_v46  ;;  %v4597_v51 = vpack.c.bf16 %v750_v50, %v749_v49  ;;  %v751_v52 = vld [vmem:[%s6966_s1 + $0x40] sm:$0xff]  ;;  %v752_v53 = vld [vmem:[%s6966_s1 + $0x48] sm:$0xff]  ;;  %v753_v55 = vld [vmem:[%s6966_s1 + $0x50] sm:$0xff] }
   0xa   :  { %4034 = vmatpush3.bf16.msra.mxu1 %v69_v5  ;;  %v4607_v54 = vpack.c.bf16 %v752_v53, %v751_v52  ;;  %v754_v56 = vld [vmem:[%s6966_s1 + $0x58] sm:$0xff]  ;;  %v755_v58 = vld [vmem:[%s6966_s1 + $0x60] sm:$0xff]  ;;  %v756_v59 = vld [vmem:[%s6966_s1 + $0x68] sm:$0xff] }
   0xb   :  { %4035 = vmatprep.subr.bf16.mxu1 %v70_v8  ;;  %v4617_v57 = vpack.c.bf16 %v754_v56, %v753_v55  ;;  %v4627_v60 = vpack.c.bf16 %v756_v59, %v755_v58  ;;  %v757_v61 = vld [vmem:[%s6966_s1 + $0x70] sm:$0xff]  ;;  %v758_v62 = vld [vmem:[%s6966_s1 + $0x78] sm:$0xff] }
   0xc   :  { %v4637_v63 = vpack.c.bf16 %v758_v62, %v757_v61 }
   0xd   :  { %4002 = vmatpush3.bf16.xpose.msra.mxu0 %v69_v5  ;;  %7115 = vst [vmem:[#allocation3_spill] sm:$0xff] %v4627_v60 }
   0xe   :  { %4003 = vmatprep.subr.bf16.mxu0 %v70_v8  ;;  %4036 = vmatpush3.bf16.msra.mxu1 %v70_v8  ;;  %7116 = vst [vmem:[#allocation4_spill] sm:$0xff] %v4637_v63 }
   0xf   :  { %4037 = vmatprep.subr.bf16.mxu1 %v71_v11 }
  0x12   :  { %4038 = vmatpush3.bf16.msra.mxu1 %v71_v11 }
  0x13   :  { %4039 = vmatprep.subr.bf16.mxu1 %v72_v14 }
  0x15   :  { %4004 = vmatpush3.bf16.xpose.msra.mxu0 %v70_v8 }
  0x16   :  { %4005 = vmatprep.subr.bf16.mxu0 %v71_v11  ;;  %4040 = vmatpush3.bf16.msra.mxu1 %v72_v14 }
  0x17   :  { %4041 = vmatprep.subr.bf16.mxu1 %v73_v17 }
  0x1a   :  { %4042 = vmatpush3.bf16.msra.mxu1 %v73_v17 }
  0x1b   :  { %4043 = vmatprep.subr.bf16.mxu1 %v74_v20 }
  0x1d   :  { %4006 = vmatpush3.bf16.xpose.msra.mxu0 %v71_v11 }
  0x1e   :  { %4007 = vmatprep.subr.bf16.mxu0 %v72_v14  ;;  %4044 = vmatpush3.bf16.msra.mxu1 %v74_v20 }
  0x1f   :  { %4045 = vmatprep.subr.bf16.mxu1 %v75_v23 }
  0x22   :  { %4046 = vmatpush3.bf16.msra.mxu1 %v75_v23 }
  0x25   :  { %4008 = vmatpush3.bf16.xpose.msra.mxu0 %v72_v14 }
  0x26   :  { %4009 = vmatprep.subr.bf16.mxu0 %v73_v17 }
  0x2d   :  { %4010 = vmatpush3.bf16.xpose.msra.mxu0 %v73_v17 }
  0x2e   :  { %4011 = vmatprep.subr.bf16.mxu0 %v74_v20 }
  0x35   :  { %4012 = vmatpush3.bf16.xpose.msra.mxu0 %v74_v20 }
  0x36   :  { %4013 = vmatprep.subr.bf16.mxu0 %v75_v23 }
  0x3d   :  { %4014 = vmatpush3.bf16.xpose.msra.mxu0 %v75_v23 }
  0x3e   :  { %4095 = vmatprep.subr.bf16.mxu0 %v4570_v43 }
  0x44   :  { %4016 = vmatmul.mubr.bf16.vlgmr.msra.gmra.mrb[0].mxu0 %v69_v5 }
  0x45   :  { %4019 = vmatprep.mubr.bf16.mxu0 %v70_v8  ;;  %4096 = vmatpush3.bf16.xpose.msra.mxu0 %v4570_v43 }
  0x46   :  { %4097 = vmatprep.subr.bf16.mxu0 %v4575_v45 }
  0x4c   :  { %4020 = vmatmul.mubr.bf16.gmra.mrb[4].mxu0 %v71_v11 }
  0x4d   :  { %4023 = vmatprep.mubr.bf16.mxu0 %v72_v14  ;;  %4098 = vmatpush3.bf16.xpose.msra.mxu0 %v4575_v45 }
  0x4e   :  { %4099 = vmatprep.subr.bf16.mxu0 %v4587_v48 }
  0x54   :  { %4024 = vmatmul.mubr.bf16.gmra.mrb[8].mxu0 %v73_v17 }
  0x55   :  { %4027 = vmatprep.mubr.bf16.mxu0 %v74_v20  ;;  %4100 = vmatpush3.bf16.xpose.msra.mxu0 %v4587_v48 }
  0x56   :  { %4101 = vmatprep.subr.bf16.mxu0 %v4597_v51 }
  0x5c   :  { %4028 = vmatmul.mubr.bf16.gmra.mrb[12].mxu0 %v75_v23 }
  0x5d   :  { %4111 = vmatprep.mubr.bf16.mxu0 %v4570_v43  ;;  %4102 = vmatpush3.bf16.xpose.msra.mxu0 %v4597_v51 }
  0x5e   :  { %4103 = vmatprep.subr.bf16.mxu0 %v4607_v54 }
  0x65   :  { %4104 = vmatpush3.bf16.xpose.msra.mxu0 %v4607_v54 }
  0x66   :  { %4105 = vmatprep.subr.bf16.mxu0 %v4617_v57 }
  0x6d   :  { %4106 = vmatpush3.bf16.xpose.msra.mxu0 %v4617_v57 }
  0x6e   :  { %4107 = vmatprep.subr.bf16.mxu0 %v4627_v60 }
  0x75   :  { %4108 = vmatpush3.bf16.xpose.msra.mxu0 %v4627_v60 }
  0x76   :  { %4109 = vmatprep.subr.bf16.mxu0 %v4637_v63 }
  0x7d   :  { %4110 = vmatpush3.bf16.xpose.msra.mxu0 %v4637_v63 }
  0x84   :  { %4112 = vmatmul.mubr.bf16.vlgmr.msra.gmra.mrb[16].mxu0 %v4575_v45 }
  0x85   :  { %4115 = vmatprep.mubr.bf16.mxu0 %v4587_v48 }
  0x8c   :  { %4116 = vmatmul.mubr.bf16.gmra.mrb[20].mxu0 %v4597_v51 }
  0x8d   :  { %4119 = vmatprep.mubr.bf16.mxu0 %v4607_v54 }
  0x94   :  { %4120 = vmatmul.mubr.bf16.gmra.mrb[24].mxu0 %v4617_v57 }
  0x95   :  { %4123 = vmatprep.mubr.bf16.mxu0 %v4627_v60 }
  0x9c   :  { %4124 = vmatmul.mubr.bf16.gmra.mrb[28].mxu0 %v4637_v63 }
 0x117   :  { %v4513_v24 = vpop.f32.mrb[0].mxu0 }
 0x118   :  { %177 = vmax.xlane.f32.xlu1 %v4513_v24  ;;  %v4516_v25 = vpop.f32.mrb[1].mxu0 }
 0x119   :  { %173 = vmax.xlane.f32.xlu0 %v4516_v25  ;;  %v4519_v26 = vpop.f32.mrb[2].mxu0 }
 0x11a   :  { %v4521_v27 = vpop.f32.mrb[3].mxu0 }
 0x11c   :  { %179 = vmax.xlane.f32.xlu1 %v4519_v26 }
 0x11d   :  { %175 = vmax.xlane.f32.xlu0 %v4521_v27 }
 0x11f   :  { %v4525_v28 = vpop.f32.mrb[4].mxu0 }
 0x120   :  { %v4527_v29 = vpop.f32.mrb[5].mxu0 }
 0x121   :  { %181 = vmax.xlane.f32.xlu0 %v4527_v29  ;;  %v4530_v30 = vpop.f32.mrb[6].mxu0 }
 0x122   :  { %v4532_v31 = vpop.f32.mrb[7].mxu0 }
 0x123   :  { %183 = vmax.xlane.f32.xlu1 %v4532_v31 }
 0x125   :  { %185 = vmax.xlane.f32.xlu0 %v4525_v28 }
 0x127   :  { %187 = vmax.xlane.f32.xlu1 %v4530_v30  ;;  %v4537_v32 = vpop.f32.mrb[8].mxu0 }
 0x128   :  { %v4539_v33 = vpop.f32.mrb[9].mxu0 }
 0x129   :  { %189 = vmax.xlane.f32.xlu0 %v4539_v33  ;;  %v4542_v34 = vpop.f32.mrb[10].mxu0 }
 0x12a   :  { %v4544_v35 = vpop.f32.mrb[11].mxu0 }
 0x12b   :  { %191 = vmax.xlane.f32.xlu1 %v4544_v35 }
 0x12d   :  { %193 = vmax.xlane.f32.xlu0 %v4537_v32 }
 0x12f   :  { %195 = vmax.xlane.f32.xlu1 %v4542_v34  ;;  %v4549_v36 = vpop.f32.mrb[12].mxu0 }
 0x130   :  { %v4551_v37 = vpop.f32.mrb[13].mxu0 }
 0x131   :  { %197 = vmax.xlane.f32.xlu0 %v4551_v37  ;;  %v4554_v38 = vpop.f32.mrb[14].mxu0 }
 0x132   :  { %v4556_v39 = vpop.f32.mrb[15].mxu0 }
 0x133   :  { %199 = vmax.xlane.f32.xlu1 %v4556_v39 }
 0x135   :  { %201 = vmax.xlane.f32.xlu0 %v4549_v36 }
 0x137   :  { %203 = vmax.xlane.f32.xlu1 %v4554_v38 }
 0x1a5   :  { %v178_v0 = vpop.xlane.xlu1 %177 }
 0x1a6   :  { %v174_v1 = vpop.xlane.xlu0 %173  ;;  %vm207_vm1 = vcmp.ge.f32.partialorder %v4513_v24, %v178_v0 }
 0x1a7   :  { %vm205_vm0 = vcmp.ge.f32.partialorder %v4516_v25, %v174_v1  ;;  %v4657_v5 = vsel %vm207_vm1, -1e+30, %v4513_v24 }
 0x1a8   :  { %v4651_v2 = vsel %vm205_vm0, -1e+30, %v4516_v25 }
 0x1a9   :  { %237 = vmax.xlane.f32.xlu0 %v4651_v2  ;;  %v180_v3 = vpop.xlane.xlu1 %179 }
 0x1aa   :  { %v176_v4 = vpop.xlane.xlu0 %175  ;;  %vm208_vm3 = vcmp.ge.f32.partialorder %v4519_v26, %v180_v3 }
 0x1ab   :  { %vm206_vm2 = vcmp.ge.f32.partialorder %v4521_v27, %v176_v4  ;;  %v4670_v10 = vsel %vm208_vm3, -1e+30, %v4519_v26 }
 0x1ac   :  { %v4660_v6 = vsel %vm206_vm2, -1e+30, %v4521_v27 }
 0x1ad   :  { %241 = vmax.xlane.f32.xlu0 %v4657_v5  ;;  %239 = vmax.xlane.f32.xlu1 %v4660_v6 }
 0x1ae   :  { %v182_v7 = vpop.xlane.xlu0 %181 }
 0x1af   :  { %vm209_vm4 = vcmp.ge.f32.partialorder %v4527_v29, %v182_v7 }
 0x1b0   :  { %v184_v8 = vpop.xlane.xlu1 %183  ;;  %v4667_v9 = vsel %vm209_vm4, -1e+30, %v4527_v29 }
 0x1b1   :  { %vm210_vm5 = vcmp.ge.f32.partialorder %v4532_v31, %v184_v8  ;;  %245 = vmax.xlane.f32.xlu0 %v4667_v9  ;;  %243 = vmax.xlane.f32.xlu1 %v4670_v10 }
 0x1b2   :  { %v186_v11 = vpop.xlane.xlu0 %185  ;;  %v4680_v14 = vsel %vm210_vm5, -1e+30, %v4532_v31 }
 0x1b3   :  { %vm211_vm6 = vcmp.ge.f32.partialorder %v4525_v28, %v186_v11 }
 0x1b4   :  { %v188_v12 = vpop.xlane.xlu1 %187  ;;  %v4677_v13 = vsel %vm211_vm6, -1e+30, %v4525_v28 }
 0x1b5   :  { %vm212_vm7 = vcmp.ge.f32.partialorder %v4530_v30, %v188_v12  ;;  %249 = vmax.xlane.f32.xlu0 %v4677_v13  ;;  %247 = vmax.xlane.f32.xlu1 %v4680_v14 }
 0x1b6   :  { %v190_v15 = vpop.xlane.xlu0 %189  ;;  %v4690_v18 = vsel %vm212_vm7, -1e+30, %v4530_v30 }
 0x1b7   :  { %vm213_vm8 = vcmp.ge.f32.partialorder %v4539_v33, %v190_v15 }
 0x1b8   :  { %v192_v16 = vpop.xlane.xlu1 %191  ;;  %v4687_v17 = vsel %vm213_vm8, -1e+30, %v4539_v33 }
 0x1b9   :  { %vm214_vm9 = vcmp.ge.f32.partialorder %v4544_v35, %v192_v16  ;;  %253 = vmax.xlane.f32.xlu0 %v4687_v17  ;;  %251 = vmax.xlane.f32.xlu1 %v4690_v18 }
 0x1ba   :  { %v194_v19 = vpop.xlane.xlu0 %193  ;;  %v4700_v22 = vsel %vm214_vm9, -1e+30, %v4544_v35 }
 0x1bb   :  { %vm215_vm10 = vcmp.ge.f32.partialorder %v4537_v32, %v194_v19 }
 0x1bc   :  { %v196_v20 = vpop.xlane.xlu1 %195  ;;  %v4697_v21 = vsel %vm215_vm10, -1e+30, %v4537_v32 }
 0x1bd   :  { %vm216_vm11 = vcmp.ge.f32.partialorder %v4542_v34, %v196_v20  ;;  %257 = vmax.xlane.f32.xlu0 %v4697_v21  ;;  %255 = vmax.xlane.f32.xlu1 %v4700_v22 }
 0x1be   :  { %v198_v23 = vpop.xlane.xlu0 %197  ;;  %v4710_v42 = vsel %vm216_vm11, -1e+30, %v4542_v34 }
 0x1bf   :  { %vm217_vm12 = vcmp.ge.f32.partialorder %v4551_v37, %v198_v23 }
 0x1c0   :  { %v200_v40 = vpop.xlane.xlu1 %199  ;;  %v4707_v41 = vsel %vm217_vm12, -1e+30, %v4551_v37 }
 0x1c1   :  { %vm218_vm13 = vcmp.ge.f32.partialorder %v4556_v39, %v200_v40  ;;  %261 = vmax.xlane.f32.xlu0 %v4707_v41  ;;  %259 = vmax.xlane.f32.xlu1 %v4710_v42  ;;  %v4809_v40 = vpop.f32.mrb[16].mxu0 }
 0x1c2   :  { %v202_v44 = vpop.xlane.xlu0 %201  ;;  %v4720_v49 = vsel %vm218_vm13, -1e+30, %v4556_v39 }
 0x1c3   :  { %vm219_vm14 = vcmp.ge.f32.partialorder %v4549_v36, %v202_v44 }
 0x1c4   :  { %v204_v46 = vpop.xlane.xlu1 %203  ;;  %v4717_v47 = vsel %vm219_vm14, -1e+30, %v4549_v36 }
 0x1c5   :  { %vm220_vm15 = vcmp.ge.f32.partialorder %v4554_v38, %v204_v46  ;;  %265 = vmax.xlane.f32.xlu0 %v4717_v47  ;;  %263 = vmax.xlane.f32.xlu1 %v4720_v49 }
 0x1c6   :  { %v4726_v50 = vsel %vm220_vm15, -1e+30, %v4554_v38 }
 0x1c9   :  { %267 = vmax.xlane.f32.xlu1 %v4726_v50 }
 0x236   :  { %v238_v52 = vpop.xlane.xlu0 %237 }
 0x237   :  { %vm269_vm0 = vcmp.ge.f32.partialorder %v4651_v2, %v238_v52 }
 0x238   :  { %v4731_v53 = vsel %vm269_vm0, -1e+30, %v4651_v2 }
 0x239   :  { %301 = vmax.xlane.f32.xlu0 %v4731_v53 }
 0x23a   :  { %v242_v55 = vpop.xlane.xlu0 %241  ;;  %v240_v56 = vpop.xlane.xlu1 %239 }
 0x23b   :  { %vm271_vm1 = vcmp.ge.f32.partialorder %v4657_v5, %v242_v55  ;;  %vm270_vm2 = vcmp.ge.f32.partialorder %v4660_v6, %v240_v56 }
 0x23c   :  { %v4737_v58 = vsel %vm271_vm1, -1e+30, %v4657_v5  ;;  %v4740_v59 = vsel %vm270_vm2, -1e+30, %v4660_v6 }
 0x23d   :  { %305 = vmax.xlane.f32.xlu0 %v4737_v58  ;;  %303 = vmax.xlane.f32.xlu1 %v4740_v59 }
 0x23e   :  { %v246_v61 = vpop.xlane.xlu0 %245  ;;  %v244_v62 = vpop.xlane.xlu1 %243 }
 0x23f   :  { %vm273_vm3 = vcmp.ge.f32.partialorder %v4667_v9, %v246_v61  ;;  %vm272_vm4 = vcmp.ge.f32.partialorder %v4670_v10, %v244_v62 }
 0x240   :  { %v4747_v0 = vsel %vm273_vm3, -1e+30, %v4667_v9  ;;  %v4750_v1 = vsel %vm272_vm4, -1e+30, %v4670_v10 }
 0x241   :  { %309 = vmax.xlane.f32.xlu0 %v4747_v0  ;;  %307 = vmax.xlane.f32.xlu1 %v4750_v1 }
 0x242   :  { %v250_v2 = vpop.xlane.xlu0 %249  ;;  %v248_v3 = vpop.xlane.xlu1 %247 }
 0x243   :  { %vm275_vm5 = vcmp.ge.f32.partialorder %v4677_v13, %v250_v2  ;;  %vm274_vm6 = vcmp.ge.f32.partialorder %v4680_v14, %v248_v3 }
 0x244   :  { %v4757_v4 = vsel %vm275_vm5, -1e+30, %v4677_v13  ;;  %v4760_v5 = vsel %vm274_vm6, -1e+30, %v4680_v14 }
 0x245   :  { %313 = vmax.xlane.f32.xlu0 %v4757_v4  ;;  %311 = vmax.xlane.f32.xlu1 %v4760_v5 }
 0x246   :  { %v254_v6 = vpop.xlane.xlu0 %253  ;;  %v252_v7 = vpop.xlane.xlu1 %251 }
 0x247   :  { %vm277_vm7 = vcmp.ge.f32.partialorder %v4687_v17, %v254_v6  ;;  %vm276_vm8 = vcmp.ge.f32.partialorder %v4690_v18, %v252_v7 }
 0x248   :  { %v4767_v8 = vsel %vm277_vm7, -1e+30, %v4687_v17  ;;  %v4770_v9 = vsel %vm276_vm8, -1e+30, %v4690_v18 }
 0x249   :  { %317 = vmax.xlane.f32.xlu0 %v4767_v8  ;;  %315 = vmax.xlane.f32.xlu1 %v4770_v9 }
 0x24a   :  { %v258_v10 = vpop.xlane.xlu0 %257  ;;  %v256_v11 = vpop.xlane.xlu1 %255 }
 0x24b   :  { %vm279_vm9 = vcmp.ge.f32.partialorder %v4697_v21, %v258_v10  ;;  %vm278_vm10 = vcmp.ge.f32.partialorder %v4700_v22, %v256_v11 }
 0x24c   :  { %v4777_v12 = vsel %vm279_vm9, -1e+30, %v4697_v21  ;;  %v4780_v13 = vsel %vm278_vm10, -1e+30, %v4700_v22 }
 0x24d   :  { %321 = vmax.xlane.f32.xlu0 %v4777_v12  ;;  %319 = vmax.xlane.f32.xlu1 %v4780_v13 }
 0x24e   :  { %v262_v14 = vpop.xlane.xlu0 %261  ;;  %v260_v15 = vpop.xlane.xlu1 %259 }
 0x24f   :  { %vm281_vm11 = vcmp.ge.f32.partialorder %v4707_v41, %v262_v14  ;;  %vm280_vm12 = vcmp.ge.f32.partialorder %v4710_v42, %v260_v15 }
 0x250   :  { %v4787_v16 = vsel %vm281_vm11, -1e+30, %v4707_v41  ;;  %v4790_v17 = vsel %vm280_vm12, -1e+30, %v4710_v42  ;;  %v4811_v41 = vpop.f32.mrb[17].mxu0 }
 0x251   :  { %325 = vmax.xlane.f32.xlu0 %v4787_v16  ;;  %323 = vmax.xlane.f32.xlu1 %v4790_v17  ;;  %v4813_v42 = vpop.f32.mrb[18].mxu0 }
 0x252   :  { %v266_v18 = vpop.xlane.xlu0 %265  ;;  %v264_v19 = vpop.xlane.xlu1 %263  ;;  %7117 = vst [vmem:[#allocation5_spill] sm:$0xff] %v4813_v42 }
 0x253   :  { %vm283_vm13 = vcmp.ge.f32.partialorder %v4717_v47, %v266_v18  ;;  %vm282_vm14 = vcmp.ge.f32.partialorder %v4720_v49, %v264_v19  ;;  %v4815_v44 = vpop.f32.mrb[19].mxu0 }
 0x254   :  { %v4797_v20 = vsel %vm283_vm13, -1e+30, %v4717_v47  ;;  %v4800_v21 = vsel %vm282_vm14, -1e+30, %v4720_v49  ;;  %v4817_v46 = vpop.f32.mrb[20].mxu0 }
 0x255   :  { %329 = vmax.xlane.f32.xlu0 %v4797_v20  ;;  %327 = vmax.xlane.f32.xlu1 %v4800_v21  ;;  %7118 = vst [vmem:[#allocation6_spill] sm:$0xff] %v4817_v46  ;;  %v4819_v47 = vpop.f32.mrb[21].mxu0 }
 0x256   :  { %v268_v22 = vpop.xlane.xlu1 %267  ;;  %v4821_v49 = vpop.f32.mrb[22].mxu0 }
 0x257   :  { %vm284_vm15 = vcmp.ge.f32.partialorder %v4726_v50, %v268_v22  ;;  %7119 = vst [vmem:[#allocation7_spill] sm:$0xff] %v4821_v49  ;;  %v4823_v52 = vpop.f32.mrb[23].mxu0 }
 0x258   :  { %v4806_v23 = vsel %vm284_vm15, -1e+30, %v4726_v50  ;;  %7120 = vst [vmem:[#allocation8_spill] sm:$0xff] %v4823_v52  ;;  %v4825_v50 = vpop.f32.mrb[24].mxu0 }
 0x259   :  { %331 = vmax.xlane.f32.xlu1 %v4806_v23  ;;  %7121 = vst [vmem:[#allocation9_spill] sm:$0xff] %v4825_v50  ;;  %v4827_v55 = vpop.f32.mrb[25].mxu0 }
 0x25a   :  { %7122 = vst [vmem:[#allocation10_spill] sm:$0xff] %v4827_v55  ;;  %v4829_v56 = vpop.f32.mrb[26].mxu0 }
 0x25b   :  { %7123 = vst [vmem:[#allocation11_spill] sm:$0xff] %v4829_v56  ;;  %v4831_v61 = vpop.f32.mrb[27].mxu0 }
 0x25c   :  { %7124 = vst [vmem:[#allocation12_spill] sm:$0xff] %v4831_v61  ;;  %v4833_v62 = vpop.f32.mrb[28].mxu0 }
 0x25d   :  { %7125 = vst [vmem:[#allocation13_spill] sm:$0xff] %v4833_v62  ;;  %v4835_v2 = vpop.f32.mrb[29].mxu0 }
 0x25e   :  { %7126 = vst [vmem:[#allocation14_spill] sm:$0xff] %v4835_v2  ;;  %v4837_v3 = vpop.f32.mrb[30].mxu0 }
 0x25f   :  { %7127 = vst [vmem:[#allocation15_spill] sm:$0xff] %v4837_v3  ;;  %v4839_v6 = vpop.f32.mrb[31].mxu0 }
 0x260   :  { %7128 = vst [vmem:[#allocation16_spill] sm:$0xff] %v4839_v6 }
 0x2c6   :  { %v302_v7 = vpop.xlane.xlu0 %301 }
 0x2c7   :  { %vm333_vm1 = vcmp.ge.f32.partialorder %v4731_v53, %v302_v7 }
 0x2c8   :  { %v349_v19 = vsel %vm333_vm1, -1e+30, %v4731_v53 }
 0x2ca   :  { %v306_v10 = vpop.xlane.xlu0 %305  ;;  %v304_v11 = vpop.xlane.xlu1 %303 }
 0x2cb   :  { %vm335_vm0 = vcmp.ge.f32.partialorder %v4737_v58, %v306_v10  ;;  %vm334_vm3 = vcmp.ge.f32.partialorder %v4740_v59, %v304_v11 }
 0x2cc   :  { %v351_v14 = vsel %vm335_vm0, -1e+30, %v4737_v58  ;;  %v350_v7 = vsel %vm334_vm3, -1e+30, %v4740_v59 }
 0x2cd   :  { %369 = vmax.xlane.f32.xlu0 %v351_v14 }
 0x2ce   :  { %v310_v15 = vpop.xlane.xlu0 %309  ;;  %v308_v18 = vpop.xlane.xlu1 %307 }
 0x2cf   :  { %vm336_vm2 = vcmp.ge.f32.partialorder %v4750_v1, %v308_v18  ;;  %vm337_vm5 = vcmp.ge.f32.partialorder %v4747_v0, %v310_v15 }
 0x2d0   :  { %v352_v22 = vsel %vm336_vm2, -1e+30, %v4750_v1  ;;  %v353_v1 = vsel %vm337_vm5, -1e+30, %v4747_v0 }
 0x2d1   :  { %365 = vmax.xlane.f32.xlu0 %v349_v19  ;;  %371 = vmax.xlane.f32.xlu1 %v352_v22 }
 0x2d2   :  { %v314_v63 = vpop.xlane.xlu0 %313  ;;  %v312_v60 = vpop.xlane.xlu1 %311 }
 0x2d3   :  { %vm339_vm4 = vcmp.ge.f32.partialorder %v4757_v4, %v314_v63  ;;  %vm338_vm7 = vcmp.ge.f32.partialorder %v4760_v5, %v312_v60 }
 0x2d4   :  { %v355_v58 = vsel %vm339_vm4, -1e+30, %v4757_v4  ;;  %v354_v14 = vsel %vm338_vm7, -1e+30, %v4760_v5 }
 0x2d5   :  { %377 = vmax.xlane.f32.xlu0 %v355_v58  ;;  %367 = vmax.xlane.f32.xlu1 %v350_v7  ;;  %v6980_v7 = vmov 1.0|1.0  }
 0x2d6   :  { %v318_v10 = vpop.xlane.xlu0 %317  ;;  %v316_v53 = vpop.xlane.xlu1 %315 }
 0x2d7   :  { %vm340_vm6 = vcmp.ge.f32.partialorder %v4770_v9, %v316_v53  ;;  %vm341_vm9 = vcmp.ge.f32.partialorder %v4767_v8, %v318_v10 }
 0x2d8   :  { %v356_v11 = vsel %vm340_vm6, -1e+30, %v4770_v9  ;;  %v357_v9 = vsel %vm341_vm9, -1e+30, %v4767_v8 }
 0x2d9   :  { %373 = vmax.xlane.f32.xlu0 %v353_v1  ;;  %379 = vmax.xlane.f32.xlu1 %v356_v11 }
 0x2da   :  { %v322_v63 = vpop.xlane.xlu0 %321  ;;  %v320_v4 = vpop.xlane.xlu1 %319 }
 0x2db   :  { %vm343_vm8 = vcmp.ge.f32.partialorder %v4777_v12, %v322_v63  ;;  %vm342_vm11 = vcmp.ge.f32.partialorder %v4780_v13, %v320_v4 }
 0x2dc   :  { %v359_v59 = vsel %vm343_vm8, -1e+30, %v4777_v12  ;;  %v358_v19 = vsel %vm342_vm11, -1e+30, %v4780_v13 }
 0x2dd   :  { %385 = vmax.xlane.f32.xlu0 %v359_v59  ;;  %375 = vmax.xlane.f32.xlu1 %v354_v14 }
 0x2de   :  { %v326_v15 = vpop.xlane.xlu0 %325  ;;  %v324_v0 = vpop.xlane.xlu1 %323 }
 0x2df   :  { %vm344_vm10 = vcmp.ge.f32.partialorder %v4790_v17, %v324_v0  ;;  %vm345_vm13 = vcmp.ge.f32.partialorder %v4787_v16, %v326_v15 }
 0x2e0   :  { %v360_v60 = vsel %vm344_vm10, -1e+30, %v4790_v17  ;;  %v361_v8 = vsel %vm345_vm13, -1e+30, %v4787_v16 }
 0x2e1   :  { %381 = vmax.xlane.f32.xlu0 %v357_v9  ;;  %387 = vmax.xlane.f32.xlu1 %v360_v60 }
 0x2e2   :  { %v330_v18 = vpop.xlane.xlu0 %329  ;;  %v328_v12 = vpop.xlane.xlu1 %327 }
 0x2e3   :  { %vm347_vm12 = vcmp.ge.f32.partialorder %v4797_v20, %v330_v18  ;;  %vm346_vm15 = vcmp.ge.f32.partialorder %v4800_v21, %v328_v12 }
 0x2e4   :  { %v363_v5 = vsel %vm347_vm12, -1e+30, %v4797_v20  ;;  %v362_v58 = vsel %vm346_vm15, -1e+30, %v4800_v21 }
 0x2e5   :  { %393 = vmax.xlane.f32.xlu0 %v363_v5  ;;  %383 = vmax.xlane.f32.xlu1 %v358_v19 }
 0x2e6   :  { %v332_v22 = vpop.xlane.xlu1 %331 }
 0x2e7   :  { %vm348_vm14 = vcmp.ge.f32.partialorder %v4806_v23, %v332_v22 }
 0x2e8   :  { %v364_v17 = vsel %vm348_vm14, -1e+30, %v4806_v23 }
 0x2e9   :  { %389 = vmax.xlane.f32.xlu0 %v361_v8  ;;  %395 = vmax.xlane.f32.xlu1 %v364_v17 }
 0x2ed   :  { %391 = vmax.xlane.f32.xlu1 %v362_v58  ;;  %864 = vmax.xlane.f32.xlu0 %v4811_v41 }
 0x2f1   :  { %868 = vmax.xlane.f32.xlu0 %v4809_v40  ;;  %866 = vmax.xlane.f32.xlu1 %v4815_v44 }
 0x2f5   :  { %870 = vmax.xlane.f32.xlu1 %v4813_v42  ;;  %872 = vmax.xlane.f32.xlu0 %v4819_v47 }
 0x2f9   :  { %876 = vmax.xlane.f32.xlu0 %v4817_v46  ;;  %874 = vmax.xlane.f32.xlu1 %v4823_v52 }
 0x2fd   :  { %878 = vmax.xlane.f32.xlu1 %v4821_v49  ;;  %880 = vmax.xlane.f32.xlu0 %v4827_v55 }
 0x301   :  { %884 = vmax.xlane.f32.xlu0 %v4825_v50  ;;  %882 = vmax.xlane.f32.xlu1 %v4831_v61 }
 0x305   :  { %886 = vmax.xlane.f32.xlu1 %v4829_v56  ;;  %888 = vmax.xlane.f32.xlu0 %v4835_v2 }
 0x309   :  { %892 = vmax.xlane.f32.xlu0 %v4833_v62  ;;  %890 = vmax.xlane.f32.xlu1 %v4839_v6 }
 0x30d   :  { %894 = vmax.xlane.f32.xlu1 %v4837_v3 }
 0x35a   :  { %v4889_v13 = vpop.xlane.xlu0 %369 }
 0x35b   :  { %vm399_vm0 = vcmp.ge.f32.partialorder %v4513_v24, %v4889_v13  ;;  %v20_v24 = vld [vmem:[%s6967_s2] sm:$0xff]  ;;  %v21_v13 = vld [vmem:[%s6967_s2 + $0x8] sm:$0xff] }
 0x35e   :  { %v4891_v16 = vpop.xlane.xlu0 %365  ;;  %v4893_v20 = vpop.xlane.xlu1 %371 }
 0x35f   :  { %vm400_vm1 = vcmp.ge.f32.partialorder %v4519_v26, %v4893_v20  ;;  %vm397_vm3 = vcmp.ge.f32.partialorder %v4516_v25, %v4891_v16  ;;  %v22_v16 = vld [vmem:[%s6967_s2 + $0x10] sm:$0xff]  ;;  %v23_v20 = vld [vmem:[%s6967_s2 + $0x18] sm:$0xff] }
 0x360   :  { %vm3513_vm2 = vmpackc.low %vm400_vm1, %vm399_vm0 }
 0x362   :  { %v4905_v21 = vpop.xlane.xlu0 %377  ;;  %v4907_v23 = vpop.xlane.xlu1 %367 }
 0x363   :  { %vm398_vm4 = vcmp.ge.f32.partialorder %v4521_v27, %v4907_v23  ;;  %vm403_vm6 = vcmp.ge.f32.partialorder %v4525_v28, %v4905_v21  ;;  %v24_v21 = vld [vmem:[%s6967_s2 + $0x20] sm:$0xff]  ;;  %v25_v23 = vld [vmem:[%s6967_s2 + $0x28] sm:$0xff] }
 0x364   :  { %vm3511_vm5 = vmpackc.low %vm398_vm4, %vm397_vm3 }
 0x365   :  { %4047 = vmatprep.mubr.msk.bf16.mxu1 %vm3511_vm5, %v6980_v7 }
 0x366   :  { %v4920_v10 = vpop.xlane.xlu0 %373  ;;  %4048 = vmatmul.mubr.msk.bf16.vlgmr.msra.gmra.mrb[0].mxu1 %vm3513_vm2, %v6980_v7  ;;  %v4923_v53 = vpop.xlane.xlu1 %379 }
 0x367   :  { %vm404_vm7 = vcmp.ge.f32.partialorder %v4530_v30, %v4923_v53  ;;  %vm401_vm9 = vcmp.ge.f32.partialorder %v4527_v29, %v4920_v10  ;;  %v26_v53 = vld [vmem:[%s6967_s2 + $0x30] sm:$0xff] }
 0x368   :  { %vm3517_vm8 = vmpackc.low %vm404_vm7, %vm403_vm6 }
 0x36a   :  { %v4935_v1 = vpop.xlane.xlu0 %385  ;;  %v4937_v11 = vpop.xlane.xlu1 %375 }
 0x36b   :  { %vm402_vm10 = vcmp.ge.f32.partialorder %v4532_v31, %v4937_v11  ;;  %vm407_vm12 = vcmp.ge.f32.partialorder %v4537_v32, %v4935_v1  ;;  %v27_v32 = vld [vmem:[%s6967_s2 + $0x38] sm:$0xff] }
 0x36c   :  { %vm3515_vm11 = vmpackc.low %vm402_vm10, %vm401_vm9 }
 0x36d   :  { %4051 = vmatprep.mubr.msk.bf16.mxu1 %vm3515_vm11, %v6980_v7 }
 0x36e   :  { %v4950_v63 = vpop.xlane.xlu0 %381  ;;  %4052 = vmatmul.mubr.msk.bf16.gmra.mrb[4].mxu1 %vm3517_vm8, %v6980_v7  ;;  %v4953_v4 = vpop.xlane.xlu1 %387 }
 0x36f   :  { %vm6976_vm13 = vcmp.ge.f32.partialorder %v4542_v34, %v4953_v4  ;;  %vm6977_vm15 = vcmp.ge.f32.partialorder %v4539_v33, %v4950_v63 }
 0x370   :  { %vm3521_vm14 = vmpackc.low %vm6976_vm13, %vm407_vm12 }
 0x372   :  { %v4965_v59 = vpop.xlane.xlu0 %393  ;;  %v4967_v14 = vpop.xlane.xlu1 %383 }
 0x373   :  { %vm6975_vm2 = vcmp.ge.f32.partialorder %v4544_v35, %v4967_v14  ;;  %vm6979_vm8 = vcmp.ge.f32.partialorder %v4549_v36, %v4965_v59 }
 0x374   :  { %vm3519_vm5 = vmpackc.low %vm6975_vm2, %vm6977_vm15 }
 0x375   :  { %4055 = vmatprep.mubr.msk.bf16.mxu1 %vm3519_vm5, %v6980_v7 }
 0x376   :  { %v4980_v15 = vpop.xlane.xlu0 %389  ;;  %4056 = vmatmul.mubr.msk.bf16.gmra.mrb[8].mxu1 %vm3521_vm14, %v6980_v7  ;;  %v4983_v0 = vpop.xlane.xlu1 %395 }
 0x377   :  { %vm6978_vm11 = vcmp.ge.f32.partialorder %v4554_v38, %v4983_v0  ;;  %vm409_vm14 = vcmp.ge.f32.partialorder %v4551_v37, %v4980_v15 }
 0x378   :  { %vm3525_vm2 = vmpackc.low %vm6978_vm11, %vm6979_vm8 }
 0x37a   :  { %v4995_v9 = vpop.xlane.xlu1 %391  ;;  %v865_v60 = vpop.xlane.xlu0 %864 }
 0x37b   :  { %vm410_vm5 = vcmp.ge.f32.partialorder %v4556_v39, %v4995_v9  ;;  %vm896_vm13 = vcmp.ge.f32.partialorder %v4811_v41, %v865_v60 }
 0x37c   :  { %vm3523_vm15 = vmpackc.low %vm410_vm5, %vm409_vm14  ;;  %v5009_v18 = vsel %vm896_vm13, -1e+30, %v4811_v41 }
 0x37d   :  { %4059 = vmatprep.mubr.msk.bf16.mxu1 %vm3523_vm15, %v6980_v7  ;;  %928 = vmax.xlane.f32.xlu0 %v5009_v18 }
 0x37e   :  { %4060 = vmatmul.mubr.msk.bf16.gmra.mrb[12].mxu1 %vm3525_vm2, %v6980_v7  ;;  %v869_v12 = vpop.xlane.xlu0 %868  ;;  %v867_v5 = vpop.xlane.xlu1 %866 }
 0x37f   :  { %vm898_vm11 = vcmp.ge.f32.partialorder %v4809_v40, %v869_v12  ;;  %vm897_vm8 = vcmp.ge.f32.partialorder %v4815_v44, %v867_v5 }
 0x380   :  { %v5017_v19 = vsel %vm898_vm11, -1e+30, %v4809_v40  ;;  %v5020_v22 = vsel %vm897_vm8, -1e+30, %v4815_v44 }
 0x381   :  { %932 = vmax.xlane.f32.xlu0 %v5017_v19  ;;  %930 = vmax.xlane.f32.xlu1 %v5020_v22 }
 0x382   :  { %v871_v8 = vpop.xlane.xlu1 %870  ;;  %v873_v17 = vpop.xlane.xlu0 %872 }
 0x383   :  { %vm899_vm13 = vcmp.ge.f32.partialorder %v4813_v42, %v871_v8  ;;  %vm900_vm15 = vcmp.ge.f32.partialorder %v4819_v47, %v873_v17 }
 0x384   :  { %v5027_v58 = vsel %vm900_vm15, -1e+30, %v4819_v47  ;;  %v5030_v60 = vsel %vm899_vm13, -1e+30, %v4813_v42 }
 0x385   :  { %936 = vmax.xlane.f32.xlu0 %v5027_v58  ;;  %934 = vmax.xlane.f32.xlu1 %v5030_v60 }
 0x386   :  { %v877_v12 = vpop.xlane.xlu0 %876  ;;  %v875_v5 = vpop.xlane.xlu1 %874 }
 0x387   :  { %vm902_vm2 = vcmp.ge.f32.partialorder %v4817_v46, %v877_v12  ;;  %vm901_vm8 = vcmp.ge.f32.partialorder %v4823_v52, %v875_v5 }
 0x388   :  { %v5037_v8 = vsel %vm902_vm2, -1e+30, %v4817_v46  ;;  %v5040_v17 = vsel %vm901_vm8, -1e+30, %v4823_v52 }
 0x389   :  { %940 = vmax.xlane.f32.xlu0 %v5037_v8  ;;  %938 = vmax.xlane.f32.xlu1 %v5040_v17 }
 0x38a   :  { %v879_v7 = vpop.xlane.xlu1 %878  ;;  %v881_v42 = vpop.xlane.xlu0 %880 }
 0x38b   :  { %vm903_vm11 = vcmp.ge.f32.partialorder %v4821_v49, %v879_v7  ;;  %vm904_vm13 = vcmp.ge.f32.partialorder %v4827_v55, %v881_v42 }
 0x38c   :  { %v5047_v12 = vsel %vm904_vm13, -1e+30, %v4827_v55  ;;  %v5050_v5 = vsel %vm903_vm11, -1e+30, %v4821_v49 }
 0x38d   :  { %944 = vmax.xlane.f32.xlu0 %v5047_v12  ;;  %942 = vmax.xlane.f32.xlu1 %v5050_v5 }
 0x38e   :  { %v885_v52 = vpop.xlane.xlu0 %884  ;;  %v883_v46 = vpop.xlane.xlu1 %882 }
 0x38f   :  { %vm906_vm15 = vcmp.ge.f32.partialorder %v4825_v50, %v885_v52  ;;  %vm905_vm2 = vcmp.ge.f32.partialorder %v4831_v61, %v883_v46 }
 0x390   :  { %v5057_v7 = vsel %vm906_vm15, -1e+30, %v4825_v50  ;;  %v5060_v42 = vsel %vm905_vm2, -1e+30, %v4831_v61 }
 0x391   :  { %948 = vmax.xlane.f32.xlu0 %v5057_v7  ;;  %946 = vmax.xlane.f32.xlu1 %v5060_v42 }
 0x392   :  { %v887_v49 = vpop.xlane.xlu1 %886  ;;  %v889_v55 = vpop.xlane.xlu0 %888 }
 0x393   :  { %vm907_vm8 = vcmp.ge.f32.partialorder %v4829_v56, %v887_v49  ;;  %vm908_vm11 = vcmp.ge.f32.partialorder %v4835_v2, %v889_v55 }
 0x394   :  { %v5067_v52 = vsel %vm908_vm11, -1e+30, %v4835_v2  ;;  %v5070_v46 = vsel %vm907_vm8, -1e+30, %v4829_v56 }
 0x395   :  { %952 = vmax.xlane.f32.xlu0 %v5067_v52  ;;  %950 = vmax.xlane.f32.xlu1 %v5070_v46 }
 0x396   :  { %v893_v61 = vpop.xlane.xlu0 %892  ;;  %v891_v50 = vpop.xlane.xlu1 %890 }
 0x397   :  { %vm910_vm13 = vcmp.ge.f32.partialorder %v4833_v62, %v893_v61  ;;  %vm909_vm15 = vcmp.ge.f32.partialorder %v4839_v6, %v891_v50 }
 0x398   :  { %v5077_v49 = vsel %vm910_vm13, -1e+30, %v4833_v62  ;;  %v5080_v55 = vsel %vm909_vm15, -1e+30, %v4839_v6 }
 0x399   :  { %956 = vmax.xlane.f32.xlu0 %v5077_v49  ;;  %954 = vmax.xlane.f32.xlu1 %v5080_v55 }
 0x39a   :  { %v895_v56 = vpop.xlane.xlu1 %894 }
 0x39b   :  { %vm911_vm2 = vcmp.ge.f32.partialorder %v4837_v3, %v895_v56 }
 0x39c   :  { %v5086_v2 = vsel %vm911_vm2, -1e+30, %v4837_v3 }
 0x39d   :  { %958 = vmax.xlane.f32.xlu1 %v5086_v2 }
 0x40a   :  { %v929_v61 = vpop.xlane.xlu0 %928 }
 0x40b   :  { %vm960_vm8 = vcmp.ge.f32.partialorder %v5009_v18, %v929_v61 }
 0x40c   :  { %v5091_v50 = vsel %vm960_vm8, -1e+30, %v5009_v18 }
 0x40d   :  { %992 = vmax.xlane.f32.xlu0 %v5091_v50 }
 0x40e   :  { %v933_v62 = vpop.xlane.xlu0 %932  ;;  %v931_v6 = vpop.xlane.xlu1 %930 }
 0x40f   :  { %vm962_vm11 = vcmp.ge.f32.partialorder %v5017_v19, %v933_v62  ;;  %vm961_vm13 = vcmp.ge.f32.partialorder %v5020_v22, %v931_v6 }
 0x410   :  { %v5097_v56 = vsel %vm962_vm11, -1e+30, %v5017_v19  ;;  %v5100_v3 = vsel %vm961_vm13, -1e+30, %v5020_v22 }
 0x411   :  { %996 = vmax.xlane.f32.xlu0 %v5097_v56  ;;  %994 = vmax.xlane.f32.xlu1 %v5100_v3 }
 0x412   :  { %v937_v18 = vpop.xlane.xlu0 %936  ;;  %v935_v61 = vpop.xlane.xlu1 %934 }
 0x413   :  { %vm964_vm15 = vcmp.ge.f32.partialorder %v5027_v58, %v937_v18  ;;  %vm963_vm2 = vcmp.ge.f32.partialorder %v5030_v60, %v935_v61 }
 0x414   :  { %v5107_v62 = vsel %vm964_vm15, -1e+30, %v5027_v58  ;;  %v5110_v6 = vsel %vm963_vm2, -1e+30, %v5030_v60 }
 0x415   :  { %1000 = vmax.xlane.f32.xlu0 %v5107_v62  ;;  %998 = vmax.xlane.f32.xlu1 %v5110_v6 }
 0x416   :  { %v941_v19 = vpop.xlane.xlu0 %940  ;;  %v939_v22 = vpop.xlane.xlu1 %938 }
 0x417   :  { %vm966_vm8 = vcmp.ge.f32.partialorder %v5037_v8, %v941_v19  ;;  %vm965_vm11 = vcmp.ge.f32.partialorder %v5040_v17, %v939_v22 }
 0x418   :  { %v5117_v18 = vsel %vm966_vm8, -1e+30, %v5037_v8  ;;  %v5120_v61 = vsel %vm965_vm11, -1e+30, %v5040_v17 }
 0x419   :  { %1004 = vmax.xlane.f32.xlu0 %v5117_v18  ;;  %1002 = vmax.xlane.f32.xlu1 %v5120_v61 }
 0x41a   :  { %v945_v58 = vpop.xlane.xlu0 %944  ;;  %v943_v60 = vpop.xlane.xlu1 %942 }
 0x41b   :  { %vm968_vm13 = vcmp.ge.f32.partialorder %v5047_v12, %v945_v58  ;;  %vm967_vm15 = vcmp.ge.f32.partialorder %v5050_v5, %v943_v60 }
 0x41c   :  { %v5127_v19 = vsel %vm968_vm13, -1e+30, %v5047_v12  ;;  %v5130_v22 = vsel %vm967_vm15, -1e+30, %v5050_v5 }
 0x41d   :  { %1008 = vmax.xlane.f32.xlu0 %v5127_v19  ;;  %1006 = vmax.xlane.f32.xlu1 %v5130_v22 }
 0x41e   :  { %v949_v8 = vpop.xlane.xlu0 %948  ;;  %v947_v17 = vpop.xlane.xlu1 %946 }
 0x41f   :  { %vm970_vm2 = vcmp.ge.f32.partialorder %v5057_v7, %v949_v8  ;;  %vm969_vm8 = vcmp.ge.f32.partialorder %v5060_v42, %v947_v17 }
 0x420   :  { %v5137_v58 = vsel %vm970_vm2, -1e+30, %v5057_v7  ;;  %v5140_v60 = vsel %vm969_vm8, -1e+30, %v5060_v42  ;;  %v6997_v42 = vmov 0.0  }
 0x421   :  { %1012 = vmax.xlane.f32.xlu0 %v5137_v58  ;;  %1010 = vmax.xlane.f32.xlu1 %v5140_v60  ;;  %v3501_v25 = vsel %vm403_vm6, 1.0, %v6997_v42  ;;  %v3496_v26 = vsel %vm398_vm4, 1.0, %v6997_v42  ;;  %v3499_v27 = vsel %vm401_vm9, 1.0, %v6997_v42  ;;  %v3502_v28 = vsel %vm404_vm7, 1.0, %v6997_v42 }
 0x422   :  { %v953_v12 = vpop.xlane.xlu0 %952  ;;  %v951_v5 = vpop.xlane.xlu1 %950  ;;  %v3505_v29 = vsel %vm407_vm12, 1.0, %v6997_v42  ;;  %v3500_v30 = vsel %vm402_vm10, 1.0, %v6997_v42  ;;  %vm7131_vm4 = vcmp.ge.f32.partialorder %v4544_v35, %v4967_v14  ;;  %vm7132_vm7 = vcmp.ge.f32.partialorder %v4549_v36, %v4965_v59  ;;  %v35_v36 = vld [vmem:[%s6967_s2 + $0x78] sm:$0xff] }
 0x423   :  { %vm972_vm11 = vcmp.ge.f32.partialorder %v5067_v52, %v953_v12  ;;  %vm971_vm13 = vcmp.ge.f32.partialorder %v5070_v46, %v951_v5  ;;  %v3497_v12 = vsel %vm399_vm0, 1.0, %v6997_v42  ;;  %vm7129_vm0 = vcmp.ge.f32.partialorder %v4539_v33, %v4950_v63  ;;  %v29_v33 = vld [vmem:[%s6967_s2 + $0x48] sm:$0xff] }
 0x424   :  { %v5147_v8 = vsel %vm972_vm11, -1e+30, %v5067_v52  ;;  %v5150_v17 = vsel %vm971_vm13, -1e+30, %v5070_v46  ;;  %v3495_v52 = vsel %vm397_vm3, 1.0, %v6997_v42  ;;  %v3498_v46 = vsel %vm400_vm1, 1.0, %v6997_v42 }
 0x425   :  { %1016 = vmax.xlane.f32.xlu0 %v5147_v8  ;;  %1014 = vmax.xlane.f32.xlu1 %v5150_v17  ;;  %vm7130_vm1 = vcmp.ge.f32.partialorder %v4542_v34, %v4953_v4  ;;  %v3504_v4 = vsel %vm7131_vm4, 1.0, %v6997_v42  ;;  %v3508_v15 = vsel %vm410_vm5, 1.0, %v6997_v42  ;;  %vm7133_vm9 = vcmp.ge.f32.partialorder %v4554_v38, %v4983_v0 }
 0x426   :  { %v955_v7 = vpop.xlane.xlu1 %954  ;;  %v957_v1 = vpop.xlane.xlu0 %956 }
 0x427   :  { %vm973_vm15 = vcmp.ge.f32.partialorder %v5080_v55, %v955_v7  ;;  %v5195_v7 = vpack.c.bf16 %v23_v20, %v22_v16  ;;  %vm974_vm3 = vcmp.ge.f32.partialorder %v5077_v49, %v957_v1  ;;  %v30_v20 = vld [vmem:[%s6967_s2 + $0x50] sm:$0xff] }
 0x428   :  { %v5160_v5 = vsel %vm973_vm15, -1e+30, %v5080_v55  ;;  %v5177_v55 = vpack.c.bf16 %v21_v13, %v20_v24  ;;  %v3503_v24 = vsel %vm7129_vm0, 1.0, %v6997_v42  ;;  %v3506_v13 = vsel %vm7130_vm1, 1.0, %v6997_v42 }
 0x429   :  { %449 = vadd.xlane.f32.xlu0 %v3497_v12  ;;  %1018 = vmax.xlane.f32.xlu1 %v5160_v5  ;;  %v5213_v12 = vpack.c.bf16 %v25_v23, %v24_v21  ;;  %v5261_v34 = vsel %vm974_vm3, -1e+30, %v5077_v49  ;;  %v31_v49 = vld [vmem:[%s6967_s2 + $0x58] sm:$0xff]  ;;  %v3507_v21 = vsel %vm409_vm14, 1.0, %v6997_v42 }
 0x42a   :  { %4063 = vmatprep.subr.bf16.mxu1 %v5177_v55  ;;  %v959_v63 = vpop.xlane.xlu1 %958  ;;  %v5281_v35 = vpack.c.bf16 %v31_v49, %v30_v20 }
 0x42b   :  { %4064 = vmatpush3.bf16.msra.mxu1 %v5177_v55  ;;  %vm975_vm6 = vcmp.ge.f32.partialorder %v5086_v2, %v959_v63 }
 0x42c   :  { %4065 = vmatprep.subr.bf16.mxu1 %v5195_v7  ;;  %v5292_v23 = vsel %vm975_vm6, -1e+30, %v5086_v2  ;;  %v3509_v2 = vsel %vm7132_vm7, 1.0, %v6997_v42 }
 0x42d   :  { %445 = vadd.xlane.f32.xlu0 %v3495_v52  ;;  %451 = vadd.xlane.f32.xlu1 %v3498_v46  ;;  %v5235_v46 = vpack.c.bf16 %v27_v32, %v26_v53  ;;  %v34_v32 = vld [vmem:[%s6967_s2 + $0x70] sm:$0xff] }
 0x42e   :  { %v5325_v39 = vpack.c.bf16 %v35_v36, %v34_v32 }
 0x42f   :  { %4066 = vmatpush3.bf16.msra.mxu1 %v5195_v7 }
 0x430   :  { %4067 = vmatprep.subr.bf16.mxu1 %v5213_v12 }
 0x431   :  { %457 = vadd.xlane.f32.xlu0 %v3501_v25  ;;  %447 = vadd.xlane.f32.xlu1 %v3496_v26  ;;  %v28_v25 = vld [vmem:[%s6967_s2 + $0x40] sm:$0xff] }
 0x432   :  { %v5258_v26 = vpack.c.bf16 %v29_v33, %v28_v25 }
 0x433   :  { %4068 = vmatpush3.bf16.msra.mxu1 %v5213_v12 }
 0x434   :  { %4069 = vmatprep.subr.bf16.mxu1 %v5235_v46 }
 0x435   :  { %453 = vadd.xlane.f32.xlu0 %v3499_v27  ;;  %459 = vadd.xlane.f32.xlu1 %v3502_v28 }
 0x437   :  { %4070 = vmatpush3.bf16.msra.mxu1 %v5235_v46 }
 0x438   :  { %4071 = vmatprep.subr.bf16.mxu1 %v5258_v26 }
 0x439   :  { %v5225_v10 = vpop.f32.mrb[0].mxu1  ;;  %465 = vadd.xlane.f32.xlu0 %v3505_v29  ;;  %455 = vadd.xlane.f32.xlu1 %v3500_v30  ;;  %v32_v29 = vld [vmem:[%s6967_s2 + $0x60] sm:$0xff]  ;;  %v33_v30 = vld [vmem:[%s6967_s2 + $0x68] sm:$0xff] }
 0x43a   :  { %v5233_v52 = vpop.f32.mrb[1].mxu1  ;;  %v5303_v37 = vpack.c.bf16 %v33_v30, %v32_v29 }
 0x43b   :  { %v5237_v31 = vpop.f32.mrb[2].mxu1  ;;  %4072 = vmatpush3.bf16.msra.mxu1 %v5258_v26 }
 0x43c   :  { %v5239_v11 = vpop.f32.mrb[3].mxu1  ;;  %4073 = vmatprep.subr.bf16.mxu1 %v5281_v35 }
 0x43d   :  { %461 = vadd.xlane.f32.xlu0 %v3503_v24  ;;  %467 = vadd.xlane.f32.xlu1 %v3506_v13  ;;  %v3510_v24 = vsel %vm7133_vm9, 1.0, %v6997_v42 }
 0x43f   :  { %4074 = vmatpush3.bf16.msra.mxu1 %v5281_v35 }
 0x440   :  { %4075 = vmatprep.subr.bf16.mxu1 %v5303_v37 }
 0x441   :  { %v5269_v16 = vpop.f32.mrb[4].mxu1  ;;  %1020 = vmax.xlane.f32.xlu0 %v5261_v34  ;;  %463 = vadd.xlane.f32.xlu1 %v3504_v4 }
 0x442   :  { %v5278_v27 = vpop.f32.mrb[5].mxu1 }
 0x443   :  { %v5283_v14 = vpop.f32.mrb[6].mxu1  ;;  %4076 = vmatpush3.bf16.msra.mxu1 %v5303_v37 }
 0x444   :  { %v5285_v28 = vpop.f32.mrb[7].mxu1  ;;  %4077 = vmatprep.subr.bf16.mxu1 %v5325_v39 }
 0x445   :  { %469 = vadd.xlane.f32.xlu0 %v3507_v21  ;;  %1022 = vmax.xlane.f32.xlu1 %v5292_v23 }
 0x447   :  { %4078 = vmatpush3.bf16.msra.mxu1 %v5325_v39 }
 0x448   :  { %4127 = vmatprep.subr.bf16.mxu1 %v4570_v43 }
 0x449   :  { %v5314_v53 = vpop.f32.mrb[8].mxu1  ;;  %473 = vadd.xlane.f32.xlu0 %v3509_v2  ;;  %471 = vadd.xlane.f32.xlu1 %v3508_v15 }
 0x44a   :  { %v5322_v59 = vpop.f32.mrb[9].mxu1 }
 0x44b   :  { %v5327_v9 = vpop.f32.mrb[10].mxu1 }
 0x44c   :  { %v5329_v1 = vpop.f32.mrb[11].mxu1 }
 0x44d   :  { %475 = vadd.xlane.f32.xlu1 %v3510_v24 }
 0x451   :  { %v5338_v13 = vpop.f32.mrb[12].mxu1 }
 0x452   :  { %v5340_v25 = vpop.f32.mrb[13].mxu1 }
 0x453   :  { %v5342_v33 = vpop.f32.mrb[14].mxu1 }
 0x454   :  { %v5344_v63 = vpop.f32.mrb[15].mxu1 }
 0x49a   :  { %v993_v4 = vpop.xlane.xlu0 %992 }
 0x49b   :  { %vm1024_vm10 = vcmp.ge.f32.partialorder %v5091_v50, %v993_v4 }
 0x49c   :  { %v1040_v38 = vsel %vm1024_vm10, -1e+30, %v5091_v50 }
 0x49d   :  { %1056 = vmax.xlane.f32.xlu0 %v1040_v38 }
 0x49e   :  { %v997_v0 = vpop.xlane.xlu0 %996  ;;  %v995_v20 = vpop.xlane.xlu1 %994 }
 0x49f   :  { %vm1026_vm12 = vcmp.ge.f32.partialorder %v5097_v56, %v997_v0  ;;  %vm1025_vm14 = vcmp.ge.f32.partialorder %v5100_v3, %v995_v20 }
 0x4a0   :  { %v1042_v49 = vsel %vm1026_vm12, -1e+30, %v5097_v56  ;;  %v1041_v21 = vsel %vm1025_vm14, -1e+30, %v5100_v3 }
 0x4a1   :  { %1060 = vmax.xlane.f32.xlu0 %v1042_v49  ;;  %1058 = vmax.xlane.f32.xlu1 %v1041_v21 }
 0x4a2   :  { %v1001_v29 = vpop.xlane.xlu0 %1000  ;;  %v999_v30 = vpop.xlane.xlu1 %998 }
 0x4a3   :  { %vm1028_vm5 = vcmp.ge.f32.partialorder %v5107_v62, %v1001_v29  ;;  %vm1027_vm2 = vcmp.ge.f32.partialorder %v5110_v6, %v999_v30 }
 0x4a4   :  { %v1044_v50 = vsel %vm1028_vm5, -1e+30, %v5107_v62  ;;  %v1043_v2 = vsel %vm1027_vm2, -1e+30, %v5110_v6 }
 0x4a5   :  { %1064 = vmax.xlane.f32.xlu0 %v1044_v50  ;;  %1062 = vmax.xlane.f32.xlu1 %v1043_v2 }
 0x4a6   :  { %v1005_v15 = vpop.xlane.xlu0 %1004  ;;  %v1003_v32 = vpop.xlane.xlu1 %1002 }
 0x4a7   :  { %vm1030_vm8 = vcmp.ge.f32.partialorder %v5117_v18, %v1005_v15  ;;  %vm1029_vm11 = vcmp.ge.f32.partialorder %v5120_v61, %v1003_v32 }
 0x4a8   :  { %v1046_v3 = vsel %vm1030_vm8, -1e+30, %v5117_v18  ;;  %v1045_v56 = vsel %vm1029_vm11, -1e+30, %v5120_v61 }
 0x4a9   :  { %1068 = vmax.xlane.f32.xlu0 %v1046_v3  ;;  %1066 = vmax.xlane.f32.xlu1 %v1045_v56 }
 0x4aa   :  { %v1009_v36 = vpop.xlane.xlu0 %1008  ;;  %v1007_v24 = vpop.xlane.xlu1 %1006 }
 0x4ab   :  { %vm1032_vm13 = vcmp.ge.f32.partialorder %v5127_v19, %v1009_v36  ;;  %vm1031_vm15 = vcmp.ge.f32.partialorder %v5130_v22, %v1007_v24 }
 0x4ac   :  { %v1048_v62 = vsel %vm1032_vm13, -1e+30, %v5127_v19  ;;  %v1047_v6 = vsel %vm1031_vm15, -1e+30, %v5130_v22 }
 0x4ad   :  { %1072 = vmax.xlane.f32.xlu0 %v1048_v62  ;;  %1070 = vmax.xlane.f32.xlu1 %v1047_v6 }
 0x4ae   :  { %v1013_v4 = vpop.xlane.xlu0 %1012  ;;  %v1011_v38 = vpop.xlane.xlu1 %1010 }
 0x4af   :  { %vm1034_vm0 = vcmp.ge.f32.partialorder %v5137_v58, %v1013_v4  ;;  %vm1033_vm1 = vcmp.ge.f32.partialorder %v5140_v60, %v1011_v38 }
 0x4b0   :  { %v1050_v18 = vsel %vm1034_vm0, -1e+30, %v5137_v58  ;;  %v1049_v61 = vsel %vm1033_vm1, -1e+30, %v5140_v60 }
 0x4b1   :  { %1076 = vmax.xlane.f32.xlu0 %v1050_v18  ;;  %1074 = vmax.xlane.f32.xlu1 %v1049_v61 }
 0x4b2   :  { %v1017_v0 = vpop.xlane.xlu0 %1016  ;;  %v1015_v20 = vpop.xlane.xlu1 %1014 }
 0x4b3   :  { %vm1036_vm3 = vcmp.ge.f32.partialorder %v5147_v8, %v1017_v0  ;;  %vm1035_vm4 = vcmp.ge.f32.partialorder %v5150_v17, %v1015_v20 }
 0x4b4   :  { %v1052_v19 = vsel %vm1036_vm3, -1e+30, %v5147_v8  ;;  %v1051_v22 = vsel %vm1035_vm4, -1e+30, %v5150_v17 }
 0x4b5   :  { %1080 = vmax.xlane.f32.xlu0 %v1052_v19  ;;  %1078 = vmax.xlane.f32.xlu1 %v1051_v22 }
 0x4b6   :  { %v450_v49 = vpop.xlane.xlu0 %449  ;;  %v1019_v21 = vpop.xlane.xlu1 %1018 }
 0x4b7   :  { %vm1037_vm6 = vcmp.ge.f32.partialorder %v5160_v5, %v1019_v21  ;;  %4305 = vrcp.f32 %v450_v49 }
 0x4b8   :  { %v1053_v58 = vsel %vm1037_vm6, -1e+30, %v5160_v5 }
 0x4b9   :  { %1082 = vmax.xlane.f32.xlu1 %v1053_v58 }
 0x4ba   :  { %v446_v60 = vpop.xlane.xlu0 %445  ;;  %v452_v29 = vpop.xlane.xlu1 %451 }
 0x4bb   :  { %4307 = vrcp.f32 %v452_v29 }
 0x4bc   :  { %4309 = vrcp.f32 %v446_v60 }
 0x4be   :  { %v458_v30 = vpop.xlane.xlu0 %457  ;;  %v448_v50 = vpop.xlane.xlu1 %447 }
 0x4bf   :  { %4311 = vrcp.f32 %v448_v50 }
 0x4c0   :  { %4313 = vrcp.f32 %v458_v30 }
 0x4c1   :  { %v4306_v2 = vpop.eup %4305 }
 0x4c2   :  { %v454_v8 = vpop.xlane.xlu0 %453  ;;  %v460_v17 = vpop.xlane.xlu1 %459  ;;  %v600_v5 = vmul.f32 %v4306_v2, %v5225_v10 }
 0x4c3   :  { %4315 = vrcp.f32 %v460_v17 }
 0x4c4   :  { %4317 = vrcp.f32 %v454_v8 }
 0x4c5   :  { %v4308_v15 = vpop.eup %4307 }
 0x4c6   :  { %v466_v32 = vpop.xlane.xlu0 %465  ;;  %v456_v3 = vpop.xlane.xlu1 %455  ;;  %v601_v56 = vmul.f32 %v4308_v15, %v5237_v31 }
 0x4c7   :  { %v4310_v36 = vpop.eup %4309  ;;  %4319 = vrcp.f32 %v456_v3 }
 0x4c8   :  { %v615_v24 = vpack.c.bf16 %v601_v56, %v600_v5  ;;  %4321 = vrcp.f32 %v466_v32  ;;  %v598_v38 = vmul.f32 %v4310_v36, %v5233_v52 }
 0x4c9   :  { %v4312_v62 = vpop.eup %4311 }
 0x4ca   :  { %v462_v6 = vpop.xlane.xlu0 %461  ;;  %v468_v4 = vpop.xlane.xlu1 %467  ;;  %v599_v18 = vmul.f32 %v4312_v62, %v5239_v11  ;;  %v7135_v62 = vld [vmem:[#allocation4_spill] sm:$0xff] }
 0x4cb   :  { %v4314_v61 = vpop.eup %4313  ;;  %4323 = vrcp.f32 %v468_v4  ;;  %v7136_v4 = vmov 1.0|1.0  }
 0x4cc   :  { %4325 = vrcp.f32 %v462_v6  ;;  %v614_v0 = vpack.c.bf16 %v599_v18, %v598_v38  ;;  %v604_v31 = vmul.f32 %v4314_v61, %v5269_v16  ;;  %v7137_v18 = vld [vmem:[#allocation5_spill] sm:$0xff] }
 0x4cd   :  { %v4316_v20 = vpop.eup %4315 }
 0x4ce   :  { %v1021_v19 = vpop.xlane.xlu0 %1020  ;;  %v464_v10 = vpop.xlane.xlu1 %463  ;;  %4079 = vmatprep.mubr.bf16.mxu1 %v614_v0  ;;  %v605_v22 = vmul.f32 %v4316_v20, %v5283_v14  ;;  %v7138_v20 = vld [vmem:[#allocation6_spill] sm:$0xff] }
 0x4cf   :  { %vm1038_vm7 = vcmp.ge.f32.partialorder %v5261_v34, %v1021_v19  ;;  %4327 = vrcp.f32 %v464_v10  ;;  %v4318_v49 = vpop.eup %4317  ;;  %4080 = vmatmul.mubr.bf16.vlgmr.msra.gmra.mrb[16].mxu1 %v615_v24  ;;  %v7134_v24 = vld [vmem:[#allocation3_spill] sm:$0xff]  ;;  %v7139_v19 = vld [vmem:[#allocation8_spill] sm:$0xff] }
 0x4d0   :  { %v1054_v52 = vsel %vm1038_vm7, -1e+30, %v5261_v34  ;;  %v617_v11 = vpack.c.bf16 %v605_v22, %v604_v31  ;;  %4128 = vmatpush3.bf16.msra.mxu1 %v4570_v43  ;;  %v602_v29 = vmul.f32 %v4318_v49, %v5278_v27  ;;  %v7141_v49 = vld [vmem:[#allocation7_spill] sm:$0xff] }
 0x4d1   :  { %1084 = vmax.xlane.f32.xlu0 %v1054_v52  ;;  %v4320_v21 = vpop.eup %4319  ;;  %4129 = vmatprep.subr.bf16.mxu1 %v4575_v45 }
 0x4d2   :  { %v470_v58 = vpop.xlane.xlu0 %469  ;;  %v1023_v60 = vpop.xlane.xlu1 %1022  ;;  %v603_v16 = vmul.f32 %v4320_v21, %v5285_v28 }
 0x4d3   :  { %vm1039_vm9 = vcmp.ge.f32.partialorder %v5292_v23, %v1023_v60  ;;  %v4322_v14 = vpop.eup %4321  ;;  %4329 = vrcp.f32 %v470_v58  ;;  %v7142_v58 = vld [vmem:[#allocation9_spill] sm:$0xff]  ;;  %v7143_v60 = vld [vmem:[#allocation12_spill] sm:$0xff] }
 0x4d4   :  { %v1055_v30 = vsel %vm1039_vm9, -1e+30, %v5292_v23  ;;  %v616_v34 = vpack.c.bf16 %v603_v16, %v602_v29  ;;  %4130 = vmatpush3.bf16.msra.mxu1 %v4575_v45  ;;  %v608_v2 = vmul.f32 %v4322_v14, %v5314_v53 }
 0x4d5   :  { %1086 = vmax.xlane.f32.xlu1 %v1055_v30  ;;  %v4324_v50 = vpop.eup %4323  ;;  %4131 = vmatprep.subr.bf16.mxu1 %v4587_v48  ;;  %v7144_v30 = vld [vmem:[#allocation14_spill] sm:$0xff] }
 0x4d6   :  { %v474_v43 = vpop.xlane.xlu0 %473  ;;  %v472_v8 = vpop.xlane.xlu1 %471  ;;  %4083 = vmatprep.mubr.bf16.mxu1 %v616_v34  ;;  %v609_v27 = vmul.f32 %v4324_v50, %v5327_v9  ;;  %v7145_v34 = vld [vmem:[#allocation11_spill] sm:$0xff] }
 0x4d7   :  { %v4326_v17 = vpop.eup %4325  ;;  %4331 = vrcp.f32 %v472_v8  ;;  %4084 = vmatmul.mubr.bf16.gmra.mrb[20].mxu1 %v617_v11 }
 0x4d8   :  { %4333 = vrcp.f32 %v474_v43  ;;  %v619_v23 = vpack.c.bf16 %v609_v27, %v608_v2  ;;  %4132 = vmatpush3.bf16.msra.mxu1 %v4587_v48  ;;  %v606_v15 = vmul.f32 %v4326_v17, %v5322_v59  ;;  %v7147_v2 = vld [vmem:[#allocation13_spill] sm:$0xff] }
 0x4d9   :  { %v4328_v28 = vpop.eup %4327  ;;  %4133 = vmatprep.subr.bf16.mxu1 %v4597_v51 }
 0x4da   :  { %v476_v45 = vpop.xlane.xlu1 %475  ;;  %v607_v32 = vmul.f32 %v4328_v28, %v5329_v1 }
 0x4db   :  { %4335 = vrcp.f32 %v476_v45 }
 0x4dc   :  { %v618_v3 = vpack.c.bf16 %v607_v32, %v606_v15  ;;  %4134 = vmatpush3.bf16.msra.mxu1 %v4597_v51 }
 0x4dd   :  { %4135 = vmatprep.subr.bf16.mxu1 %v4607_v54  ;;  %v4330_v53 = vpop.eup %4329 }
 0x4de   :  { %4087 = vmatprep.mubr.bf16.mxu1 %v618_v3  ;;  %v610_v59 = vmul.f32 %v4330_v53, %v5340_v25 }
 0x4df   :  { %4088 = vmatmul.mubr.bf16.gmra.mrb[24].mxu1 %v619_v23  ;;  %v7148_v23 = vld [vmem:[#allocation15_spill] sm:$0xff] }
 0x4e0   :  { %4136 = vmatpush3.bf16.msra.mxu1 %v4607_v54 }
 0x4e1   :  { %v4332_v9 = vpop.eup %4331  ;;  %4137 = vmatprep.subr.bf16.mxu1 %v4617_v57 }
 0x4e2   :  { %v4334_v48 = vpop.eup %4333  ;;  %v611_v1 = vmul.f32 %v4332_v9, %v5344_v63 }
 0x4e3   :  { %v612_v51 = vmul.f32 %v4334_v48, %v5338_v13 }
 0x4e4   :  { %v620_v56 = vpack.c.bf16 %v611_v1, %v610_v59  ;;  %4138 = vmatpush3.bf16.msra.mxu1 %v4617_v57 }
 0x4e5   :  { %v4336_v5 = vpop.eup %4335  ;;  %4139 = vmatprep.subr.bf16.mxu1 %v7134_v24 }
 0x4e6   :  { %v613_v36 = vmul.f32 %v4336_v5, %v5342_v33  ;;  %4091 = vmatprep.mubr.bf16.mxu1 %v620_v56 }
 0x4e8   :  { %v621_v54 = vpack.c.bf16 %v613_v36, %v612_v51  ;;  %4140 = vmatpush3.bf16.msra.mxu1 %v7134_v24 }
 0x4e9   :  { %4141 = vmatprep.subr.bf16.mxu1 %v7135_v62 }
 0x4ea   :  { %4092 = vmatmul.mubr.bf16.gmra.mrb[28].mxu1 %v621_v54 }
 0x4ec   :  { %4142 = vmatpush3.bf16.msra.mxu1 %v7135_v62 }
 0x4ed   :  { %4159 = vmatprep.subr.bf16.mxu1 %v5177_v55 }
 0x52a   :  { %v1057_v25 = vpop.xlane.xlu0 %1056 }
 0x52b   :  { %vm1088_vm10 = vcmp.ge.f32.partialorder %v4811_v41, %v1057_v25 }
 0x52c   :  { %v3527_v57 = vsel %vm1088_vm10, 1.0, %v6997_v42 }
 0x52d   :  { %1136 = vadd.xlane.f32.xlu0 %v3527_v57 }
 0x52e   :  { %v1061_v13 = vpop.xlane.xlu0 %1060  ;;  %v1059_v33 = vpop.xlane.xlu1 %1058 }
 0x52f   :  { %vm1090_vm12 = vcmp.ge.f32.partialorder %v4809_v40, %v1061_v13  ;;  %vm1089_vm14 = vcmp.ge.f32.partialorder %v4815_v44, %v1059_v33 }
 0x530   :  { %vm3543_vm5 = vmpackc.low %vm1089_vm14, %vm1088_vm10  ;;  %v3529_v63 = vsel %vm1090_vm12, 1.0, %v6997_v42  ;;  %v3528_v6 = vsel %vm1089_vm14, 1.0, %v6997_v42 }
 0x531   :  { %1140 = vadd.xlane.f32.xlu0 %v3529_v63  ;;  %4143 = vmatprep.mubr.msk.bf16.mxu1 %vm3543_vm5, %v7136_v4 }
 0x532   :  { %1138 = vadd.xlane.f32.xlu1 %v3528_v6  ;;  %v1065_v38 = vpop.xlane.xlu0 %1064  ;;  %v1063_v41 = vpop.xlane.xlu1 %1062 }
 0x533   :  { %vm1092_vm2 = vcmp.ge.f32.partialorder %v4819_v47, %v1065_v38  ;;  %vm1091_vm8 = vcmp.ge.f32.partialorder %v7137_v18, %v1063_v41 }
 0x534   :  { %vm3545_vm11 = vmpackc.low %vm1091_vm8, %vm1090_vm12  ;;  %v3531_v40 = vsel %vm1092_vm2, 1.0, %v6997_v42  ;;  %v3530_v44 = vsel %vm1091_vm8, 1.0, %v6997_v42 }
 0x535   :  { %1144 = vadd.xlane.f32.xlu0 %v3531_v40  ;;  %4144 = vmatmul.mubr.msk.bf16.vlgmr.msra.gmra.mrb[32].mxu1 %vm3545_vm11, %v7136_v4 }
 0x536   :  { %1142 = vadd.xlane.f32.xlu1 %v3530_v44  ;;  %v1069_v61 = vpop.xlane.xlu0 %1068  ;;  %v1067_v0 = vpop.xlane.xlu1 %1066  ;;  %4160 = vmatpush3.bf16.msra.mxu1 %v5177_v55  ;;  %v7140_v55 = vld [vmem:[#allocation10_spill] sm:$0xff] }
 0x537   :  { %vm1094_vm13 = vcmp.ge.f32.partialorder %v7138_v20, %v1069_v61  ;;  %vm1093_vm15 = vcmp.ge.f32.partialorder %v7139_v19, %v1067_v0  ;;  %4161 = vmatprep.subr.bf16.mxu1 %v5195_v7 }
 0x538   :  { %vm3547_vm0 = vmpackc.low %vm1093_vm15, %vm1092_vm2  ;;  %v3533_v47 = vsel %vm1094_vm13, 1.0, %v6997_v42  ;;  %v3532_v10 = vsel %vm1093_vm15, 1.0, %v6997_v42 }
 0x539   :  { %1148 = vadd.xlane.f32.xlu0 %v3533_v47  ;;  %4147 = vmatprep.mubr.msk.bf16.mxu1 %vm3547_vm0, %v7136_v4 }
 0x53a   :  { %1146 = vadd.xlane.f32.xlu1 %v3532_v10  ;;  %v1073_v31 = vpop.xlane.xlu0 %1072  ;;  %v1071_v22 = vpop.xlane.xlu1 %1070  ;;  %4162 = vmatpush3.bf16.msra.mxu1 %v5195_v7 }
 0x53b   :  { %vm1096_vm1 = vcmp.ge.f32.partialorder %v7140_v55, %v1073_v31  ;;  %vm1095_vm3 = vcmp.ge.f32.partialorder %v7141_v49, %v1071_v22  ;;  %4163 = vmatprep.subr.bf16.mxu1 %v5213_v12 }
 0x53c   :  { %vm3549_vm4 = vmpackc.low %vm1095_vm3, %vm1094_vm13  ;;  %v3535_v52 = vsel %vm1096_vm1, 1.0, %v6997_v42  ;;  %v3534_v11 = vsel %vm1095_vm3, 1.0, %v6997_v42 }
 0x53d   :  { %1152 = vadd.xlane.f32.xlu0 %v3535_v52  ;;  %4148 = vmatmul.mubr.msk.bf16.gmra.mrb[36].mxu1 %vm3549_vm4, %v7136_v4 }
 0x53e   :  { %1150 = vadd.xlane.f32.xlu1 %v3534_v11  ;;  %v1077_v7 = vpop.xlane.xlu0 %1076  ;;  %v1075_v21 = vpop.xlane.xlu1 %1074  ;;  %4164 = vmatpush3.bf16.msra.mxu1 %v5213_v12 }
 0x53f   :  { %vm1098_vm6 = vcmp.ge.f32.partialorder %v7142_v58, %v1077_v7  ;;  %vm1097_vm7 = vcmp.ge.f32.partialorder %v7143_v60, %v1075_v21  ;;  %4165 = vmatprep.subr.bf16.mxu1 %v5235_v46 }
 0x540   :  { %vm3551_vm9 = vmpackc.low %vm1097_vm7, %vm1096_vm1  ;;  %v3537_v29 = vsel %vm1098_vm6, 1.0, %v6997_v42  ;;  %v3536_v16 = vsel %vm1097_vm7, 1.0, %v6997_v42 }
 0x541   :  { %1156 = vadd.xlane.f32.xlu0 %v3537_v29  ;;  %4151 = vmatprep.mubr.msk.bf16.mxu1 %vm3551_vm9, %v7136_v4 }
 0x542   :  { %1154 = vadd.xlane.f32.xlu1 %v3536_v16  ;;  %v1081_v12 = vpop.xlane.xlu0 %1080  ;;  %v1079_v14 = vpop.xlane.xlu1 %1078  ;;  %4166 = vmatpush3.bf16.msra.mxu1 %v5235_v46  ;;  %v7146_v46 = vld [vmem:[#allocation16_spill] sm:$0xff] }
 0x543   :  { %vm1100_vm10 = vcmp.ge.f32.partialorder %v7144_v30, %v1081_v12  ;;  %vm1099_vm12 = vcmp.ge.f32.partialorder %v7145_v34, %v1079_v14  ;;  %4167 = vmatprep.subr.bf16.mxu1 %v5258_v26 }
 0x544   :  { %vm3553_vm14 = vmpackc.low %vm1099_vm12, %vm1098_vm6  ;;  %v3539_v50 = vsel %vm1100_vm10, 1.0, %v6997_v42  ;;  %v3538_v43 = vsel %vm1099_vm12, 1.0, %v6997_v42 }
 0x545   :  { %1160 = vadd.xlane.f32.xlu0 %v3539_v50  ;;  %4152 = vmatmul.mubr.msk.bf16.gmra.mrb[40].mxu1 %vm3553_vm14, %v7136_v4 }
 0x546   :  { %1158 = vadd.xlane.f32.xlu1 %v3538_v43  ;;  %v1083_v8 = vpop.xlane.xlu1 %1082  ;;  %4168 = vmatpush3.bf16.msra.mxu1 %v5258_v26 }
 0x547   :  { %vm1101_vm5 = vcmp.ge.f32.partialorder %v7146_v46, %v1083_v8  ;;  %4169 = vmatprep.subr.bf16.mxu1 %v5281_v35 }
 0x548   :  { %vm3555_vm2 = vmpackc.low %vm1101_vm5, %vm1100_vm10  ;;  %v3540_v17 = vsel %vm1101_vm5, 1.0, %v6997_v42 }
 0x549   :  { %4155 = vmatprep.mubr.msk.bf16.mxu1 %vm3555_vm2, %v7136_v4 }
 0x54a   :  { %1162 = vadd.xlane.f32.xlu1 %v3540_v17  ;;  %4170 = vmatpush3.bf16.msra.mxu1 %v5281_v35 }
 0x54b   :  { %4171 = vmatprep.subr.bf16.mxu1 %v5303_v37 }
 0x54e   :  { %4172 = vmatpush3.bf16.msra.mxu1 %v5303_v37 }
 0x54f   :  { %4173 = vmatprep.subr.bf16.mxu1 %v5325_v39 }
 0x552   :  { %4174 = vmatpush3.bf16.msra.mxu1 %v5325_v39 }
 0x55e   :  { %v1085_v26 = vpop.xlane.xlu0 %1084 }
 0x55f   :  { %vm1102_vm8 = vcmp.ge.f32.partialorder %v7147_v2, %v1085_v26 }
 0x560   :  { %v3541_v27 = vsel %vm1102_vm8, 1.0, %v6997_v42 }
 0x561   :  { %1164 = vadd.xlane.f32.xlu0 %v3541_v27 }
 0x562   :  { %v1087_v28 = vpop.xlane.xlu1 %1086 }
 0x563   :  { %vm1103_vm11 = vcmp.ge.f32.partialorder %v7148_v23, %v1087_v28 }
 0x564   :  { %vm3557_vm13 = vmpackc.low %vm1103_vm11, %vm1102_vm8  ;;  %v3542_v35 = vsel %vm1103_vm11, 1.0, %v6997_v42 }
 0x565   :  { %4156 = vmatmul.mubr.msk.bf16.gmra.mrb[44].mxu1 %vm3557_vm13, %v7136_v4  ;;  %1166 = vadd.xlane.f32.xlu1 %v3542_v35 }
 0x5a2   :  { %v4081_v37 = vpop.f32.mrb[16].mxu1 }
 0x5a3   :  { %v664_v45 = vpop.f32.mrb[17].mxu1  ;;  %v729_v32 = vmax.f32 %v4081_v37, 0.0 }
 0x5a4   :  { %v4082_v15 = vpop.f32.mrb[18].mxu1  ;;  %v727_v53 = vmax.f32 %v664_v45, 0.0 }
 0x5a5   :  { %v730_v39 = vmax.f32 %v4082_v15, 0.0  ;;  %v667_v3 = vpop.f32.mrb[19].mxu1 }
 0x5a6   :  { %v728_v9 = vmax.f32 %v667_v3, 0.0 }
 0x5a7   :  { %v5477_v48 = vpack.c.bf16 %v730_v39, %v729_v32 }
 0x5a8   :  { %v5479_v59 = vpack.c.bf16 %v728_v9, %v727_v53 }
 0x5aa   :  { %v4085_v1 = vpop.f32.mrb[20].mxu1  ;;  %3799 = vmatprep.mubr.bf16.mxu0 %v5479_v59 }
 0x5ab   :  { %v680_v5 = vpop.f32.mrb[21].mxu1  ;;  %v733_v51 = vmax.f32 %v4085_v1, 0.0 }
 0x5ac   :  { %v4086_v56 = vpop.f32.mrb[22].mxu1  ;;  %v731_v54 = vmax.f32 %v680_v5, 0.0 }
 0x5ad   :  { %v734_v36 = vmax.f32 %v4086_v56, 0.0  ;;  %v683_v24 = vpop.f32.mrb[23].mxu1 }
 0x5ae   :  { %v732_v62 = vmax.f32 %v683_v24, 0.0 }
 0x5af   :  { %v5482_v25 = vpack.c.bf16 %v734_v36, %v733_v51 }
 0x5b0   :  { %v5484_v57 = vpack.c.bf16 %v732_v62, %v731_v54 }
 0x5b2   :  { %v4089_v13 = vpop.f32.mrb[24].mxu1 }
 0x5b3   :  { %v696_v33 = vpop.f32.mrb[25].mxu1  ;;  %v737_v6 = vmax.f32 %v4089_v13, 0.0 }
 0x5b4   :  { %v4090_v63 = vpop.f32.mrb[26].mxu1  ;;  %v735_v18 = vmax.f32 %v696_v33, 0.0 }
 0x5b5   :  { %v738_v38 = vmax.f32 %v4090_v63, 0.0  ;;  %v699_v41 = vpop.f32.mrb[27].mxu1 }
 0x5b6   :  { %v736_v40 = vmax.f32 %v699_v41, 0.0 }
 0x5b7   :  { %v5486_v44 = vpack.c.bf16 %v738_v38, %v737_v6 }
 0x5b8   :  { %v5488_v61 = vpack.c.bf16 %v736_v40, %v735_v18 }
 0x5ba   :  { %v1137_v11 = vpop.xlane.xlu0 %1136 }
 0x5bb   :  { %4337 = vrcp.f32 %v1137_v11 }
 0x5bd   :  { %v4093_v0 = vpop.f32.mrb[28].mxu1 }
 0x5be   :  { %v712_v20 = vpop.f32.mrb[29].mxu1  ;;  %v741_v47 = vmax.f32 %v4093_v0, 0.0  ;;  %v1141_v21 = vpop.xlane.xlu0 %1140 }
 0x5bf   :  { %v4094_v19 = vpop.f32.mrb[30].mxu1  ;;  %v739_v22 = vmax.f32 %v712_v20, 0.0  ;;  %v1139_v7 = vpop.xlane.xlu1 %1138  ;;  %4339 = vrcp.f32 %v1141_v21 }
 0x5c0   :  { %v742_v10 = vmax.f32 %v4094_v19, 0.0  ;;  %v715_v31 = vpop.f32.mrb[31].mxu1 }
 0x5c1   :  { %v740_v55 = vmax.f32 %v715_v31, 0.0 }
 0x5c2   :  { %v5490_v49 = vpack.c.bf16 %v742_v10, %v741_v47  ;;  %v1145_v60 = vpop.xlane.xlu0 %1144 }
 0x5c3   :  { %v5492_v52 = vpack.c.bf16 %v740_v55, %v739_v22  ;;  %v1143_v58 = vpop.xlane.xlu1 %1142 }
 0x5c4   :  { %4341 = vrcp.f32 %v1143_v58 }
 0x5c5   :  { %4343 = vrcp.f32 %v1139_v7  ;;  %v4338_v34 = vpop.eup %4337 }
 0x5c6   :  { %v1149_v16 = vpop.xlane.xlu0 %1148  ;;  %4345 = vrcp.f32 %v1145_v60 }
 0x5c7   :  { %v1147_v29 = vpop.xlane.xlu1 %1146  ;;  %4347 = vrcp.f32 %v1149_v16 }
 0x5c9   :  { %v4340_v43 = vpop.eup %4339 }
 0x5ca   :  { %v1153_v14 = vpop.xlane.xlu0 %1152 }
 0x5cb   :  { %v1151_v12 = vpop.xlane.xlu1 %1150 }
 0x5cc   :  { %4349 = vrcp.f32 %v1151_v12 }
 0x5cd   :  { %4351 = vrcp.f32 %v1147_v29 }
 0x5ce   :  { %v4342_v46 = vpop.eup %4341  ;;  %v1157_v23 = vpop.xlane.xlu0 %1156  ;;  %4353 = vrcp.f32 %v1153_v14 }
 0x5cf   :  { %v1155_v30 = vpop.xlane.xlu1 %1154  ;;  %v4344_v26 = vpop.eup %4343  ;;  %4355 = vrcp.f32 %v1157_v23 }
 0x5d0   :  { %v4346_v39 = vpop.eup %4345 }
 0x5d1   :  { %v4348_v53 = vpop.eup %4347 }
 0x5d2   :  { %v1161_v11 = vpop.xlane.xlu0 %1160 }
 0x5d3   :  { %v1159_v45 = vpop.xlane.xlu1 %1158 }
 0x5d4   :  { %4357 = vrcp.f32 %v1159_v45 }
 0x5d5   :  { %4359 = vrcp.f32 %v1155_v30 }
 0x5d6   :  { %v4350_v1 = vpop.eup %4349  ;;  %4361 = vrcp.f32 %v1161_v11 }
 0x5d7   :  { %v4352_v56 = vpop.eup %4351  ;;  %v1163_v7 = vpop.xlane.xlu1 %1162 }
 0x5d8   :  { %v4354_v63 = vpop.eup %4353 }
 0x5d9   :  { %v4356_v38 = vpop.eup %4355 }
 0x5de   :  { %v4358_v18 = vpop.eup %4357 }
 0x5df   :  { %v4360_v0 = vpop.eup %4359 }
 0x5e0   :  { %v4362_v60 = vpop.eup %4361 }
 0x5ee   :  { %v1165_v21 = vpop.xlane.xlu0 %1164 }
 0x5ef   :  { %4363 = vrcp.f32 %v1165_v21 }
 0x5f2   :  { %v1167_v58 = vpop.xlane.xlu1 %1166 }
 0x5f3   :  { %4365 = vrcp.f32 %v1167_v58 }
 0x5f4   :  { %4367 = vrcp.f32 %v1163_v7 }
 0x5f9   :  { %v4364_v16 = vpop.eup %4363 }
 0x5fd   :  { %v4366_v14 = vpop.eup %4365 }
 0x608   :  { %v4145_v50 = vpop.f32.mrb[32].mxu1 }
 0x609   :  { %v1226_v8 = vpop.f32.mrb[33].mxu1  ;;  %v1291_v2 = vmul.f32 %v4340_v43, %v4145_v50 }
 0x60a   :  { %v4146_v17 = vpop.f32.mrb[34].mxu1  ;;  %v1289_v35 = vmul.f32 %v4338_v34, %v1226_v8  ;;  %v4368_v34 = vpop.eup %4367 }
 0x60b   :  { %v1292_v27 = vmul.f32 %v4342_v46, %v4146_v17  ;;  %v1229_v28 = vpop.f32.mrb[35].mxu1 }
 0x60c   :  { %v1290_v37 = vmul.f32 %v4344_v26, %v1229_v28 }
 0x60d   :  { %v1306_v15 = vpack.c.bf16 %v1292_v27, %v1291_v2 }
 0x60e   :  { %v1305_v32 = vpack.c.bf16 %v1290_v37, %v1289_v35 }
 0x610   :  { %v4149_v3 = vpop.f32.mrb[36].mxu1  ;;  %4175 = vmatprep.mubr.bf16.mxu1 %v1305_v32 }
 0x611   :  { %v1242_v9 = vpop.f32.mrb[37].mxu1  ;;  %4176 = vmatmul.mubr.bf16.vlgmr.msra.gmra.mrb[48].mxu1 %v1306_v15  ;;  %v1295_v51 = vmul.f32 %v4348_v53, %v4149_v3 }
 0x612   :  { %v4150_v5 = vpop.f32.mrb[38].mxu1  ;;  %v1293_v54 = vmul.f32 %v4346_v39, %v1242_v9 }
 0x613   :  { %v1296_v36 = vmul.f32 %v4350_v1, %v4150_v5  ;;  %v1245_v24 = vpop.f32.mrb[39].mxu1 }
 0x614   :  { %v1294_v62 = vmul.f32 %v4352_v56, %v1245_v24 }
 0x615   :  { %v1308_v13 = vpack.c.bf16 %v1296_v36, %v1295_v51 }
 0x616   :  { %v1307_v33 = vpack.c.bf16 %v1294_v62, %v1293_v54 }
 0x618   :  { %v4153_v6 = vpop.f32.mrb[40].mxu1  ;;  %4179 = vmatprep.mubr.bf16.mxu1 %v1307_v33 }
 0x619   :  { %v1258_v41 = vpop.f32.mrb[41].mxu1  ;;  %4180 = vmatmul.mubr.bf16.gmra.mrb[52].mxu1 %v1308_v13  ;;  %v1299_v20 = vmul.f32 %v4356_v38, %v4153_v6 }
 0x61a   :  { %v4154_v40 = vpop.f32.mrb[42].mxu1  ;;  %v1297_v10 = vmul.f32 %v4354_v63, %v1258_v41 }
 0x61b   :  { %v1300_v19 = vmul.f32 %v4358_v18, %v4154_v40  ;;  %v1261_v47 = vpop.f32.mrb[43].mxu1 }
 0x61c   :  { %v1298_v31 = vmul.f32 %v4360_v0, %v1261_v47 }
 0x61d   :  { %v1310_v22 = vpack.c.bf16 %v1300_v19, %v1299_v20 }
 0x61e   :  { %v1309_v55 = vpack.c.bf16 %v1298_v31, %v1297_v10 }
 0x620   :  { %4183 = vmatprep.mubr.bf16.mxu1 %v1309_v55 }
 0x621   :  { %4184 = vmatmul.mubr.bf16.gmra.mrb[56].mxu1 %v1310_v22 }
 0x638   :  { %v4157_v29 = vpop.f32.mrb[44].mxu1 }
 0x639   :  { %v1274_v12 = vpop.f32.mrb[45].mxu1  ;;  %v1303_v50 = vmul.f32 %v4364_v16, %v4157_v29 }
 0x63a   :  { %v4158_v30 = vpop.f32.mrb[46].mxu1  ;;  %v1301_v46 = vmul.f32 %v4362_v60, %v1274_v12 }
 0x63b   :  { %v1304_v43 = vmul.f32 %v4366_v14, %v4158_v30  ;;  %v1277_v8 = vpop.f32.mrb[47].mxu1 }
 0x63c   :  { %v1302_v17 = vmul.f32 %v4368_v34, %v1277_v8 }
 0x63d   :  { %v1312_v26 = vpack.c.bf16 %v1304_v43, %v1303_v50 }
 0x63e   :  { %v1311_v2 = vpack.c.bf16 %v1302_v17, %v1301_v46 }
 0x640   :  { %4187 = vmatprep.mubr.bf16.mxu1 %v1311_v2 }
 0x641   :  { %4188 = vmatmul.mubr.bf16.gmra.mrb[60].mxu1 %v1312_v26 }
 0x6e4   :  { %v4177_v27 = vpop.f32.mrb[48].mxu1 }
 0x6e5   :  { %v1347_v28 = vpop.f32.mrb[49].mxu1  ;;  %v1412_v35 = vmax.f32 %v4177_v27, 0.0 }
 0x6e6   :  { %v4178_v23 = vpop.f32.mrb[50].mxu1  ;;  %v1410_v15 = vmax.f32 %v1347_v28, 0.0 }
 0x6e7   :  { %v1413_v37 = vmax.f32 %v4178_v23, 0.0  ;;  %v1350_v45 = vpop.f32.mrb[51].mxu1 }
 0x6e8   :  { %v1411_v32 = vmax.f32 %v1350_v45, 0.0 }
 0x6e9   :  { %v5494_v39 = vpack.c.bf16 %v1413_v37, %v1412_v35 }
 0x6ea   :  { %v5496_v3 = vpack.c.bf16 %v1411_v32, %v1410_v15 }
 0x6ec   :  { %v4181_v53 = vpop.f32.mrb[52].mxu1  ;;  %3783 = vmatprep.subr.bf16.mxu0 %v5496_v3  ;;  %3831 = vmatprep.subr.bf16.mxu1 %v5496_v3 }
 0x6ed   :  { %v1363_v9 = vpop.f32.mrb[53].mxu1  ;;  %3784 = vmatpush3.bf16.xpose.msra.mxu0 %v5479_v59  ;;  %3832 = vmatpush3.bf16.msra.mxu1 %v5479_v59  ;;  %v1416_v5 = vmax.f32 %v4181_v53, 0.0 }
 0x6ee   :  { %v4182_v1 = vpop.f32.mrb[54].mxu1  ;;  %3785 = vmatprep.subr.bf16.mxu0 %v5494_v39  ;;  %3833 = vmatprep.subr.bf16.mxu1 %v5494_v39  ;;  %v1414_v36 = vmax.f32 %v1363_v9, 0.0 }
 0x6ef   :  { %v1417_v56 = vmax.f32 %v4182_v1, 0.0  ;;  %v1366_v51 = vpop.f32.mrb[55].mxu1 }
 0x6f0   :  { %v1415_v24 = vmax.f32 %v1366_v51, 0.0 }
 0x6f1   :  { %v5504_v54 = vpack.c.bf16 %v1417_v56, %v1416_v5  ;;  %3834 = vmatpush3.bf16.msra.mxu1 %v5477_v48 }
 0x6f2   :  { %v5507_v62 = vpack.c.bf16 %v1415_v24, %v1414_v36 }
 0x6f4   :  { %v4185_v13 = vpop.f32.mrb[56].mxu1  ;;  %3835 = vmatprep.subr.bf16.mxu1 %v5507_v62 }
 0x6f5   :  { %v1379_v33 = vpop.f32.mrb[57].mxu1  ;;  %3786 = vmatpush3.bf16.xpose.msra.mxu0 %v5477_v48  ;;  %3836 = vmatpush3.bf16.msra.mxu1 %v5484_v57  ;;  %v1420_v6 = vmax.f32 %v4185_v13, 0.0 }
 0x6f6   :  { %v4186_v63 = vpop.f32.mrb[58].mxu1  ;;  %3787 = vmatprep.subr.bf16.mxu0 %v5507_v62  ;;  %3837 = vmatprep.subr.bf16.mxu1 %v5504_v54  ;;  %v1418_v18 = vmax.f32 %v1379_v33, 0.0 }
 0x6f7   :  { %v1421_v38 = vmax.f32 %v4186_v63, 0.0  ;;  %v1382_v41 = vpop.f32.mrb[59].mxu1 }
 0x6f8   :  { %v1419_v40 = vmax.f32 %v1382_v41, 0.0 }
 0x6f9   :  { %v5514_v0 = vpack.c.bf16 %v1421_v38, %v1420_v6  ;;  %3838 = vmatpush3.bf16.msra.mxu1 %v5482_v25 }
 0x6fa   :  { %v5517_v20 = vpack.c.bf16 %v1419_v40, %v1418_v18 }
 0x6fc   :  { %3839 = vmatprep.subr.bf16.mxu1 %v5517_v20 }
 0x6fd   :  { %3788 = vmatpush3.bf16.xpose.msra.mxu0 %v5484_v57  ;;  %3840 = vmatpush3.bf16.msra.mxu1 %v5488_v61 }
 0x6fe   :  { %3789 = vmatprep.subr.bf16.mxu0 %v5504_v54  ;;  %3841 = vmatprep.subr.bf16.mxu1 %v5514_v0 }
 0x701   :  { %3842 = vmatpush3.bf16.msra.mxu1 %v5486_v44 }
 0x705   :  { %3790 = vmatpush3.bf16.xpose.msra.mxu0 %v5482_v25 }
 0x706   :  { %3791 = vmatprep.subr.bf16.mxu0 %v5517_v20 }
 0x70d   :  { %3792 = vmatpush3.bf16.xpose.msra.mxu0 %v5488_v61 }
 0x70e   :  { %3793 = vmatprep.subr.bf16.mxu0 %v5514_v0 }
 0x714   :  { %v4189_v19 = vpop.f32.mrb[60].mxu1 }
 0x715   :  { %v1395_v47 = vpop.f32.mrb[61].mxu1  ;;  %3794 = vmatpush3.bf16.xpose.msra.mxu0 %v5486_v44  ;;  %v1424_v31 = vmax.f32 %v4189_v19, 0.0 }
 0x716   :  { %v4190_v10 = vpop.f32.mrb[62].mxu1  ;;  %v1422_v11 = vmax.f32 %v1395_v47, 0.0 }
 0x717   :  { %v1425_v22 = vmax.f32 %v4190_v10, 0.0  ;;  %v1398_v55 = vpop.f32.mrb[63].mxu1 }
 0x718   :  { %v1423_v7 = vmax.f32 %v1398_v55, 0.0 }
 0x719   :  { %v1505_v21 = vpack.c.bf16 %v1425_v22, %v1424_v31 }
 0x71a   :  { %v1504_v58 = vpack.c.bf16 %v1423_v7, %v1422_v11 }
 0x71c   :  { %3795 = vmatprep.subr.bf16.mxu0 %v1504_v58  ;;  %3843 = vmatprep.subr.bf16.mxu1 %v1504_v58 }
 0x71d   :  { %3796 = vmatpush3.bf16.xpose.msra.mxu0 %v5492_v52  ;;  %3844 = vmatpush3.bf16.msra.mxu1 %v5492_v52 }
 0x71e   :  { %3797 = vmatprep.subr.bf16.mxu0 %v1505_v21  ;;  %3845 = vmatprep.subr.bf16.mxu1 %v1505_v21 }
 0x721   :  { %3846 = vmatpush3.bf16.msra.mxu1 %v5490_v49 }
 0x725   :  { %3798 = vmatpush3.bf16.xpose.msra.mxu0 %v5490_v49 }
 0x726   :  { %4239 = vmatprep.subr.bf16.mxu0 %v5496_v3 }
 0x72c   :  { %3800 = vmatmul.mubr.bf16.vlgmr.msra.gmra.mrb[32].mxu0 %v5479_v59 }
 0x72d   :  { %3801 = vmatprep.mubr.bf16.mxu0 %v5477_v48  ;;  %4240 = vmatpush3.bf16.xpose.msra.mxu0 %v5496_v3 }
 0x72e   :  { %4241 = vmatprep.subr.bf16.mxu0 %v5494_v39 }
 0x734   :  { %3802 = vmatmul.mubr.bf16.gmra.mrb[36].mxu0 %v5477_v48 }
 0x735   :  { %3803 = vmatprep.mubr.bf16.mxu0 %v5484_v57  ;;  %4242 = vmatpush3.bf16.xpose.msra.mxu0 %v5494_v39 }
 0x736   :  { %4243 = vmatprep.subr.bf16.mxu0 %v5507_v62 }
 0x73c   :  { %3804 = vmatmul.mubr.bf16.gmra.mrb[40].mxu0 %v5484_v57 }
 0x73d   :  { %3805 = vmatprep.mubr.bf16.mxu0 %v5482_v25  ;;  %4244 = vmatpush3.bf16.xpose.msra.mxu0 %v5507_v62 }
 0x73e   :  { %4245 = vmatprep.subr.bf16.mxu0 %v5504_v54 }
 0x744   :  { %3806 = vmatmul.mubr.bf16.gmra.mrb[44].mxu0 %v5482_v25 }
 0x745   :  { %3807 = vmatprep.mubr.bf16.mxu0 %v5488_v61  ;;  %4246 = vmatpush3.bf16.xpose.msra.mxu0 %v5504_v54 }
 0x746   :  { %4247 = vmatprep.subr.bf16.mxu0 %v5517_v20 }
 0x74c   :  { %3808 = vmatmul.mubr.bf16.gmra.mrb[48].mxu0 %v5488_v61 }
 0x74d   :  { %3809 = vmatprep.mubr.bf16.mxu0 %v5486_v44  ;;  %4248 = vmatpush3.bf16.xpose.msra.mxu0 %v5517_v20 }
 0x74e   :  { %4249 = vmatprep.subr.bf16.mxu0 %v5514_v0 }
 0x754   :  { %3810 = vmatmul.mubr.bf16.gmra.mrb[52].mxu0 %v5486_v44 }
 0x755   :  { %3811 = vmatprep.mubr.bf16.mxu0 %v5492_v52  ;;  %4250 = vmatpush3.bf16.xpose.msra.mxu0 %v5514_v0 }
 0x756   :  { %4251 = vmatprep.subr.bf16.mxu0 %v1504_v58 }
 0x75c   :  { %3812 = vmatmul.mubr.bf16.gmra.mrb[56].mxu0 %v5492_v52 }
 0x75d   :  { %3813 = vmatprep.mubr.bf16.mxu0 %v5490_v49  ;;  %4252 = vmatpush3.bf16.xpose.msra.mxu0 %v1504_v58 }
 0x75e   :  { %4253 = vmatprep.subr.bf16.mxu0 %v1505_v21 }
 0x764   :  { %3814 = vmatmul.mubr.bf16.gmra.mrb[60].mxu0 %v5490_v49 }
 0x765   :  { %3815 = vmatprep.mubr.bf16.mxu0 %v5496_v3  ;;  %4254 = vmatpush3.bf16.xpose.msra.mxu0 %v1505_v21 }
 0x76c   :  { %3816 = vmatmul.mubr.bf16.gmra.mrb[64].mxu0 %v5496_v3 }
 0x76d   :  { %3817 = vmatprep.mubr.bf16.mxu0 %v5494_v39 }
 0x774   :  { %3818 = vmatmul.mubr.bf16.gmra.mrb[68].mxu0 %v5494_v39 }
 0x775   :  { %3819 = vmatprep.mubr.bf16.mxu0 %v5507_v62 }
 0x77c   :  { %3820 = vmatmul.mubr.bf16.gmra.mrb[72].mxu0 %v5507_v62 }
 0x77d   :  { %3821 = vmatprep.mubr.bf16.mxu0 %v5504_v54 }
 0x784   :  { %3822 = vmatmul.mubr.bf16.gmra.mrb[76].mxu0 %v5504_v54 }
 0x785   :  { %3823 = vmatprep.mubr.bf16.mxu0 %v5517_v20 }
 0x78c   :  { %3824 = vmatmul.mubr.bf16.gmra.mrb[80].mxu0 %v5517_v20 }
 0x78d   :  { %3825 = vmatprep.mubr.bf16.mxu0 %v5514_v0 }
 0x794   :  { %3826 = vmatmul.mubr.bf16.gmra.mrb[84].mxu0 %v5514_v0 }
 0x795   :  { %3827 = vmatprep.mubr.bf16.mxu0 %v1504_v58 }
 0x79c   :  { %3828 = vmatmul.mubr.bf16.gmra.mrb[88].mxu0 %v1504_v58 }
 0x79d   :  { %3829 = vmatprep.mubr.bf16.mxu0 %v1505_v21 }
 0x7a4   :  { %3830 = vmatmul.mubr.bf16.gmra.mrb[92].mxu0 %v1505_v21 }
 0x7a5   :  { %4255 = vmatprep.mubr.bf16.mxu0 %v5479_v59 }
 0x7ac   :  { %4256 = vmatmul.mubr.bf16.vlgmr.msra.gmra.mrb[96].mxu0 %v5477_v48 }
 0x7ad   :  { %4259 = vmatprep.mubr.bf16.mxu0 %v5484_v57 }
 0x7b4   :  { %4260 = vmatmul.mubr.bf16.gmra.mrb[100].mxu0 %v5482_v25 }
 0x7b5   :  { %4263 = vmatprep.mubr.bf16.mxu0 %v5488_v61 }
 0x7bc   :  { %4264 = vmatmul.mubr.bf16.gmra.mrb[104].mxu0 %v5486_v44 }
 0x7bd   :  { %4267 = vmatprep.mubr.bf16.mxu0 %v5492_v52 }
 0x7c4   :  { %4268 = vmatmul.mubr.bf16.gmra.mrb[108].mxu0 %v5490_v49 }
 0x7ff   :  { %v5581_v60 = vpop.f32.mrb[32].mxu0 }
 0x800   :  { %7149 = vst [vmem:[#allocation3_spill] sm:$0xff] %v5581_v60  ;;  %v5583_v29 = vpop.f32.mrb[33].mxu0 }
 0x801   :  { %7150 = vst [vmem:[#allocation4_spill] sm:$0xff] %v5583_v29  ;;  %v5585_v16 = vpop.f32.mrb[34].mxu0  ;;  %v1699_v48 = vmax.f32 %v5581_v60, %v5583_v29 }
 0x802   :  { %7151 = vst [vmem:[#allocation5_spill] sm:$0xff] %v5585_v16  ;;  %v5589_v59 = vpop.f32.mrb[35].mxu0 }
 0x803   :  { %7152 = vst [vmem:[#allocation6_spill] sm:$0xff] %v5589_v59  ;;  %1700 = vmax.xlane.f32.xlu0 %v1699_v48  ;;  %v1702_v25 = vmax.f32 %v5585_v16, %v5589_v59 }
 0x805   :  { %1703 = vmax.xlane.f32.xlu1 %v1702_v25 }
 0x807   :  { %v5593_v57 = vpop.f32.mrb[36].mxu0 }
 0x808   :  { %7153 = vst [vmem:[#allocation8_spill] sm:$0xff] %v5593_v57  ;;  %v5595_v44 = vpop.f32.mrb[37].mxu0 }
 0x809   :  { %7154 = vst [vmem:[#allocation10_spill] sm:$0xff] %v5595_v44  ;;  %v5597_v61 = vpop.f32.mrb[38].mxu0  ;;  %v1705_v49 = vmax.f32 %v5593_v57, %v5595_v44 }
 0x80a   :  { %7155 = vst [vmem:[#allocation7_spill] sm:$0xff] %v5597_v61  ;;  %v5601_v52 = vpop.f32.mrb[39].mxu0 }
 0x80b   :  { %7156 = vst [vmem:[#allocation9_spill] sm:$0xff] %v5601_v52  ;;  %1706 = vmax.xlane.f32.xlu0 %v1705_v49  ;;  %v1708_v12 = vmax.f32 %v5597_v61, %v5601_v52 }
 0x80d   :  { %1709 = vmax.xlane.f32.xlu1 %v1708_v12 }
 0x80f   :  { %v5605_v14 = vpop.f32.mrb[40].mxu0 }
 0x810   :  { %7157 = vst [vmem:[#allocation12_spill] sm:$0xff] %v5605_v14  ;;  %v5607_v30 = vpop.f32.mrb[41].mxu0 }
 0x811   :  { %7158 = vst [vmem:[#allocation14_spill] sm:$0xff] %v5607_v30  ;;  %v5609_v34 = vpop.f32.mrb[42].mxu0  ;;  %v1711_v50 = vmax.f32 %v5605_v14, %v5607_v30 }
 0x812   :  { %7159 = vst [vmem:[#allocation11_spill] sm:$0xff] %v5609_v34  ;;  %v5613_v43 = vpop.f32.mrb[43].mxu0 }
 0x813   :  { %7160 = vst [vmem:[#allocation16_spill] sm:$0xff] %v5613_v43  ;;  %1712 = vmax.xlane.f32.xlu0 %v1711_v50  ;;  %v1714_v8 = vmax.f32 %v5609_v34, %v5613_v43 }
 0x815   :  { %1715 = vmax.xlane.f32.xlu1 %v1714_v8 }
 0x817   :  { %v5617_v46 = vpop.f32.mrb[44].mxu0 }
 0x818   :  { %7161 = vst [vmem:[#allocation13_spill] sm:$0xff] %v5617_v46  ;;  %v5619_v17 = vpop.f32.mrb[45].mxu0 }
 0x819   :  { %7162 = vst [vmem:[#allocation15_spill] sm:$0xff] %v5619_v17  ;;  %v5621_v26 = vpop.f32.mrb[46].mxu0  ;;  %v1717_v2 = vmax.f32 %v5617_v46, %v5619_v17 }
 0x81a   :  { %7163 = vst [vmem:[#allocation17_spill] sm:$0xff] %v5621_v26  ;;  %v5625_v27 = vpop.f32.mrb[47].mxu0 }
 0x81b   :  { %7164 = vst [vmem:[#allocation18_spill] sm:$0xff] %v5625_v27  ;;  %1718 = vmax.xlane.f32.xlu0 %v1717_v2  ;;  %v1720_v28 = vmax.f32 %v5621_v26, %v5625_v27 }
 0x81d   :  { %1721 = vmax.xlane.f32.xlu1 %v1720_v28 }
 0x81f   :  { %v5629_v23 = vpop.f32.mrb[48].mxu0 }
 0x820   :  { %7165 = vst [vmem:[#allocation19_spill] sm:$0xff] %v5629_v23  ;;  %v5631_v35 = vpop.f32.mrb[49].mxu0 }
 0x821   :  { %7166 = vst [vmem:[#allocation20_spill] sm:$0xff] %v5631_v35  ;;  %v5633_v37 = vpop.f32.mrb[50].mxu0  ;;  %v1723_v45 = vmax.f32 %v5629_v23, %v5631_v35 }
 0x822   :  { %7167 = vst [vmem:[#allocation21_spill] sm:$0xff] %v5633_v37  ;;  %v5637_v15 = vpop.f32.mrb[51].mxu0 }
 0x823   :  { %7168 = vst [vmem:[#allocation22_spill] sm:$0xff] %v5637_v15  ;;  %1724 = vmax.xlane.f32.xlu0 %v1723_v45  ;;  %v1726_v32 = vmax.f32 %v5633_v37, %v5637_v15 }
 0x825   :  { %1727 = vmax.xlane.f32.xlu1 %v1726_v32 }
 0x827   :  { %v5641_v39 = vpop.f32.mrb[52].mxu0 }
 0x828   :  { %7169 = vst [vmem:[#allocation23_spill] sm:$0xff] %v5641_v39  ;;  %v5643_v3 = vpop.f32.mrb[53].mxu0 }
 0x829   :  { %7170 = vst [vmem:[#allocation24_spill] sm:$0xff] %v5643_v3  ;;  %v5645_v53 = vpop.f32.mrb[54].mxu0  ;;  %v1729_v9 = vmax.f32 %v5641_v39, %v5643_v3 }
 0x82a   :  { %7171 = vst [vmem:[#allocation25_spill] sm:$0xff] %v5645_v53  ;;  %v5649_v1 = vpop.f32.mrb[55].mxu0 }
 0x82b   :  { %7172 = vst [vmem:[#allocation26_spill] sm:$0xff] %v5649_v1  ;;  %1730 = vmax.xlane.f32.xlu0 %v1729_v9  ;;  %v1732_v5 = vmax.f32 %v5645_v53, %v5649_v1 }
 0x82d   :  { %1733 = vmax.xlane.f32.xlu1 %v1732_v5 }
 0x82f   :  { %v5653_v56 = vpop.f32.mrb[56].mxu0 }
 0x830   :  { %7173 = vst [vmem:[#allocation27_spill] sm:$0xff] %v5653_v56  ;;  %v5655_v51 = vpop.f32.mrb[57].mxu0 }
 0x831   :  { %7174 = vst [vmem:[#allocation28_spill] sm:$0xff] %v5655_v51  ;;  %v5657_v36 = vpop.f32.mrb[58].mxu0  ;;  %v1735_v24 = vmax.f32 %v5653_v56, %v5655_v51 }
 0x832   :  { %7175 = vst [vmem:[#allocation29_spill] sm:$0xff] %v5657_v36  ;;  %v5661_v54 = vpop.f32.mrb[59].mxu0 }
 0x833   :  { %7176 = vst [vmem:[#allocation30_spill] sm:$0xff] %v5661_v54  ;;  %1736 = vmax.xlane.f32.xlu0 %v1735_v24  ;;  %v1738_v62 = vmax.f32 %v5657_v36, %v5661_v54 }
 0x835   :  { %1739 = vmax.xlane.f32.xlu1 %v1738_v62 }
 0x837   :  { %v5665_v13 = vpop.f32.mrb[60].mxu0 }
 0x838   :  { %7177 = vst [vmem:[#allocation31_spill] sm:$0xff] %v5665_v13  ;;  %v5667_v33 = vpop.f32.mrb[61].mxu0 }
 0x839   :  { %7178 = vst [vmem:[#allocation32_spill] sm:$0xff] %v5667_v33  ;;  %v5669_v63 = vpop.f32.mrb[62].mxu0  ;;  %v1741_v6 = vmax.f32 %v5665_v13, %v5667_v33 }
 0x83a   :  { %7179 = vst [vmem:[#allocation33_spill] sm:$0xff] %v5669_v63  ;;  %v5673_v38 = vpop.f32.mrb[63].mxu0 }
 0x83b   :  { %7180 = vst [vmem:[#allocation34_spill] sm:$0xff] %v5673_v38  ;;  %1742 = vmax.xlane.f32.xlu0 %v1741_v6  ;;  %v1744_v41 = vmax.f32 %v5669_v63, %v5673_v38 }
 0x83d   :  { %1745 = vmax.xlane.f32.xlu1 %v1744_v41 }
 0x83f   :  { %v5677_v18 = vpop.f32.mrb[64].mxu0 }
 0x840   :  { %7181 = vst [vmem:[#allocation35_spill] sm:$0xff] %v5677_v18  ;;  %v5679_v40 = vpop.f32.mrb[65].mxu0 }
 0x841   :  { %7182 = vst [vmem:[#allocation36_spill] sm:$0xff] %v5679_v40  ;;  %v5681_v0 = vpop.f32.mrb[66].mxu0  ;;  %v1747_v20 = vmax.f32 %v5677_v18, %v5679_v40 }
 0x842   :  { %7183 = vst [vmem:[#allocation37_spill] sm:$0xff] %v5681_v0  ;;  %v5685_v19 = vpop.f32.mrb[67].mxu0 }
 0x843   :  { %7184 = vst [vmem:[#allocation38_spill] sm:$0xff] %v5685_v19  ;;  %1748 = vmax.xlane.f32.xlu0 %v1747_v20  ;;  %v1750_v47 = vmax.f32 %v5681_v0, %v5685_v19 }
 0x845   :  { %1751 = vmax.xlane.f32.xlu1 %v1750_v47 }
 0x847   :  { %v5689_v10 = vpop.f32.mrb[68].mxu0 }
 0x848   :  { %7185 = vst [vmem:[#allocation39_spill] sm:$0xff] %v5689_v10  ;;  %v5691_v31 = vpop.f32.mrb[69].mxu0 }
 0x849   :  { %7186 = vst [vmem:[#allocation40_spill] sm:$0xff] %v5691_v31  ;;  %v5693_v22 = vpop.f32.mrb[70].mxu0  ;;  %v1753_v55 = vmax.f32 %v5689_v10, %v5691_v31 }
 0x84a   :  { %7187 = vst [vmem:[#allocation41_spill] sm:$0xff] %v5693_v22  ;;  %v5697_v11 = vpop.f32.mrb[71].mxu0 }
 0x84b   :  { %7188 = vst [vmem:[#allocation42_spill] sm:$0xff] %v5697_v11  ;;  %1754 = vmax.xlane.f32.xlu0 %v1753_v55  ;;  %v1756_v7 = vmax.f32 %v5693_v22, %v5697_v11 }
 0x84d   :  { %1757 = vmax.xlane.f32.xlu1 %v1756_v7 }
 0x84f   :  { %v5701_v21 = vpop.f32.mrb[72].mxu0 }
 0x850   :  { %7189 = vst [vmem:[#allocation43_spill] sm:$0xff] %v5701_v21  ;;  %v5703_v58 = vpop.f32.mrb[73].mxu0 }
 0x851   :  { %7190 = vst [vmem:[#allocation44_spill] sm:$0xff] %v5703_v58  ;;  %v5705_v48 = vpop.f32.mrb[74].mxu0 }
 0x852   :  { %7191 = vst [vmem:[#allocation45_spill] sm:$0xff] %v5705_v48  ;;  %v5709_v49 = vpop.f32.mrb[75].mxu0 }
 0x853   :  { %7192 = vst [vmem:[#allocation46_spill] sm:$0xff] %v5709_v49 }
 0x857   :  { %v5713_v50 = vpop.f32.mrb[76].mxu0 }
 0x858   :  { %7193 = vst [vmem:[#allocation47_spill] sm:$0xff] %v5713_v50  ;;  %v5715_v8 = vpop.f32.mrb[77].mxu0 }
 0x859   :  { %7194 = vst [vmem:[#allocation48_spill] sm:$0xff] %v5715_v8  ;;  %v5717_v2 = vpop.f32.mrb[78].mxu0 }
 0x85a   :  { %7195 = vst [vmem:[#allocation49_spill] sm:$0xff] %v5717_v2  ;;  %v5721_v45 = vpop.f32.mrb[79].mxu0 }
 0x85b   :  { %7196 = vst [vmem:[#allocation50_spill] sm:$0xff] %v5721_v45 }
 0x85f   :  { %v5725_v9 = vpop.f32.mrb[80].mxu0 }
 0x860   :  { %7197 = vst [vmem:[#allocation51_spill] sm:$0xff] %v5725_v9  ;;  %v5727_v5 = vpop.f32.mrb[81].mxu0 }
 0x861   :  { %7198 = vst [vmem:[#allocation52_spill] sm:$0xff] %v5727_v5  ;;  %v5729_v24 = vpop.f32.mrb[82].mxu0 }
 0x862   :  { %7199 = vst [vmem:[#allocation53_spill] sm:$0xff] %v5729_v24  ;;  %v5733_v6 = vpop.f32.mrb[83].mxu0 }
 0x863   :  { %7200 = vst [vmem:[#allocation54_spill] sm:$0xff] %v5733_v6 }
 0x867   :  { %v5737_v20 = vpop.f32.mrb[84].mxu0 }
 0x868   :  { %7201 = vst [vmem:[#allocation55_spill] sm:$0xff] %v5737_v20  ;;  %v5739_v47 = vpop.f32.mrb[85].mxu0 }
 0x869   :  { %7202 = vst [vmem:[#allocation56_spill] sm:$0xff] %v5739_v47  ;;  %v5741_v55 = vpop.f32.mrb[86].mxu0 }
 0x86a   :  { %7203 = vst [vmem:[#allocation57_spill] sm:$0xff] %v5741_v55  ;;  %v5745_v42 = vpop.f32.mrb[87].mxu0 }
 0x86b   :  { %7204 = vst [vmem:[#allocation58_spill] sm:$0xff] %v5745_v42 }
 0x86f   :  { %v5749_v62 = vpop.f32.mrb[88].mxu0 }
 0x870   :  { %7205 = vst [vmem:[#allocation59_spill] sm:$0xff] %v5749_v62  ;;  %v5751_v28 = vpop.f32.mrb[89].mxu0 }
 0x871   :  { %7206 = vst [vmem:[#allocation60_spill] sm:$0xff] %v5751_v28  ;;  %v5753_v12 = vpop.f32.mrb[90].mxu0 }
 0x872   :  { %7207 = vst [vmem:[#allocation61_spill] sm:$0xff] %v5753_v12  ;;  %v5757_v25 = vpop.f32.mrb[91].mxu0 }
 0x873   :  { %7208 = vst [vmem:[#allocation62_spill] sm:$0xff] %v5757_v25 }
 0x877   :  { %v5761_v7 = vpop.f32.mrb[92].mxu0 }
 0x878   :  { %7209 = vst [vmem:[#allocation63_spill] sm:$0xff] %v5761_v7  ;;  %v5763_v11 = vpop.f32.mrb[93].mxu0 }
 0x879   :  { %7210 = vst [vmem:[#allocation64_spill] sm:$0xff] %v5763_v11  ;;  %v5765_v22 = vpop.f32.mrb[94].mxu0 }
 0x87a   :  { %7211 = vst [vmem:[#allocation65_spill] sm:$0xff] %v5765_v22  ;;  %v5769_v31 = vpop.f32.mrb[95].mxu0 }
 0x87b   :  { %7212 = vst [vmem:[#allocation66_spill] sm:$0xff] %v5769_v31 }
 0x87f   :  { %v4257_v41 = vpop.f32.mrb[96].mxu0 }
 0x880   :  { %3344 = vst [vmem:[%s6968_s4 + $0x10] sm:$0xff] %v4257_v41  ;;  %v3279_v4 = vpop.f32.mrb[97].mxu0 }
 0x881   :  { %3342 = vst [vmem:[%s6968_s4] sm:$0xff] %v3279_v4  ;;  %v4258_v19 = vpop.f32.mrb[98].mxu0 }
 0x882   :  { %3345 = vst [vmem:[%s6968_s4 + $0x18] sm:$0xff] %v4258_v19  ;;  %v3282_v32 = vpop.f32.mrb[99].mxu0 }
 0x883   :  { %3343 = vst [vmem:[%s6968_s4 + $0x8] sm:$0xff] %v3282_v32 }
 0x887   :  { %v4261_v10 = vpop.f32.mrb[100].mxu0 }
 0x888   :  { %3348 = vst [vmem:[%s6968_s4 + $0x30] sm:$0xff] %v4261_v10  ;;  %v3295_v41 = vpop.f32.mrb[101].mxu0 }
 0x889   :  { %3346 = vst [vmem:[%s6968_s4 + $0x20] sm:$0xff] %v3295_v41  ;;  %v4262_v4 = vpop.f32.mrb[102].mxu0 }
 0x88a   :  { %3349 = vst [vmem:[%s6968_s4 + $0x38] sm:$0xff] %v4262_v4  ;;  %v3298_v19 = vpop.f32.mrb[103].mxu0 }
 0x88b   :  { %3347 = vst [vmem:[%s6968_s4 + $0x28] sm:$0xff] %v3298_v19 }
 0x88f   :  { %v4265_v32 = vpop.f32.mrb[104].mxu0 }
 0x890   :  { %3352 = vst [vmem:[%s6968_s4 + $0x50] sm:$0xff] %v4265_v32  ;;  %v1701_v10 = vpop.xlane.xlu0 %1700  ;;  %v3311_v0 = vpop.f32.mrb[105].mxu0 }
 0x891   :  { %vm1795_vm15 = vcmp.ge.f32.partialorder %v5581_v60, %v1701_v10  ;;  %vm1796_vm0 = vcmp.ge.f32.partialorder %v5583_v29, %v1701_v10  ;;  %3350 = vst [vmem:[%s6968_s4 + $0x40] sm:$0xff] %v3311_v0  ;;  %v4266_v41 = vpop.f32.mrb[106].mxu0 }
 0x892   :  { %v5806_v4 = vsel %vm1795_vm15, -1e+30, %v5581_v60  ;;  %v5809_v19 = vsel %vm1796_vm0, -1e+30, %v5583_v29  ;;  %3353 = vst [vmem:[%s6968_s4 + $0x58] sm:$0xff] %v4266_v41  ;;  %v1704_v32 = vpop.xlane.xlu1 %1703  ;;  %v3314_v40 = vpop.f32.mrb[107].mxu0 }
 0x893   :  { %vm1797_vm1 = vcmp.ge.f32.partialorder %v5585_v16, %v1704_v32  ;;  %vm1798_vm3 = vcmp.ge.f32.partialorder %v5589_v59, %v1704_v32  ;;  %3351 = vst [vmem:[%s6968_s4 + $0x48] sm:$0xff] %v3314_v40  ;;  %v1923_v0 = vmax.f32 %v5806_v4, %v5809_v19 }
 0x894   :  { %v5822_v10 = vsel %vm1797_vm1, -1e+30, %v5585_v16  ;;  %v5825_v29 = vsel %vm1798_vm3, -1e+30, %v5589_v59 }
 0x895   :  { %1924 = vmax.xlane.f32.xlu0 %v1923_v0  ;;  %v1926_v41 = vmax.f32 %v5822_v10, %v5825_v29  ;;  %v7213_v0 = vmax.f32 %v5701_v21, %v5703_v58 }
 0x897   :  { %1927 = vmax.xlane.f32.xlu1 %v1926_v41  ;;  %v4269_v60 = vpop.f32.mrb[108].mxu0 }
 0x898   :  { %3356 = vst [vmem:[%s6968_s4 + $0x70] sm:$0xff] %v4269_v60  ;;  %v1707_v40 = vpop.xlane.xlu0 %1706  ;;  %v3327_v32 = vpop.f32.mrb[109].mxu0 }
 0x899   :  { %vm1799_vm4 = vcmp.ge.f32.partialorder %v5593_v57, %v1707_v40  ;;  %vm1800_vm6 = vcmp.ge.f32.partialorder %v5595_v44, %v1707_v40  ;;  %3354 = vst [vmem:[%s6968_s4 + $0x60] sm:$0xff] %v3327_v32  ;;  %1760 = vmax.xlane.f32.xlu0 %v7213_v0  ;;  %v4270_v41 = vpop.f32.mrb[110].mxu0  ;;  %v7214_v32 = vmax.f32 %v5705_v48, %v5709_v49 }
 0x89a   :  { %v5841_v59 = vsel %vm1799_vm4, -1e+30, %v5593_v57  ;;  %v5844_v60 = vsel %vm1800_vm6, -1e+30, %v5595_v44  ;;  %3357 = vst [vmem:[%s6968_s4 + $0x78] sm:$0xff] %v4270_v41  ;;  %v1710_v40 = vpop.xlane.xlu1 %1709  ;;  %v3330_v16 = vpop.f32.mrb[111].mxu0 }
 0x89b   :  { %vm1801_vm7 = vcmp.ge.f32.partialorder %v5597_v61, %v1710_v40  ;;  %vm1802_vm9 = vcmp.ge.f32.partialorder %v5601_v52, %v1710_v40  ;;  %3355 = vst [vmem:[%s6968_s4 + $0x68] sm:$0xff] %v3330_v16  ;;  %1763 = vmax.xlane.f32.xlu1 %v7214_v32  ;;  %v1929_v0 = vmax.f32 %v5841_v59, %v5844_v60 }
 0x89c   :  { %v5860_v44 = vsel %vm1801_vm7, -1e+30, %v5597_v61  ;;  %v5863_v41 = vsel %vm1802_vm9, -1e+30, %v5601_v52  ;;  %v7215_v16 = vmax.f32 %v5713_v50, %v5715_v8 }
 0x89d   :  { %1930 = vmax.xlane.f32.xlu0 %v1929_v0  ;;  %v1932_v40 = vmax.f32 %v5860_v44, %v5863_v41 }
 0x89f   :  { %1933 = vmax.xlane.f32.xlu1 %v1932_v40  ;;  %v7216_v40 = vmax.f32 %v5717_v2, %v5721_v45 }
 0x8a0   :  { %v1713_v57 = vpop.xlane.xlu0 %1712 }
 0x8a1   :  { %vm1803_vm10 = vcmp.ge.f32.partialorder %v5605_v14, %v1713_v57  ;;  %vm1804_vm12 = vcmp.ge.f32.partialorder %v5607_v30, %v1713_v57  ;;  %1766 = vmax.xlane.f32.xlu0 %v7215_v16 }
 0x8a2   :  { %v5873_v32 = vsel %vm1803_vm10, -1e+30, %v5605_v14  ;;  %v5876_v52 = vsel %vm1804_vm12, -1e+30, %v5607_v30  ;;  %v1716_v0 = vpop.xlane.xlu1 %1715 }
 0x8a3   :  { %vm1805_vm14 = vcmp.ge.f32.partialorder %v5609_v34, %v1716_v0  ;;  %vm1806_vm5 = vcmp.ge.f32.partialorder %v5613_v43, %v1716_v0  ;;  %1769 = vmax.xlane.f32.xlu1 %v7216_v40  ;;  %v1935_v57 = vmax.f32 %v5873_v32, %v5876_v52  ;;  %v7217_v0 = vmax.f32 %v5725_v9, %v5727_v5 }
 0x8a4   :  { %v5886_v16 = vsel %vm1805_vm14, -1e+30, %v5609_v34  ;;  %v5889_v14 = vsel %vm1806_vm5, -1e+30, %v5613_v43 }
 0x8a5   :  { %1936 = vmax.xlane.f32.xlu0 %v1935_v57  ;;  %v1938_v30 = vmax.f32 %v5886_v16, %v5889_v14 }
 0x8a7   :  { %1939 = vmax.xlane.f32.xlu1 %v1938_v30  ;;  %v7218_v30 = vmax.f32 %v5729_v24, %v5733_v6 }
 0x8a8   :  { %v1719_v61 = vpop.xlane.xlu0 %1718 }
 0x8a9   :  { %vm1807_vm2 = vcmp.ge.f32.partialorder %v5617_v46, %v1719_v61  ;;  %vm1808_vm8 = vcmp.ge.f32.partialorder %v5619_v17, %v1719_v61  ;;  %1772 = vmax.xlane.f32.xlu0 %v7217_v0 }
 0x8aa   :  { %v5899_v40 = vsel %vm1807_vm2, -1e+30, %v5617_v46  ;;  %v5902_v43 = vsel %vm1808_vm8, -1e+30, %v5619_v17  ;;  %v1722_v57 = vpop.xlane.xlu1 %1721 }
 0x8ab   :  { %vm1809_vm11 = vcmp.ge.f32.partialorder %v5621_v26, %v1722_v57  ;;  %vm1810_vm13 = vcmp.ge.f32.partialorder %v5625_v27, %v1722_v57  ;;  %1775 = vmax.xlane.f32.xlu1 %v7218_v30  ;;  %v1941_v61 = vmax.f32 %v5899_v40, %v5902_v43  ;;  %v7219_v57 = vmax.f32 %v5737_v20, %v5739_v47 }
 0x8ac   :  { %v5912_v0 = vsel %vm1809_vm11, -1e+30, %v5621_v26  ;;  %v5915_v46 = vsel %vm1810_vm13, -1e+30, %v5625_v27 }
 0x8ad   :  { %1942 = vmax.xlane.f32.xlu0 %v1941_v61  ;;  %v1944_v17 = vmax.f32 %v5912_v0, %v5915_v46 }
 0x8af   :  { %1945 = vmax.xlane.f32.xlu1 %v1944_v17  ;;  %v7220_v17 = vmax.f32 %v5741_v55, %v5745_v42 }
 0x8b0   :  { %v1725_v34 = vpop.xlane.xlu0 %1724 }
 0x8b1   :  { %vm1811_vm15 = vcmp.ge.f32.partialorder %v5629_v23, %v1725_v34  ;;  %vm1812_vm0 = vcmp.ge.f32.partialorder %v5631_v35, %v1725_v34  ;;  %1778 = vmax.xlane.f32.xlu0 %v7219_v57 }
 0x8b2   :  { %v5925_v30 = vsel %vm1811_vm15, -1e+30, %v5629_v23  ;;  %v5928_v27 = vsel %vm1812_vm0, -1e+30, %v5631_v35  ;;  %v1728_v61 = vpop.xlane.xlu1 %1727 }
 0x8b3   :  { %vm1813_vm1 = vcmp.ge.f32.partialorder %v5633_v37, %v1728_v61  ;;  %vm1814_vm3 = vcmp.ge.f32.partialorder %v5637_v15, %v1728_v61  ;;  %1781 = vmax.xlane.f32.xlu1 %v7220_v17  ;;  %v1947_v34 = vmax.f32 %v5925_v30, %v5928_v27  ;;  %v7221_v61 = vmax.f32 %v5749_v62, %v5751_v28 }
 0x8b4   :  { %v5938_v57 = vsel %vm1813_vm1, -1e+30, %v5633_v37  ;;  %v5941_v23 = vsel %vm1814_vm3, -1e+30, %v5637_v15 }
 0x8b5   :  { %1948 = vmax.xlane.f32.xlu0 %v1947_v34  ;;  %v1950_v35 = vmax.f32 %v5938_v57, %v5941_v23 }
 0x8b7   :  { %1951 = vmax.xlane.f32.xlu1 %v1950_v35  ;;  %v7222_v35 = vmax.f32 %v5753_v12, %v5757_v25 }
 0x8b8   :  { %v1731_v26 = vpop.xlane.xlu0 %1730 }
 0x8b9   :  { %vm1815_vm4 = vcmp.ge.f32.partialorder %v5641_v39, %v1731_v26  ;;  %vm1816_vm6 = vcmp.ge.f32.partialorder %v5643_v3, %v1731_v26  ;;  %1784 = vmax.xlane.f32.xlu0 %v7221_v61 }
 0x8ba   :  { %v5951_v17 = vsel %vm1815_vm4, -1e+30, %v5641_v39  ;;  %v5954_v15 = vsel %vm1816_vm6, -1e+30, %v5643_v3  ;;  %v1734_v34 = vpop.xlane.xlu1 %1733 }
 0x8bb   :  { %vm1817_vm7 = vcmp.ge.f32.partialorder %v5645_v53, %v1734_v34  ;;  %vm1818_vm9 = vcmp.ge.f32.partialorder %v5649_v1, %v1734_v34  ;;  %1787 = vmax.xlane.f32.xlu1 %v7222_v35  ;;  %v1953_v26 = vmax.f32 %v5951_v17, %v5954_v15  ;;  %v7223_v34 = vmax.f32 %v5761_v7, %v5763_v11 }
 0x8bc   :  { %v5964_v61 = vsel %vm1817_vm7, -1e+30, %v5645_v53  ;;  %v5967_v39 = vsel %vm1818_vm9, -1e+30, %v5649_v1 }
 0x8bd   :  { %1954 = vmax.xlane.f32.xlu0 %v1953_v26  ;;  %v1956_v3 = vmax.f32 %v5964_v61, %v5967_v39 }
 0x8bf   :  { %1957 = vmax.xlane.f32.xlu1 %v1956_v3  ;;  %v7224_v3 = vmax.f32 %v5765_v22, %v5769_v31 }
 0x8c0   :  { %v1737_v37 = vpop.xlane.xlu0 %1736 }
 0x8c1   :  { %vm1819_vm10 = vcmp.ge.f32.partialorder %v5653_v56, %v1737_v37  ;;  %vm1820_vm12 = vcmp.ge.f32.partialorder %v5655_v51, %v1737_v37  ;;  %1790 = vmax.xlane.f32.xlu0 %v7223_v34 }
 0x8c2   :  { %v5977_v35 = vsel %vm1819_vm10, -1e+30, %v5653_v56  ;;  %v5980_v1 = vsel %vm1820_vm12, -1e+30, %v5655_v51  ;;  %v1740_v26 = vpop.xlane.xlu1 %1739 }
 0x8c3   :  { %vm1821_vm14 = vcmp.ge.f32.partialorder %v5657_v36, %v1740_v26  ;;  %vm1822_vm5 = vcmp.ge.f32.partialorder %v5661_v54, %v1740_v26  ;;  %1793 = vmax.xlane.f32.xlu1 %v7224_v3  ;;  %v1959_v37 = vmax.f32 %v5977_v35, %v5980_v1 }
 0x8c4   :  { %v5990_v34 = vsel %vm1821_vm14, -1e+30, %v5657_v36  ;;  %v5993_v56 = vsel %vm1822_vm5, -1e+30, %v5661_v54 }
 0x8c5   :  { %1960 = vmax.xlane.f32.xlu0 %v1959_v37  ;;  %v1962_v51 = vmax.f32 %v5990_v34, %v5993_v56 }
 0x8c7   :  { %1963 = vmax.xlane.f32.xlu1 %v1962_v51 }
 0x8c8   :  { %v1743_v53 = vpop.xlane.xlu0 %1742 }
 0x8c9   :  { %vm1823_vm2 = vcmp.ge.f32.partialorder %v5665_v13, %v1743_v53  ;;  %vm1824_vm8 = vcmp.ge.f32.partialorder %v5667_v33, %v1743_v53 }
 0x8ca   :  { %v6000_v26 = vsel %vm1823_vm2, -1e+30, %v5665_v13  ;;  %v6003_v3 = vsel %vm1824_vm8, -1e+30, %v5667_v33  ;;  %v1746_v36 = vpop.xlane.xlu1 %1745  ;;  %v7229_v13 = vld [vmem:[#allocation36_spill] sm:$0xff] }
 0x8cb   :  { %7225 = vst [vmem:[#allocation67_spill] sm:$0xff] %v6000_v26  ;;  %7226 = vst [vmem:[#allocation68_spill] sm:$0xff] %v6003_v3  ;;  %vm1825_vm11 = vcmp.ge.f32.partialorder %v5669_v63, %v1746_v36  ;;  %vm1826_vm13 = vcmp.ge.f32.partialorder %v5673_v38, %v1746_v36  ;;  %v1965_v37 = vmax.f32 %v6000_v26, %v6003_v3  ;;  %v7232_v26 = vld [vmem:[#allocation37_spill] sm:$0xff] }
 0x8cc   :  { %v6010_v51 = vsel %vm1825_vm11, -1e+30, %v5669_v63  ;;  %v6013_v54 = vsel %vm1826_vm13, -1e+30, %v5673_v38  ;;  %v7233_v38 = vld [vmem:[#allocation38_spill] sm:$0xff] }
 0x8cd   :  { %7227 = vst [vmem:[#allocation69_spill] sm:$0xff] %v6010_v51  ;;  %7228 = vst [vmem:[#allocation70_spill] sm:$0xff] %v6013_v54  ;;  %1966 = vmax.xlane.f32.xlu0 %v1965_v37  ;;  %v1968_v53 = vmax.f32 %v6010_v51, %v6013_v54  ;;  %v7236_v51 = vld [vmem:[#allocation40_spill] sm:$0xff] }
 0x8cf   :  { %1969 = vmax.xlane.f32.xlu1 %v1968_v53 }
 0x8d0   :  { %v1749_v33 = vpop.xlane.xlu0 %1748 }
 0x8d1   :  { %vm1827_vm15 = vcmp.ge.f32.partialorder %v5677_v18, %v1749_v33  ;;  %vm1828_vm0 = vcmp.ge.f32.partialorder %v7229_v13, %v1749_v33 }
 0x8d2   :  { %v6020_v36 = vsel %vm1827_vm15, -1e+30, %v5677_v18  ;;  %v6023_v3 = vsel %vm1828_vm0, -1e+30, %v7229_v13  ;;  %v1752_v63 = vpop.xlane.xlu1 %1751  ;;  %v7235_v18 = vld [vmem:[#allocation39_spill] sm:$0xff] }
 0x8d3   :  { %7230 = vst [vmem:[#allocation71_spill] sm:$0xff] %v6020_v36  ;;  %7231 = vst [vmem:[#allocation72_spill] sm:$0xff] %v6023_v3  ;;  %vm1829_vm1 = vcmp.ge.f32.partialorder %v7232_v26, %v1752_v63  ;;  %vm1830_vm3 = vcmp.ge.f32.partialorder %v7233_v38, %v1752_v63  ;;  %v1971_v37 = vmax.f32 %v6020_v36, %v6023_v3  ;;  %v7237_v36 = vld [vmem:[#allocation41_spill] sm:$0xff] }
 0x8d4   :  { %v6030_v53 = vsel %vm1829_vm1, -1e+30, %v7232_v26  ;;  %v6033_v54 = vsel %vm1830_vm3, -1e+30, %v7233_v38  ;;  %v7238_v38 = vld [vmem:[#allocation42_spill] sm:$0xff] }
 0x8d5   :  { %7234 = vst [vmem:[#allocation73_spill] sm:$0xff] %v6033_v54  ;;  %1972 = vmax.xlane.f32.xlu0 %v1971_v37  ;;  %v1974_v33 = vmax.f32 %v6030_v53, %v6033_v54 }
 0x8d7   :  { %1975 = vmax.xlane.f32.xlu1 %v1974_v33 }
 0x8d8   :  { %v1755_v13 = vpop.xlane.xlu0 %1754 }
 0x8d9   :  { %vm1831_vm4 = vcmp.ge.f32.partialorder %v7235_v18, %v1755_v13  ;;  %vm1832_vm6 = vcmp.ge.f32.partialorder %v7236_v51, %v1755_v13 }
 0x8da   :  { %v6040_v63 = vsel %vm1831_vm4, -1e+30, %v7235_v18  ;;  %v6043_v3 = vsel %vm1832_vm6, -1e+30, %v7236_v51  ;;  %v1758_v26 = vpop.xlane.xlu1 %1757 }
 0x8db   :  { %vm1833_vm7 = vcmp.ge.f32.partialorder %v7237_v36, %v1758_v26  ;;  %vm1834_vm9 = vcmp.ge.f32.partialorder %v7238_v38, %v1758_v26  ;;  %v1977_v37 = vmax.f32 %v6040_v63, %v6043_v3 }
 0x8dc   :  { %v6050_v33 = vsel %vm1833_vm7, -1e+30, %v7237_v36  ;;  %v6053_v54 = vsel %vm1834_vm9, -1e+30, %v7238_v38 }
 0x8dd   :  { %1978 = vmax.xlane.f32.xlu0 %v1977_v37  ;;  %v1980_v13 = vmax.f32 %v6050_v33, %v6053_v54 }
 0x8df   :  { %1981 = vmax.xlane.f32.xlu1 %v1980_v13 }
 0x922   :  { %v1925_v51 = vpop.xlane.xlu0 %1924 }
 0x923   :  { %vm2019_vm10 = vcmp.ge.f32.partialorder %v5806_v4, %v1925_v51  ;;  %vm2020_vm12 = vcmp.ge.f32.partialorder %v5809_v19, %v1925_v51 }
 0x924   :  { %v6060_v26 = vsel %vm2019_vm10, -1e+30, %v5806_v4  ;;  %v6063_v18 = vsel %vm2020_vm12, -1e+30, %v5809_v19  ;;  %v1928_v36 = vpop.xlane.xlu1 %1927 }
 0x925   :  { %vm2021_vm14 = vcmp.ge.f32.partialorder %v5822_v10, %v1928_v36  ;;  %vm2022_vm5 = vcmp.ge.f32.partialorder %v5825_v29, %v1928_v36  ;;  %v2147_v37 = vmax.f32 %v6060_v26, %v6063_v18 }
 0x926   :  { %v6070_v13 = vsel %vm2021_vm14, -1e+30, %v5822_v10  ;;  %v6073_v38 = vsel %vm2022_vm5, -1e+30, %v5825_v29  ;;  %v1761_v51 = vpop.xlane.xlu0 %1760 }
 0x927   :  { %vm1835_vm2 = vcmp.ge.f32.partialorder %v5701_v21, %v1761_v51  ;;  %vm1836_vm8 = vcmp.ge.f32.partialorder %v5703_v58, %v1761_v51  ;;  %2148 = vmax.xlane.f32.xlu0 %v2147_v37  ;;  %v2150_v4 = vmax.f32 %v6070_v13, %v6073_v38 }
 0x928   :  { %v6080_v19 = vsel %vm1835_vm2, -1e+30, %v5701_v21  ;;  %v6083_v36 = vsel %vm1836_vm8, -1e+30, %v5703_v58  ;;  %v1764_v10 = vpop.xlane.xlu1 %1763 }
 0x929   :  { %vm1837_vm11 = vcmp.ge.f32.partialorder %v5705_v48, %v1764_v10  ;;  %vm1838_vm13 = vcmp.ge.f32.partialorder %v5709_v49, %v1764_v10  ;;  %2151 = vmax.xlane.f32.xlu1 %v2150_v4  ;;  %v1983_v29 = vmax.f32 %v6080_v19, %v6083_v36 }
 0x92a   :  { %v6090_v37 = vsel %vm1837_vm11, -1e+30, %v5705_v48  ;;  %v6093_v51 = vsel %vm1838_vm13, -1e+30, %v5709_v49  ;;  %v1931_v21 = vpop.xlane.xlu0 %1930 }
 0x92b   :  { %vm2023_vm15 = vcmp.ge.f32.partialorder %v5841_v59, %v1931_v21  ;;  %vm2024_vm0 = vcmp.ge.f32.partialorder %v5844_v60, %v1931_v21  ;;  %1984 = vmax.xlane.f32.xlu0 %v1983_v29  ;;  %v1986_v58 = vmax.f32 %v6090_v37, %v6093_v51 }
 0x92c   :  { %v6100_v4 = vsel %vm2023_vm15, -1e+30, %v5841_v59  ;;  %v6103_v10 = vsel %vm2024_vm0, -1e+30, %v5844_v60  ;;  %v1934_v48 = vpop.xlane.xlu1 %1933 }
 0x92d   :  { %vm2025_vm1 = vcmp.ge.f32.partialorder %v5860_v44, %v1934_v48  ;;  %vm2026_vm3 = vcmp.ge.f32.partialorder %v5863_v41, %v1934_v48  ;;  %1987 = vmax.xlane.f32.xlu1 %v1986_v58  ;;  %v2153_v49 = vmax.f32 %v6100_v4, %v6103_v10 }
 0x92e   :  { %v6110_v21 = vsel %vm2025_vm1, -1e+30, %v5860_v44  ;;  %v6113_v29 = vsel %vm2026_vm3, -1e+30, %v5863_v41  ;;  %v1767_v59 = vpop.xlane.xlu0 %1766 }
 0x92f   :  { %vm1839_vm4 = vcmp.ge.f32.partialorder %v5713_v50, %v1767_v59  ;;  %vm1840_vm6 = vcmp.ge.f32.partialorder %v5715_v8, %v1767_v59  ;;  %2154 = vmax.xlane.f32.xlu0 %v2153_v49  ;;  %v2156_v60 = vmax.f32 %v6110_v21, %v6113_v29 }
 0x930   :  { %v6120_v58 = vsel %vm1839_vm4, -1e+30, %v5713_v50  ;;  %v6123_v48 = vsel %vm1840_vm6, -1e+30, %v5715_v8  ;;  %v1770_v44 = vpop.xlane.xlu1 %1769 }
 0x931   :  { %vm1841_vm7 = vcmp.ge.f32.partialorder %v5717_v2, %v1770_v44  ;;  %vm1842_vm9 = vcmp.ge.f32.partialorder %v5721_v45, %v1770_v44  ;;  %2157 = vmax.xlane.f32.xlu1 %v2156_v60  ;;  %v1989_v41 = vmax.f32 %v6120_v58, %v6123_v48 }
 0x932   :  { %v6130_v49 = vsel %vm1841_vm7, -1e+30, %v5717_v2  ;;  %v6133_v59 = vsel %vm1842_vm9, -1e+30, %v5721_v45  ;;  %v1937_v50 = vpop.xlane.xlu0 %1936 }
 0x933   :  { %vm2027_vm10 = vcmp.ge.f32.partialorder %v5873_v32, %v1937_v50  ;;  %vm2028_vm12 = vcmp.ge.f32.partialorder %v5876_v52, %v1937_v50  ;;  %1990 = vmax.xlane.f32.xlu0 %v1989_v41  ;;  %v1992_v8 = vmax.f32 %v6130_v49, %v6133_v59 }
 0x934   :  { %v6140_v60 = vsel %vm2027_vm10, -1e+30, %v5873_v32  ;;  %v6143_v44 = vsel %vm2028_vm12, -1e+30, %v5876_v52  ;;  %v1940_v2 = vpop.xlane.xlu1 %1939 }
 0x935   :  { %vm2029_vm14 = vcmp.ge.f32.partialorder %v5886_v16, %v1940_v2  ;;  %vm2030_vm5 = vcmp.ge.f32.partialorder %v5889_v14, %v1940_v2  ;;  %1993 = vmax.xlane.f32.xlu1 %v1992_v8  ;;  %v2159_v45 = vmax.f32 %v6140_v60, %v6143_v44 }
 0x936   :  { %v6150_v50 = vsel %vm2029_vm14, -1e+30, %v5886_v16  ;;  %v6153_v41 = vsel %vm2030_vm5, -1e+30, %v5889_v14  ;;  %v1773_v32 = vpop.xlane.xlu0 %1772 }
 0x937   :  { %vm1843_vm2 = vcmp.ge.f32.partialorder %v5725_v9, %v1773_v32  ;;  %vm1844_vm8 = vcmp.ge.f32.partialorder %v5727_v5, %v1773_v32  ;;  %2160 = vmax.xlane.f32.xlu0 %v2159_v45  ;;  %v2162_v52 = vmax.f32 %v6150_v50, %v6153_v41 }
 0x938   :  { %v6160_v8 = vsel %vm1843_vm2, -1e+30, %v5725_v9  ;;  %v6163_v2 = vsel %vm1844_vm8, -1e+30, %v5727_v5  ;;  %v1776_v16 = vpop.xlane.xlu1 %1775 }
 0x939   :  { %vm1845_vm11 = vcmp.ge.f32.partialorder %v5729_v24, %v1776_v16  ;;  %vm1846_vm13 = vcmp.ge.f32.partialorder %v5733_v6, %v1776_v16  ;;  %2163 = vmax.xlane.f32.xlu1 %v2162_v52  ;;  %v1995_v14 = vmax.f32 %v6160_v8, %v6163_v2 }
 0x93a   :  { %v6170_v45 = vsel %vm1845_vm11, -1e+30, %v5729_v24  ;;  %v6173_v32 = vsel %vm1846_vm13, -1e+30, %v5733_v6  ;;  %v1943_v9 = vpop.xlane.xlu0 %1942 }
 0x93b   :  { %vm2031_vm15 = vcmp.ge.f32.partialorder %v5899_v40, %v1943_v9  ;;  %vm2032_vm0 = vcmp.ge.f32.partialorder %v5902_v43, %v1943_v9  ;;  %1996 = vmax.xlane.f32.xlu0 %v1995_v14  ;;  %v1998_v5 = vmax.f32 %v6170_v45, %v6173_v32 }
 0x93c   :  { %v6180_v52 = vsel %vm2031_vm15, -1e+30, %v5899_v40  ;;  %v6183_v16 = vsel %vm2032_vm0, -1e+30, %v5902_v43  ;;  %v1946_v24 = vpop.xlane.xlu1 %1945 }
 0x93d   :  { %vm2033_vm1 = vcmp.ge.f32.partialorder %v5912_v0, %v1946_v24  ;;  %vm2034_vm3 = vcmp.ge.f32.partialorder %v5915_v46, %v1946_v24  ;;  %1999 = vmax.xlane.f32.xlu1 %v1998_v5  ;;  %v2165_v6 = vmax.f32 %v6180_v52, %v6183_v16 }
 0x93e   :  { %v6190_v9 = vsel %vm2033_vm1, -1e+30, %v5912_v0  ;;  %v6193_v14 = vsel %vm2034_vm3, -1e+30, %v5915_v46  ;;  %v1779_v40 = vpop.xlane.xlu0 %1778 }
 0x93f   :  { %vm1847_vm4 = vcmp.ge.f32.partialorder %v5737_v20, %v1779_v40  ;;  %vm1848_vm6 = vcmp.ge.f32.partialorder %v5739_v47, %v1779_v40  ;;  %2166 = vmax.xlane.f32.xlu0 %v2165_v6  ;;  %v2168_v43 = vmax.f32 %v6190_v9, %v6193_v14 }
 0x940   :  { %v6200_v5 = vsel %vm1847_vm4, -1e+30, %v5737_v20  ;;  %v6203_v24 = vsel %vm1848_vm6, -1e+30, %v5739_v47  ;;  %v1782_v0 = vpop.xlane.xlu1 %1781 }
 0x941   :  { %vm1849_vm7 = vcmp.ge.f32.partialorder %v5741_v55, %v1782_v0  ;;  %vm1850_vm9 = vcmp.ge.f32.partialorder %v5745_v42, %v1782_v0  ;;  %2169 = vmax.xlane.f32.xlu1 %v2168_v43  ;;  %v2001_v46 = vmax.f32 %v6200_v5, %v6203_v24 }
 0x942   :  { %v6210_v6 = vsel %vm1849_vm7, -1e+30, %v5741_v55  ;;  %v6213_v40 = vsel %vm1850_vm9, -1e+30, %v5745_v42  ;;  %v1949_v20 = vpop.xlane.xlu0 %1948 }
 0x943   :  { %vm2035_vm10 = vcmp.ge.f32.partialorder %v5925_v30, %v1949_v20  ;;  %vm2036_vm12 = vcmp.ge.f32.partialorder %v5928_v27, %v1949_v20  ;;  %2002 = vmax.xlane.f32.xlu0 %v2001_v46  ;;  %v2004_v47 = vmax.f32 %v6210_v6, %v6213_v40 }
 0x944   :  { %v6220_v43 = vsel %vm2035_vm10, -1e+30, %v5925_v30  ;;  %v6223_v0 = vsel %vm2036_vm12, -1e+30, %v5928_v27  ;;  %v1952_v55 = vpop.xlane.xlu1 %1951 }
 0x945   :  { %vm2037_vm14 = vcmp.ge.f32.partialorder %v5938_v57, %v1952_v55  ;;  %vm2038_vm5 = vcmp.ge.f32.partialorder %v5941_v23, %v1952_v55  ;;  %2005 = vmax.xlane.f32.xlu1 %v2004_v47  ;;  %v2171_v42 = vmax.f32 %v6220_v43, %v6223_v0 }
 0x946   :  { %v6230_v20 = vsel %vm2037_vm14, -1e+30, %v5938_v57  ;;  %v6233_v46 = vsel %vm2038_vm5, -1e+30, %v5941_v23  ;;  %v1785_v30 = vpop.xlane.xlu0 %1784 }
 0x947   :  { %vm1851_vm2 = vcmp.ge.f32.partialorder %v5749_v62, %v1785_v30  ;;  %vm1852_vm8 = vcmp.ge.f32.partialorder %v5751_v28, %v1785_v30  ;;  %2172 = vmax.xlane.f32.xlu0 %v2171_v42  ;;  %v2174_v27 = vmax.f32 %v6230_v20, %v6233_v46 }
 0x948   :  { %v6240_v47 = vsel %vm1851_vm2, -1e+30, %v5749_v62  ;;  %v6243_v55 = vsel %vm1852_vm8, -1e+30, %v5751_v28  ;;  %v1788_v57 = vpop.xlane.xlu1 %1787 }
 0x949   :  { %vm1853_vm11 = vcmp.ge.f32.partialorder %v5753_v12, %v1788_v57  ;;  %vm1854_vm13 = vcmp.ge.f32.partialorder %v5757_v25, %v1788_v57  ;;  %2175 = vmax.xlane.f32.xlu1 %v2174_v27  ;;  %v2007_v23 = vmax.f32 %v6240_v47, %v6243_v55 }
 0x94a   :  { %v6250_v42 = vsel %vm1853_vm11, -1e+30, %v5753_v12  ;;  %v6253_v30 = vsel %vm1854_vm13, -1e+30, %v5757_v25  ;;  %v1955_v62 = vpop.xlane.xlu0 %1954 }
 0x94b   :  { %vm2039_vm15 = vcmp.ge.f32.partialorder %v5951_v17, %v1955_v62  ;;  %vm2040_vm0 = vcmp.ge.f32.partialorder %v5954_v15, %v1955_v62  ;;  %2008 = vmax.xlane.f32.xlu0 %v2007_v23  ;;  %v2010_v28 = vmax.f32 %v6250_v42, %v6253_v30 }
 0x94c   :  { %v6260_v27 = vsel %vm2039_vm15, -1e+30, %v5951_v17  ;;  %v6263_v57 = vsel %vm2040_vm0, -1e+30, %v5954_v15  ;;  %v1958_v12 = vpop.xlane.xlu1 %1957 }
 0x94d   :  { %vm2041_vm1 = vcmp.ge.f32.partialorder %v5964_v61, %v1958_v12  ;;  %vm2042_vm3 = vcmp.ge.f32.partialorder %v5967_v39, %v1958_v12  ;;  %2011 = vmax.xlane.f32.xlu1 %v2010_v28  ;;  %v2177_v25 = vmax.f32 %v6260_v27, %v6263_v57 }
 0x94e   :  { %v6270_v62 = vsel %vm2041_vm1, -1e+30, %v5964_v61  ;;  %v6273_v23 = vsel %vm2042_vm3, -1e+30, %v5967_v39  ;;  %v1791_v17 = vpop.xlane.xlu0 %1790 }
 0x94f   :  { %vm1855_vm4 = vcmp.ge.f32.partialorder %v5761_v7, %v1791_v17  ;;  %vm1856_vm6 = vcmp.ge.f32.partialorder %v5763_v11, %v1791_v17  ;;  %2178 = vmax.xlane.f32.xlu0 %v2177_v25  ;;  %v2180_v15 = vmax.f32 %v6270_v62, %v6273_v23 }
 0x950   :  { %v6280_v12 = vsel %vm1855_vm4, -1e+30, %v5761_v7  ;;  %v6283_v28 = vsel %vm1856_vm6, -1e+30, %v5763_v11  ;;  %v1794_v61 = vpop.xlane.xlu1 %1793 }
 0x951   :  { %vm1857_vm7 = vcmp.ge.f32.partialorder %v5765_v22, %v1794_v61  ;;  %vm1858_vm9 = vcmp.ge.f32.partialorder %v5769_v31, %v1794_v61  ;;  %2181 = vmax.xlane.f32.xlu1 %v2180_v15  ;;  %v2013_v39 = vmax.f32 %v6280_v12, %v6283_v28 }
 0x952   :  { %v6290_v25 = vsel %vm1857_vm7, -1e+30, %v5765_v22  ;;  %v6293_v17 = vsel %vm1858_vm9, -1e+30, %v5769_v31  ;;  %v1961_v7 = vpop.xlane.xlu0 %1960 }
 0x953   :  { %7239 = vst [vmem:[#allocation74_spill] sm:$0xff] %v6290_v25  ;;  %7240 = vst [vmem:[#allocation75_spill] sm:$0xff] %v6293_v17  ;;  %vm2043_vm10 = vcmp.ge.f32.partialorder %v5977_v35, %v1961_v7  ;;  %vm2044_vm12 = vcmp.ge.f32.partialorder %v5980_v1, %v1961_v7  ;;  %2014 = vmax.xlane.f32.xlu0 %v2013_v39  ;;  %v2016_v11 = vmax.f32 %v6290_v25, %v6293_v17  ;;  %v7244_v17 = vld [vmem:[#allocation67_spill] sm:$0xff]  ;;  %v7245_v25 = vld [vmem:[#allocation68_spill] sm:$0xff] }
 0x954   :  { %v6300_v15 = vsel %vm2043_vm10, -1e+30, %v5977_v35  ;;  %v6303_v61 = vsel %vm2044_vm12, -1e+30, %v5980_v1  ;;  %v1964_v22 = vpop.xlane.xlu1 %1963 }
 0x955   :  { %7241 = vst [vmem:[#allocation76_spill] sm:$0xff] %v6303_v61  ;;  %vm2045_vm14 = vcmp.ge.f32.partialorder %v5990_v34, %v1964_v22  ;;  %vm2046_vm5 = vcmp.ge.f32.partialorder %v5993_v56, %v1964_v22  ;;  %2017 = vmax.xlane.f32.xlu1 %v2016_v11  ;;  %v2183_v31 = vmax.f32 %v6300_v15, %v6303_v61  ;;  %v7247_v61 = vld [vmem:[#allocation69_spill] sm:$0xff] }
 0x956   :  { %v6310_v7 = vsel %vm2045_vm14, -1e+30, %v5990_v34  ;;  %v6313_v39 = vsel %vm2046_vm5, -1e+30, %v5993_v56  ;;  %v7248_v56 = vld [vmem:[#allocation70_spill] sm:$0xff] }
 0x957   :  { %7242 = vst [vmem:[#allocation77_spill] sm:$0xff] %v6310_v7  ;;  %7243 = vst [vmem:[#allocation78_spill] sm:$0xff] %v6313_v39  ;;  %2184 = vmax.xlane.f32.xlu0 %v2183_v31  ;;  %v2186_v1 = vmax.f32 %v6310_v7, %v6313_v39  ;;  %v7251_v7 = vld [vmem:[#allocation72_spill] sm:$0xff] }
 0x959   :  { %2187 = vmax.xlane.f32.xlu1 %v2186_v1 }
 0x95a   :  { %v1967_v35 = vpop.xlane.xlu0 %1966 }
 0x95b   :  { %vm2047_vm2 = vcmp.ge.f32.partialorder %v7244_v17, %v1967_v35  ;;  %vm2048_vm8 = vcmp.ge.f32.partialorder %v7245_v25, %v1967_v35  ;;  %v7250_v35 = vld [vmem:[#allocation71_spill] sm:$0xff] }
 0x95c   :  { %v6320_v22 = vsel %vm2047_vm2, -1e+30, %v7244_v17  ;;  %v6323_v11 = vsel %vm2048_vm8, -1e+30, %v7245_v25  ;;  %v1970_v34 = vpop.xlane.xlu1 %1969 }
 0x95d   :  { %7246 = vst [vmem:[#allocation67_spill] sm:$0xff] %v6323_v11  ;;  %vm2049_vm11 = vcmp.ge.f32.partialorder %v7247_v61, %v1970_v34  ;;  %vm2050_vm13 = vcmp.ge.f32.partialorder %v7248_v56, %v1970_v34  ;;  %v2189_v31 = vmax.f32 %v6320_v22, %v6323_v11 }
 0x95e   :  { %v6330_v1 = vsel %vm2049_vm11, -1e+30, %v7247_v61  ;;  %v6333_v39 = vsel %vm2050_vm13, -1e+30, %v7248_v56  ;;  %v7252_v56 = vld [vmem:[#allocation73_spill] sm:$0xff] }
 0x95f   :  { %7249 = vst [vmem:[#allocation68_spill] sm:$0xff] %v6333_v39  ;;  %2190 = vmax.xlane.f32.xlu0 %v2189_v31  ;;  %v2192_v17 = vmax.f32 %v6330_v1, %v6333_v39 }
 0x961   :  { %2193 = vmax.xlane.f32.xlu1 %v2192_v17 }
 0x962   :  { %v1973_v25 = vpop.xlane.xlu0 %1972 }
 0x963   :  { %vm2051_vm15 = vcmp.ge.f32.partialorder %v7250_v35, %v1973_v25  ;;  %vm2052_vm0 = vcmp.ge.f32.partialorder %v7251_v7, %v1973_v25 }
 0x964   :  { %v6340_v34 = vsel %vm2051_vm15, -1e+30, %v7250_v35  ;;  %v6343_v11 = vsel %vm2052_vm0, -1e+30, %v7251_v7  ;;  %v1976_v61 = vpop.xlane.xlu1 %1975 }
 0x965   :  { %vm2053_vm1 = vcmp.ge.f32.partialorder %v6030_v53, %v1976_v61  ;;  %vm2054_vm3 = vcmp.ge.f32.partialorder %v7252_v56, %v1976_v61  ;;  %v2195_v31 = vmax.f32 %v6340_v34, %v6343_v11 }
 0x966   :  { %v6350_v17 = vsel %vm2053_vm1, -1e+30, %v6030_v53  ;;  %v6353_v39 = vsel %vm2054_vm3, -1e+30, %v7252_v56 }
 0x967   :  { %2196 = vmax.xlane.f32.xlu0 %v2195_v31  ;;  %v2198_v25 = vmax.f32 %v6350_v17, %v6353_v39 }
 0x969   :  { %2199 = vmax.xlane.f32.xlu1 %v2198_v25 }
 0x96a   :  { %v1979_v7 = vpop.xlane.xlu0 %1978 }
 0x96b   :  { %vm2055_vm4 = vcmp.ge.f32.partialorder %v6040_v63, %v1979_v7  ;;  %vm2056_vm6 = vcmp.ge.f32.partialorder %v6043_v3, %v1979_v7 }
 0x96c   :  { %v6360_v35 = vsel %vm2055_vm4, -1e+30, %v6040_v63  ;;  %v6363_v61 = vsel %vm2056_vm6, -1e+30, %v6043_v3  ;;  %v1982_v53 = vpop.xlane.xlu1 %1981 }
 0x96d   :  { %7253 = vst [vmem:[#allocation69_spill] sm:$0xff] %v6363_v61  ;;  %vm2057_vm7 = vcmp.ge.f32.partialorder %v6050_v33, %v1982_v53  ;;  %vm2058_vm9 = vcmp.ge.f32.partialorder %v6053_v54, %v1982_v53  ;;  %v2201_v56 = vmax.f32 %v6360_v35, %v6363_v61 }
 0x96e   :  { %v6370_v31 = vsel %vm2057_vm7, -1e+30, %v6050_v33  ;;  %v6373_v25 = vsel %vm2058_vm9, -1e+30, %v6053_v54 }
 0x96f   :  { %7254 = vst [vmem:[#allocation70_spill] sm:$0xff] %v6373_v25  ;;  %2202 = vmax.xlane.f32.xlu0 %v2201_v56  ;;  %v2204_v63 = vmax.f32 %v6370_v31, %v6373_v25 }
 0x971   :  { %2205 = vmax.xlane.f32.xlu1 %v2204_v63 }
 0x9b4   :  { %v2149_v3 = vpop.xlane.xlu0 %2148 }
 0x9b5   :  { %vm2243_vm10 = vcmp.ge.f32.partialorder %v6060_v26, %v2149_v3  ;;  %vm2244_vm12 = vcmp.ge.f32.partialorder %v6063_v18, %v2149_v3 }
 0x9b6   :  { %v2307_v7 = vsel %vm2243_vm10, -1e+30, %v6060_v26  ;;  %v2308_v53 = vsel %vm2244_vm12, -1e+30, %v6063_v18  ;;  %v2152_v61 = vpop.xlane.xlu1 %2151 }
 0x9b7   :  { %vm2245_vm14 = vcmp.ge.f32.partialorder %v6070_v13, %v2152_v61  ;;  %vm2246_vm5 = vcmp.ge.f32.partialorder %v6073_v38, %v2152_v61  ;;  %v2371_v54 = vmax.f32 %v2307_v7, %v2308_v53 }
 0x9b8   :  { %v2309_v33 = vsel %vm2245_vm14, -1e+30, %v6070_v13  ;;  %v2310_v56 = vsel %vm2246_vm5, -1e+30, %v6073_v38  ;;  %v1985_v63 = vpop.xlane.xlu0 %1984 }
 0x9b9   :  { %vm2059_vm2 = vcmp.ge.f32.partialorder %v6080_v19, %v1985_v63  ;;  %vm2060_vm8 = vcmp.ge.f32.partialorder %v6083_v36, %v1985_v63  ;;  %2372 = vmax.xlane.f32.xlu0 %v2371_v54  ;;  %v2374_v3 = vmax.f32 %v2309_v33, %v2310_v56 }
 0x9ba   :  { %v6388_v26 = vsel %vm2059_vm2, -1e+30, %v6080_v19  ;;  %v6391_v18 = vsel %vm2060_vm8, -1e+30, %v6083_v36  ;;  %v1988_v25 = vpop.xlane.xlu1 %1987 }
 0x9bb   :  { %vm2061_vm11 = vcmp.ge.f32.partialorder %v6090_v37, %v1988_v25  ;;  %vm2062_vm13 = vcmp.ge.f32.partialorder %v6093_v51, %v1988_v25  ;;  %2375 = vmax.xlane.f32.xlu1 %v2374_v3  ;;  %v2207_v38 = vmax.f32 %v6388_v26, %v6391_v18 }
 0x9bc   :  { %v6398_v13 = vsel %vm2061_vm11, -1e+30, %v6090_v37  ;;  %v6401_v61 = vsel %vm2062_vm13, -1e+30, %v6093_v51  ;;  %v2155_v19 = vpop.xlane.xlu0 %2154 }
 0x9bd   :  { %vm2247_vm15 = vcmp.ge.f32.partialorder %v6100_v4, %v2155_v19  ;;  %vm2248_vm0 = vcmp.ge.f32.partialorder %v6103_v10, %v2155_v19  ;;  %2208 = vmax.xlane.f32.xlu0 %v2207_v38  ;;  %v2210_v36 = vmax.f32 %v6398_v13, %v6401_v61 }
 0x9be   :  { %v2311_v25 = vsel %vm2247_vm15, -1e+30, %v6100_v4  ;;  %v2312_v7 = vsel %vm2248_vm0, -1e+30, %v6103_v10  ;;  %v2158_v53 = vpop.xlane.xlu1 %2157 }
 0x9bf   :  { %vm2249_vm1 = vcmp.ge.f32.partialorder %v6110_v21, %v2158_v53  ;;  %vm2250_vm3 = vcmp.ge.f32.partialorder %v6113_v29, %v2158_v53  ;;  %2211 = vmax.xlane.f32.xlu1 %v2210_v36  ;;  %v2377_v37 = vmax.f32 %v2311_v25, %v2312_v7 }
 0x9c0   :  { %v2313_v51 = vsel %vm2249_vm1, -1e+30, %v6110_v21  ;;  %v2314_v54 = vsel %vm2250_vm3, -1e+30, %v6113_v29  ;;  %v1991_v33 = vpop.xlane.xlu0 %1990 }
 0x9c1   :  { %vm2063_vm4 = vcmp.ge.f32.partialorder %v6120_v58, %v1991_v33  ;;  %vm2064_vm6 = vcmp.ge.f32.partialorder %v6123_v48, %v1991_v33  ;;  %2378 = vmax.xlane.f32.xlu0 %v2377_v37  ;;  %v2380_v4 = vmax.f32 %v2313_v51, %v2314_v54 }
 0x9c2   :  { %v6416_v10 = vsel %vm2063_vm4, -1e+30, %v6120_v58  ;;  %v6419_v56 = vsel %vm2064_vm6, -1e+30, %v6123_v48  ;;  %v1994_v63 = vpop.xlane.xlu1 %1993 }
 0x9c3   :  { %vm2065_vm7 = vcmp.ge.f32.partialorder %v6130_v49, %v1994_v63  ;;  %vm2066_vm9 = vcmp.ge.f32.partialorder %v6133_v59, %v1994_v63  ;;  %2381 = vmax.xlane.f32.xlu1 %v2380_v4  ;;  %v2213_v21 = vmax.f32 %v6416_v10, %v6419_v56 }
 0x9c4   :  { %v6426_v29 = vsel %vm2065_vm7, -1e+30, %v6130_v49  ;;  %v6429_v3 = vsel %vm2066_vm9, -1e+30, %v6133_v59  ;;  %v2161_v58 = vpop.xlane.xlu0 %2160 }
 0x9c5   :  { %vm2251_vm10 = vcmp.ge.f32.partialorder %v6140_v60, %v2161_v58  ;;  %vm2252_vm12 = vcmp.ge.f32.partialorder %v6143_v44, %v2161_v58  ;;  %2214 = vmax.xlane.f32.xlu0 %v2213_v21  ;;  %v2216_v48 = vmax.f32 %v6426_v29, %v6429_v3 }
 0x9c6   :  { %v2315_v38 = vsel %vm2251_vm10, -1e+30, %v6140_v60  ;;  %v2316_v19 = vsel %vm2252_vm12, -1e+30, %v6143_v44  ;;  %v2164_v36 = vpop.xlane.xlu1 %2163 }
 0x9c7   :  { %vm2253_vm14 = vcmp.ge.f32.partialorder %v6150_v50, %v2164_v36  ;;  %vm2254_vm5 = vcmp.ge.f32.partialorder %v6153_v41, %v2164_v36  ;;  %2217 = vmax.xlane.f32.xlu1 %v2216_v48  ;;  %v2383_v49 = vmax.f32 %v2315_v38, %v2316_v19 }
 0x9c8   :  { %v2317_v59 = vsel %vm2253_vm14, -1e+30, %v6150_v50  ;;  %v2318_v25 = vsel %vm2254_vm5, -1e+30, %v6153_v41  ;;  %v1997_v7 = vpop.xlane.xlu0 %1996 }
 0x9c9   :  { %vm2067_vm2 = vcmp.ge.f32.partialorder %v6160_v8, %v1997_v7  ;;  %vm2068_vm8 = vcmp.ge.f32.partialorder %v6163_v2, %v1997_v7  ;;  %2384 = vmax.xlane.f32.xlu0 %v2383_v49  ;;  %v2386_v60 = vmax.f32 %v2317_v59, %v2318_v25 }
 0x9ca   :  { %v6444_v44 = vsel %vm2067_vm2, -1e+30, %v6160_v8  ;;  %v6447_v53 = vsel %vm2068_vm8, -1e+30, %v6163_v2  ;;  %v2000_v37 = vpop.xlane.xlu1 %1999 }
 0x9cb   :  { %vm2069_vm11 = vcmp.ge.f32.partialorder %v6170_v45, %v2000_v37  ;;  %vm2070_vm13 = vcmp.ge.f32.partialorder %v6173_v32, %v2000_v37  ;;  %2387 = vmax.xlane.f32.xlu1 %v2386_v60  ;;  %v2219_v50 = vmax.f32 %v6444_v44, %v6447_v53 }
 0x9cc   :  { %v6454_v41 = vsel %vm2069_vm11, -1e+30, %v6170_v45  ;;  %v6457_v51 = vsel %vm2070_vm13, -1e+30, %v6173_v32  ;;  %v2167_v8 = vpop.xlane.xlu0 %2166 }
 0x9cd   :  { %vm2255_vm15 = vcmp.ge.f32.partialorder %v6180_v52, %v2167_v8  ;;  %vm2256_vm0 = vcmp.ge.f32.partialorder %v6183_v16, %v2167_v8  ;;  %2220 = vmax.xlane.f32.xlu0 %v2219_v50  ;;  %v2222_v2 = vmax.f32 %v6454_v41, %v6457_v51 }
 0x9ce   :  { %v2319_v54 = vsel %vm2255_vm15, -1e+30, %v6180_v52  ;;  %v2320_v33 = vsel %vm2256_vm0, -1e+30, %v6183_v16  ;;  %v2170_v4 = vpop.xlane.xlu1 %2169 }
 0x9cf   :  { %v2389_v63 = vmax.f32 %v2319_v54, %v2320_v33  ;;  %vm2257_vm1 = vcmp.ge.f32.partialorder %v6190_v9, %v2170_v4  ;;  %vm2258_vm3 = vcmp.ge.f32.partialorder %v6193_v14, %v2170_v4  ;;  %2223 = vmax.xlane.f32.xlu1 %v2222_v2 }
 0x9d0   :  { %v2321_v45 = vsel %vm2257_vm1, -1e+30, %v6190_v9  ;;  %v2322_v32 = vsel %vm2258_vm3, -1e+30, %v6193_v14  ;;  %v2003_v21 = vpop.xlane.xlu0 %2002 }
 0x9d1   :  { %v2392_v58 = vmax.f32 %v2321_v45, %v2322_v32  ;;  %vm2071_vm4 = vcmp.ge.f32.partialorder %v6200_v5, %v2003_v21  ;;  %vm2072_vm6 = vcmp.ge.f32.partialorder %v6203_v24, %v2003_v21  ;;  %2390 = vmax.xlane.f32.xlu0 %v2389_v63  ;;  %v7255_v45 = vld [vmem:[#allocation74_spill] sm:$0xff]  ;;  %v7256_v32 = vld [vmem:[#allocation75_spill] sm:$0xff] }
 0x9d2   :  { %v6472_v52 = vsel %vm2071_vm4, -1e+30, %v6200_v5  ;;  %v6475_v16 = vsel %vm2072_vm6, -1e+30, %v6203_v24  ;;  %v2006_v48 = vpop.xlane.xlu1 %2005 }
 0x9d3   :  { %vm2073_vm7 = vcmp.ge.f32.partialorder %v6210_v6, %v2006_v48  ;;  %vm2074_vm9 = vcmp.ge.f32.partialorder %v6213_v40, %v2006_v48  ;;  %2393 = vmax.xlane.f32.xlu1 %v2392_v58  ;;  %v2225_v9 = vmax.f32 %v6472_v52, %v6475_v16 }
 0x9d4   :  { %v6482_v14 = vsel %vm2073_vm7, -1e+30, %v6210_v6  ;;  %v6485_v38 = vsel %vm2074_vm9, -1e+30, %v6213_v40  ;;  %v2173_v5 = vpop.xlane.xlu0 %2172 }
 0x9d5   :  { %vm2259_vm10 = vcmp.ge.f32.partialorder %v6220_v43, %v2173_v5  ;;  %vm2260_vm12 = vcmp.ge.f32.partialorder %v6223_v0, %v2173_v5  ;;  %2226 = vmax.xlane.f32.xlu0 %v2225_v9  ;;  %v2228_v24 = vmax.f32 %v6482_v14, %v6485_v38 }
 0x9d6   :  { %v2323_v19 = vsel %vm2259_vm10, -1e+30, %v6220_v43  ;;  %v2324_v36 = vsel %vm2260_vm12, -1e+30, %v6223_v0  ;;  %v2176_v49 = vpop.xlane.xlu1 %2175 }
 0x9d7   :  { %v2395_v59 = vmax.f32 %v2323_v19, %v2324_v36  ;;  %vm2261_vm14 = vcmp.ge.f32.partialorder %v6230_v20, %v2176_v49  ;;  %vm2262_vm5 = vcmp.ge.f32.partialorder %v6233_v46, %v2176_v49  ;;  %2229 = vmax.xlane.f32.xlu1 %v2228_v24  ;;  %v7258_v19 = vld [vmem:[#allocation77_spill] sm:$0xff]  ;;  %v7259_v36 = vld [vmem:[#allocation78_spill] sm:$0xff] }
 0x9d8   :  { %v2325_v6 = vsel %vm2261_vm14, -1e+30, %v6230_v20  ;;  %v2326_v40 = vsel %vm2262_vm5, -1e+30, %v6233_v46  ;;  %v2009_v25 = vpop.xlane.xlu0 %2008 }
 0x9d9   :  { %v2398_v7 = vmax.f32 %v2325_v6, %v2326_v40  ;;  %vm2075_vm2 = vcmp.ge.f32.partialorder %v6240_v47, %v2009_v25  ;;  %vm2076_vm8 = vcmp.ge.f32.partialorder %v6243_v55, %v2009_v25  ;;  %2396 = vmax.xlane.f32.xlu0 %v2395_v59 }
 0x9da   :  { %v6500_v43 = vsel %vm2075_vm2, -1e+30, %v6240_v47  ;;  %v6503_v0 = vsel %vm2076_vm8, -1e+30, %v6243_v55  ;;  %v2012_v60 = vpop.xlane.xlu1 %2011 }
 0x9db   :  { %vm2077_vm11 = vcmp.ge.f32.partialorder %v6250_v42, %v2012_v60  ;;  %vm2078_vm13 = vcmp.ge.f32.partialorder %v6253_v30, %v2012_v60  ;;  %2399 = vmax.xlane.f32.xlu1 %v2398_v7  ;;  %v2231_v20 = vmax.f32 %v6500_v43, %v6503_v0 }
 0x9dc   :  { %v6510_v46 = vsel %vm2077_vm11, -1e+30, %v6250_v42  ;;  %v6513_v37 = vsel %vm2078_vm13, -1e+30, %v6253_v30  ;;  %v2179_v47 = vpop.xlane.xlu0 %2178 }
 0x9dd   :  { %vm2263_vm15 = vcmp.ge.f32.partialorder %v6260_v27, %v2179_v47  ;;  %vm2264_vm0 = vcmp.ge.f32.partialorder %v6263_v57, %v2179_v47  ;;  %2232 = vmax.xlane.f32.xlu0 %v2231_v20  ;;  %v2234_v55 = vmax.f32 %v6510_v46, %v6513_v37  ;;  %v7261_v47 = vld [vmem:[#allocation68_spill] sm:$0xff] }
 0x9de   :  { %v2327_v50 = vsel %vm2263_vm15, -1e+30, %v6260_v27  ;;  %v2328_v8 = vsel %vm2264_vm0, -1e+30, %v6263_v57  ;;  %v2182_v2 = vpop.xlane.xlu1 %2181 }
 0x9df   :  { %v2401_v54 = vmax.f32 %v2327_v50, %v2328_v8  ;;  %vm2265_vm1 = vcmp.ge.f32.partialorder %v6270_v62, %v2182_v2  ;;  %vm2266_vm3 = vcmp.ge.f32.partialorder %v6273_v23, %v2182_v2  ;;  %2235 = vmax.xlane.f32.xlu1 %v2234_v55 }
 0x9e0   :  { %v2329_v42 = vsel %vm2265_vm1, -1e+30, %v6270_v62  ;;  %v2330_v30 = vsel %vm2266_vm3, -1e+30, %v6273_v23  ;;  %v2015_v33 = vpop.xlane.xlu0 %2014 }
 0x9e1   :  { %v2404_v4 = vmax.f32 %v2329_v42, %v2330_v30  ;;  %vm2079_vm4 = vcmp.ge.f32.partialorder %v6280_v12, %v2015_v33  ;;  %vm2080_vm6 = vcmp.ge.f32.partialorder %v6283_v28, %v2015_v33  ;;  %2402 = vmax.xlane.f32.xlu0 %v2401_v54 }
 0x9e2   :  { %v6528_v27 = vsel %vm2079_vm4, -1e+30, %v6280_v12  ;;  %v6531_v57 = vsel %vm2080_vm6, -1e+30, %v6283_v28  ;;  %v2018_v63 = vpop.xlane.xlu1 %2017  ;;  %v7257_v28 = vld [vmem:[#allocation76_spill] sm:$0xff] }
 0x9e3   :  { %vm2081_vm7 = vcmp.ge.f32.partialorder %v7255_v45, %v2018_v63  ;;  %vm2082_vm9 = vcmp.ge.f32.partialorder %v7256_v32, %v2018_v63  ;;  %2405 = vmax.xlane.f32.xlu1 %v2404_v4  ;;  %v2237_v62 = vmax.f32 %v6528_v27, %v6531_v57 }
 0x9e4   :  { %v6538_v23 = vsel %vm2081_vm7, -1e+30, %v7255_v45  ;;  %v6541_v21 = vsel %vm2082_vm9, -1e+30, %v7256_v32  ;;  %v2185_v12 = vpop.xlane.xlu0 %2184  ;;  %v7262_v45 = vld [vmem:[#allocation69_spill] sm:$0xff] }
 0x9e5   :  { %vm2267_vm10 = vcmp.ge.f32.partialorder %v6300_v15, %v2185_v12  ;;  %vm2268_vm12 = vcmp.ge.f32.partialorder %v7257_v28, %v2185_v12  ;;  %2238 = vmax.xlane.f32.xlu0 %v2237_v62  ;;  %v2240_v58 = vmax.f32 %v6538_v23, %v6541_v21  ;;  %v7263_v12 = vld [vmem:[#allocation70_spill] sm:$0xff] }
 0x9e6   :  { %v2331_v48 = vsel %vm2267_vm10, -1e+30, %v6300_v15  ;;  %v2332_v9 = vsel %vm2268_vm12, -1e+30, %v7257_v28  ;;  %v2188_v5 = vpop.xlane.xlu1 %2187  ;;  %v7260_v15 = vld [vmem:[#allocation67_spill] sm:$0xff] }
 0x9e7   :  { %v2407_v24 = vmax.f32 %v2331_v48, %v2332_v9  ;;  %vm2269_vm14 = vcmp.ge.f32.partialorder %v7258_v19, %v2188_v5  ;;  %vm2270_vm5 = vcmp.ge.f32.partialorder %v7259_v36, %v2188_v5  ;;  %2241 = vmax.xlane.f32.xlu1 %v2240_v58  ;;  %v7264_v48 = vld [vmem:[#allocation3_spill] sm:$0xff]  ;;  %v7265_v9 = vld [vmem:[#allocation4_spill] sm:$0xff] }
 0x9e8   :  { %v2333_v49 = vsel %vm2269_vm14, -1e+30, %v7258_v19  ;;  %v2334_v59 = vsel %vm2270_vm5, -1e+30, %v7259_v36 }
 0x9e9   :  { %v2410_v6 = vmax.f32 %v2333_v49, %v2334_v59  ;;  %2408 = vmax.xlane.f32.xlu0 %v2407_v24  ;;  %v7267_v49 = vld [vmem:[#allocation5_spill] sm:$0xff] }
 0x9eb   :  { %2411 = vmax.xlane.f32.xlu1 %v2410_v6 }
 0x9ec   :  { %v2191_v40 = vpop.xlane.xlu0 %2190 }
 0x9ed   :  { %vm2271_vm2 = vcmp.ge.f32.partialorder %v6320_v22, %v2191_v40  ;;  %vm2272_vm8 = vcmp.ge.f32.partialorder %v7260_v15, %v2191_v40 }
 0x9ee   :  { %v2335_v25 = vsel %vm2271_vm2, -1e+30, %v6320_v22  ;;  %v2336_v7 = vsel %vm2272_vm8, -1e+30, %v7260_v15  ;;  %v2194_v60 = vpop.xlane.xlu1 %2193 }
 0x9ef   :  { %v2413_v20 = vmax.f32 %v2335_v25, %v2336_v7  ;;  %vm2273_vm11 = vcmp.ge.f32.partialorder %v6330_v1, %v2194_v60  ;;  %vm2274_vm13 = vcmp.ge.f32.partialorder %v7261_v47, %v2194_v60  ;;  %v7269_v25 = vmov 1.0|1.0  }
 0x9f0   :  { %v2337_v55 = vsel %vm2273_vm11, -1e+30, %v6330_v1  ;;  %v2338_v50 = vsel %vm2274_vm13, -1e+30, %v7261_v47 }
 0x9f1   :  { %v2416_v8 = vmax.f32 %v2337_v55, %v2338_v50  ;;  %2414 = vmax.xlane.f32.xlu0 %v2413_v20 }
 0x9f3   :  { %2417 = vmax.xlane.f32.xlu1 %v2416_v8 }
 0x9f4   :  { %v2197_v2 = vpop.xlane.xlu0 %2196 }
 0x9f5   :  { %vm2275_vm15 = vcmp.ge.f32.partialorder %v6340_v34, %v2197_v2  ;;  %vm2276_vm0 = vcmp.ge.f32.partialorder %v6343_v11, %v2197_v2 }
 0x9f6   :  { %v2339_v22 = vsel %vm2275_vm15, -1e+30, %v6340_v34  ;;  %v2340_v54 = vsel %vm2276_vm0, -1e+30, %v6343_v11  ;;  %v2200_v42 = vpop.xlane.xlu1 %2199 }
 0x9f7   :  { %v2419_v30 = vmax.f32 %v2339_v22, %v2340_v54  ;;  %vm2277_vm1 = vcmp.ge.f32.partialorder %v6350_v17, %v2200_v42  ;;  %vm2278_vm3 = vcmp.ge.f32.partialorder %v6353_v39, %v2200_v42  ;;  %v7270_v22 = vld [vmem:[#allocation8_spill] sm:$0xff]  ;;  %v7271_v54 = vld [vmem:[#allocation10_spill] sm:$0xff] }
 0x9f8   :  { %v2341_v1 = vsel %vm2277_vm1, -1e+30, %v6350_v17  ;;  %v2342_v33 = vsel %vm2278_vm3, -1e+30, %v6353_v39 }
 0x9f9   :  { %v2422_v4 = vmax.f32 %v2341_v1, %v2342_v33  ;;  %2420 = vmax.xlane.f32.xlu0 %v2419_v30  ;;  %v7272_v1 = vld [vmem:[#allocation7_spill] sm:$0xff] }
 0x9fb   :  { %2423 = vmax.xlane.f32.xlu1 %v2422_v4 }
 0x9fc   :  { %v2203_v63 = vpop.xlane.xlu0 %2202 }
 0x9fd   :  { %vm2279_vm4 = vcmp.ge.f32.partialorder %v6360_v35, %v2203_v63  ;;  %vm2280_vm6 = vcmp.ge.f32.partialorder %v7262_v45, %v2203_v63 }
 0x9fe   :  { %v2343_v11 = vsel %vm2279_vm4, -1e+30, %v6360_v35  ;;  %v2344_v34 = vsel %vm2280_vm6, -1e+30, %v7262_v45  ;;  %v2206_v32 = vpop.xlane.xlu1 %2205  ;;  %v7266_v35 = vmov 0.0  }
 0x9ff   :  { %v2425_v62 = vmax.f32 %v2343_v11, %v2344_v34  ;;  %vm2281_vm7 = vcmp.ge.f32.partialorder %v6370_v31, %v2206_v32  ;;  %vm2282_vm9 = vcmp.ge.f32.partialorder %v7263_v12, %v2206_v32 }
 0xa00   :  { %v2345_v39 = vsel %vm2281_vm7, -1e+30, %v6370_v31  ;;  %v2346_v17 = vsel %vm2282_vm9, -1e+30, %v7263_v12  ;;  %v7268_v31 = vld [vmem:[#allocation6_spill] sm:$0xff] }
 0xa01   :  { %v2428_v28 = vmax.f32 %v2345_v39, %v2346_v17  ;;  %2426 = vmax.xlane.f32.xlu0 %v2425_v62 }
 0xa03   :  { %2429 = vmax.xlane.f32.xlu1 %v2428_v28  ;;  %v7274_v28 = vld [vmem:[#allocation12_spill] sm:$0xff] }
 0xa46   :  { %v2373_v58 = vpop.xlane.xlu0 %2372 }
 0xa47   :  { %vm2467_vm10 = vcmp.ge.f32.partialorder %v7264_v48, %v2373_v58  ;;  %vm2468_vm12 = vcmp.ge.f32.partialorder %v7265_v9, %v2373_v58  ;;  %v7275_v58 = vld [vmem:[#allocation14_spill] sm:$0xff] }
 0xa48   :  { %v3559_v5 = vsel %vm2467_vm10, 1.0, %v7266_v35  ;;  %v3560_v24 = vsel %vm2468_vm12, 1.0, %v7266_v35  ;;  %v2376_v19 = vpop.xlane.xlu1 %2375 }
 0xa49   :  { %v6581_v36 = vadd.f32 %v3560_v24, %v3559_v5  ;;  %vm2469_vm14 = vcmp.ge.f32.partialorder %v7267_v49, %v2376_v19  ;;  %vm2470_vm5 = vcmp.ge.f32.partialorder %v7268_v31, %v2376_v19  ;;  %v7276_v5 = vld [vmem:[#allocation11_spill] sm:$0xff] }
 0xa4a   :  { %v3561_v59 = vsel %vm2469_vm14, 1.0, %v7266_v35  ;;  %v3562_v6 = vsel %vm2470_vm5, 1.0, %v7266_v35  ;;  %vm3623_vm2 = vmpackc.low %vm2470_vm5, %vm2468_vm12  ;;  %v2209_v40 = vpop.xlane.xlu0 %2208 }
 0xa4b   :  { %v6587_v15 = vadd.f32 %v3562_v6, %v3561_v59  ;;  %vm3625_vm8 = vmpackc.low %vm2469_vm14, %vm2467_vm10  ;;  %vm2283_vm11 = vcmp.ge.f32.partialorder %v6388_v26, %v2209_v40  ;;  %vm2284_vm13 = vcmp.ge.f32.partialorder %v6391_v18, %v2209_v40  ;;  %3624 = vmatprep.mubr.msk.bf16.mxu1 %vm3623_vm2, %v7269_v25 }
 0xa4c   :  { %v2347_v7 = vsel %vm2283_vm11, -1e+30, %v6388_v26  ;;  %v2348_v60 = vsel %vm2284_vm13, -1e+30, %v6391_v18  ;;  %3626 = vmatmul.mubr.msk.bf16.vlgmr.msra.gmra.mrb[64].mxu1 %vm3625_vm8, %v7269_v25  ;;  %v2212_v20 = vpop.xlane.xlu1 %2211 }
 0xa4d   :  { %v2431_v47 = vmax.f32 %v2347_v7, %v2348_v60  ;;  %vm2285_vm15 = vcmp.ge.f32.partialorder %v6398_v13, %v2212_v20  ;;  %vm2286_vm0 = vcmp.ge.f32.partialorder %v6401_v61, %v2212_v20 }
 0xa4e   :  { %v2349_v55 = vsel %vm2285_vm15, -1e+30, %v6398_v13  ;;  %v2350_v50 = vsel %vm2286_vm0, -1e+30, %v6401_v61  ;;  %v2379_v8 = vpop.xlane.xlu0 %2378  ;;  %v7273_v13 = vld [vmem:[#allocation9_spill] sm:$0xff] }
 0xa4f   :  { %v2434_v2 = vmax.f32 %v2349_v55, %v2350_v50  ;;  %vm2471_vm1 = vcmp.ge.f32.partialorder %v7270_v22, %v2379_v8  ;;  %vm2472_vm3 = vcmp.ge.f32.partialorder %v7271_v54, %v2379_v8  ;;  %2432 = vmax.xlane.f32.xlu0 %v2431_v47  ;;  %v7278_v55 = vld [vmem:[#allocation13_spill] sm:$0xff]  ;;  %v7279_v50 = vld [vmem:[#allocation15_spill] sm:$0xff] }
 0xa50   :  { %v3563_v26 = vsel %vm2471_vm1, 1.0, %v7266_v35  ;;  %v3564_v18 = vsel %vm2472_vm3, 1.0, %v7266_v35  ;;  %v2382_v42 = vpop.xlane.xlu1 %2381  ;;  %v7280_v22 = vld [vmem:[#allocation17_spill] sm:$0xff] }
 0xa51   :  { %v6605_v30 = vadd.f32 %v3564_v18, %v3563_v26  ;;  %vm2473_vm4 = vcmp.ge.f32.partialorder %v7272_v1, %v2382_v42  ;;  %vm2474_vm6 = vcmp.ge.f32.partialorder %v7273_v13, %v2382_v42  ;;  %2435 = vmax.xlane.f32.xlu1 %v2434_v2 }
 0xa52   :  { %v3565_v61 = vsel %vm2473_vm4, 1.0, %v7266_v35  ;;  %v3566_v33 = vsel %vm2474_vm6, 1.0, %v7266_v35  ;;  %vm3627_vm7 = vmpackc.low %vm2474_vm6, %vm2472_vm3  ;;  %v2215_v4 = vpop.xlane.xlu0 %2214 }
 0xa53   :  { %v6611_v63 = vadd.f32 %v3566_v33, %v3565_v61  ;;  %vm3629_vm9 = vmpackc.low %vm2473_vm4, %vm2471_vm1  ;;  %vm2287_vm10 = vcmp.ge.f32.partialorder %v6416_v10, %v2215_v4  ;;  %vm2288_vm12 = vcmp.ge.f32.partialorder %v6419_v56, %v2215_v4  ;;  %3628 = vmatprep.mubr.msk.bf16.mxu1 %vm3627_vm7, %v7269_v25 }
 0xa54   :  { %v2351_v45 = vsel %vm2287_vm10, -1e+30, %v6416_v10  ;;  %v2352_v11 = vsel %vm2288_vm12, -1e+30, %v6419_v56  ;;  %3630 = vmatmul.mubr.msk.bf16.gmra.mrb[68].mxu1 %vm3629_vm9, %v7269_v25  ;;  %v2218_v34 = vpop.xlane.xlu1 %2217 }
 0xa55   :  { %v2437_v32 = vmax.f32 %v2351_v45, %v2352_v11  ;;  %vm2289_vm14 = vcmp.ge.f32.partialorder %v6426_v29, %v2218_v34  ;;  %vm2290_vm5 = vcmp.ge.f32.partialorder %v6429_v3, %v2218_v34  ;;  %v7282_v34 = vld [vmem:[#allocation19_spill] sm:$0xff] }
 0xa56   :  { %v2353_v62 = vsel %vm2289_vm14, -1e+30, %v6426_v29  ;;  %v2354_v12 = vsel %vm2290_vm5, -1e+30, %v6429_v3  ;;  %v2385_v39 = vpop.xlane.xlu0 %2384  ;;  %v7277_v29 = vld [vmem:[#allocation16_spill] sm:$0xff] }
 0xa57   :  { %v2440_v17 = vmax.f32 %v2353_v62, %v2354_v12  ;;  %vm2475_vm2 = vcmp.ge.f32.partialorder %v7274_v28, %v2385_v39  ;;  %vm2476_vm8 = vcmp.ge.f32.partialorder %v7275_v58, %v2385_v39  ;;  %2438 = vmax.xlane.f32.xlu0 %v2437_v32  ;;  %v7283_v32 = vld [vmem:[#allocation20_spill] sm:$0xff]  ;;  %v7284_v39 = vld [vmem:[#allocation21_spill] sm:$0xff] }
 0xa58   :  { %v3567_v10 = vsel %vm2475_vm2, 1.0, %v7266_v35  ;;  %v3568_v56 = vsel %vm2476_vm8, 1.0, %v7266_v35  ;;  %v2388_v48 = vpop.xlane.xlu1 %2387 }
 0xa59   :  { %v6631_v9 = vadd.f32 %v3568_v56, %v3567_v10  ;;  %vm2477_vm11 = vcmp.ge.f32.partialorder %v7276_v5, %v2388_v48  ;;  %vm2478_vm13 = vcmp.ge.f32.partialorder %v7277_v29, %v2388_v48  ;;  %2441 = vmax.xlane.f32.xlu1 %v2440_v17 }
 0xa5a   :  { %v3569_v3 = vsel %vm2477_vm11, 1.0, %v7266_v35  ;;  %v3570_v24 = vsel %vm2478_vm13, 1.0, %v7266_v35  ;;  %vm3631_vm15 = vmpackc.low %vm2478_vm13, %vm2476_vm8  ;;  %v2221_v19 = vpop.xlane.xlu0 %2220 }
 0xa5b   :  { %v6637_v49 = vadd.f32 %v3570_v24, %v3569_v3  ;;  %vm3633_vm0 = vmpackc.low %vm2477_vm11, %vm2475_vm2  ;;  %vm2291_vm1 = vcmp.ge.f32.partialorder %v6444_v44, %v2221_v19  ;;  %vm2292_vm3 = vcmp.ge.f32.partialorder %v6447_v53, %v2221_v19  ;;  %3632 = vmatprep.mubr.msk.bf16.mxu1 %vm3631_vm15, %v7269_v25 }
 0xa5c   :  { %v2355_v31 = vsel %vm2291_vm1, -1e+30, %v6444_v44  ;;  %v2356_v59 = vsel %vm2292_vm3, -1e+30, %v6447_v53  ;;  %3634 = vmatmul.mubr.msk.bf16.gmra.mrb[72].mxu1 %vm3633_vm0, %v7269_v25  ;;  %v2224_v6 = vpop.xlane.xlu1 %2223 }
 0xa5d   :  { %v2443_v40 = vmax.f32 %v2355_v31, %v2356_v59  ;;  %vm2293_vm4 = vcmp.ge.f32.partialorder %v6454_v41, %v2224_v6  ;;  %vm2294_vm6 = vcmp.ge.f32.partialorder %v6457_v51, %v2224_v6  ;;  %v7286_v31 = vld [vmem:[#allocation23_spill] sm:$0xff]  ;;  %v7287_v59 = vld [vmem:[#allocation24_spill] sm:$0xff] }
 0xa5e   :  { %v2357_v7 = vsel %vm2293_vm4, -1e+30, %v6454_v41  ;;  %v2358_v60 = vsel %vm2294_vm6, -1e+30, %v6457_v51  ;;  %v2391_v20 = vpop.xlane.xlu0 %2390  ;;  %v7281_v41 = vld [vmem:[#allocation18_spill] sm:$0xff] }
 0xa5f   :  { %v2446_v47 = vmax.f32 %v2357_v7, %v2358_v60  ;;  %vm2479_vm7 = vcmp.ge.f32.partialorder %v7278_v55, %v2391_v20  ;;  %vm2480_vm9 = vcmp.ge.f32.partialorder %v7279_v50, %v2391_v20  ;;  %2444 = vmax.xlane.f32.xlu0 %v2443_v40  ;;  %v7288_v7 = vld [vmem:[#allocation25_spill] sm:$0xff] }
 0xa60   :  { %v3571_v44 = vsel %vm2479_vm7, 1.0, %v7266_v35  ;;  %v3572_v53 = vsel %vm2480_vm9, 1.0, %v7266_v35  ;;  %v2394_v8 = vpop.xlane.xlu1 %2393 }
 0xa61   :  { %v6657_v2 = vadd.f32 %v3572_v53, %v3571_v44  ;;  %vm2481_vm10 = vcmp.ge.f32.partialorder %v7280_v22, %v2394_v8  ;;  %vm2482_vm12 = vcmp.ge.f32.partialorder %v7281_v41, %v2394_v8  ;;  %2447 = vmax.xlane.f32.xlu1 %v2446_v47 }
 0xa62   :  { %v3573_v51 = vsel %vm2481_vm10, 1.0, %v7266_v35  ;;  %v3574_v54 = vsel %vm2482_vm12, 1.0, %v7266_v35  ;;  %vm3635_vm14 = vmpackc.low %vm2482_vm12, %vm2480_vm9  ;;  %v2227_v26 = vpop.xlane.xlu0 %2226 }
 0xa63   :  { %v6663_v18 = vadd.f32 %v3574_v54, %v3573_v51  ;;  %vm3637_vm5 = vmpackc.low %vm2481_vm10, %vm2479_vm7  ;;  %vm2295_vm2 = vcmp.ge.f32.partialorder %v6472_v52, %v2227_v26  ;;  %vm2296_vm8 = vcmp.ge.f32.partialorder %v6475_v16, %v2227_v26  ;;  %3636 = vmatprep.mubr.msk.bf16.mxu1 %vm3635_vm14, %v7269_v25  ;;  %v7290_v54 = vld [vmem:[#allocation27_spill] sm:$0xff]  ;;  %v7291_v26 = vld [vmem:[#allocation28_spill] sm:$0xff] }
 0xa64   :  { %v2359_v42 = vsel %vm2295_vm2, -1e+30, %v6472_v52  ;;  %v2360_v1 = vsel %vm2296_vm8, -1e+30, %v6475_v16  ;;  %3638 = vmatmul.mubr.msk.bf16.gmra.mrb[76].mxu1 %vm3637_vm5, %v7269_v25  ;;  %v2230_v13 = vpop.xlane.xlu1 %2229 }
 0xa65   :  { %v2449_v61 = vmax.f32 %v2359_v42, %v2360_v1  ;;  %vm2297_vm11 = vcmp.ge.f32.partialorder %v6482_v14, %v2230_v13  ;;  %vm2298_vm13 = vcmp.ge.f32.partialorder %v6485_v38, %v2230_v13  ;;  %v7292_v13 = vld [vmem:[#allocation29_spill] sm:$0xff] }
 0xa66   :  { %v2361_v33 = vsel %vm2297_vm11, -1e+30, %v6482_v14  ;;  %v2362_v4 = vsel %vm2298_vm13, -1e+30, %v6485_v38  ;;  %v2397_v45 = vpop.xlane.xlu0 %2396  ;;  %v7285_v14 = vld [vmem:[#allocation22_spill] sm:$0xff] }
 0xa67   :  { %v2452_v11 = vmax.f32 %v2361_v33, %v2362_v4  ;;  %vm2483_vm15 = vcmp.ge.f32.partialorder %v7282_v34, %v2397_v45  ;;  %vm2484_vm0 = vcmp.ge.f32.partialorder %v7283_v32, %v2397_v45  ;;  %2450 = vmax.xlane.f32.xlu0 %v2449_v61  ;;  %v7293_v61 = vld [vmem:[#allocation30_spill] sm:$0xff]  ;;  %v7294_v45 = vld [vmem:[#allocation31_spill] sm:$0xff] }
 0xa68   :  { %v3575_v52 = vsel %vm2483_vm15, 1.0, %v7266_v35  ;;  %v3576_v16 = vsel %vm2484_vm0, 1.0, %v7266_v35  ;;  %v2400_v62 = vpop.xlane.xlu1 %2399 }
 0xa69   :  { %v6683_v12 = vadd.f32 %v3576_v16, %v3575_v52  ;;  %vm2485_vm1 = vcmp.ge.f32.partialorder %v7284_v39, %v2400_v62  ;;  %vm2486_vm3 = vcmp.ge.f32.partialorder %v7285_v14, %v2400_v62  ;;  %2453 = vmax.xlane.f32.xlu1 %v2452_v11  ;;  %v7295_v11 = vld [vmem:[#allocation32_spill] sm:$0xff]  ;;  %v7297_v62 = vld [vmem:[#allocation34_spill] sm:$0xff] }
 0xa6a   :  { %v3577_v38 = vsel %vm2485_vm1, 1.0, %v7266_v35  ;;  %v3578_v17 = vsel %vm2486_vm3, 1.0, %v7266_v35  ;;  %vm3639_vm4 = vmpackc.low %vm2486_vm3, %vm2484_vm0  ;;  %v2233_v28 = vpop.xlane.xlu0 %2232 }
 0xa6b   :  { %v6689_v58 = vadd.f32 %v3578_v17, %v3577_v38  ;;  %vm3641_vm6 = vmpackc.low %vm2485_vm1, %vm2483_vm15  ;;  %vm2299_vm7 = vcmp.ge.f32.partialorder %v6500_v43, %v2233_v28  ;;  %vm2300_vm9 = vcmp.ge.f32.partialorder %v6503_v0, %v2233_v28  ;;  %3640 = vmatprep.mubr.msk.bf16.mxu1 %vm3639_vm4, %v7269_v25  ;;  %v7298_v38 = vld [vmem:[#allocation35_spill] sm:$0xff]  ;;  %v7299_v17 = vld [vmem:[#allocation36_spill] sm:$0xff] }
 0xa6c   :  { %v2363_v10 = vsel %vm2299_vm7, -1e+30, %v6500_v43  ;;  %v2364_v56 = vsel %vm2300_vm9, -1e+30, %v6503_v0  ;;  %3642 = vmatmul.mubr.msk.bf16.gmra.mrb[80].mxu1 %vm3641_vm6, %v7269_v25  ;;  %v2236_v48 = vpop.xlane.xlu1 %2235 }
 0xa6d   :  { %v2455_v5 = vmax.f32 %v2363_v10, %v2364_v56  ;;  %vm2301_vm10 = vcmp.ge.f32.partialorder %v6510_v46, %v2236_v48  ;;  %vm2302_vm12 = vcmp.ge.f32.partialorder %v6513_v37, %v2236_v48  ;;  %v7301_v48 = vld [vmem:[#allocation38_spill] sm:$0xff] }
 0xa6e   :  { %v2365_v29 = vsel %vm2301_vm10, -1e+30, %v6510_v46  ;;  %v2366_v3 = vsel %vm2302_vm12, -1e+30, %v6513_v37  ;;  %v2403_v24 = vpop.xlane.xlu0 %2402  ;;  %v7289_v46 = vld [vmem:[#allocation26_spill] sm:$0xff] }
 0xa6f   :  { %v2458_v19 = vmax.f32 %v2365_v29, %v2366_v3  ;;  %vm2487_vm14 = vcmp.ge.f32.partialorder %v7286_v31, %v2403_v24  ;;  %vm2488_vm5 = vcmp.ge.f32.partialorder %v7287_v59, %v2403_v24  ;;  %2456 = vmax.xlane.f32.xlu0 %v2455_v5  ;;  %v7302_v3 = vld [vmem:[#allocation39_spill] sm:$0xff]  ;;  %v7303_v24 = vld [vmem:[#allocation40_spill] sm:$0xff] }
 0xa70   :  { %v3579_v43 = vsel %vm2487_vm14, 1.0, %v7266_v35  ;;  %v3580_v0 = vsel %vm2488_vm5, 1.0, %v7266_v35  ;;  %v2406_v6 = vpop.xlane.xlu1 %2405 }
 0xa71   :  { %v6709_v40 = vadd.f32 %v3580_v0, %v3579_v43  ;;  %vm2489_vm2 = vcmp.ge.f32.partialorder %v7288_v7, %v2406_v6  ;;  %vm2490_vm8 = vcmp.ge.f32.partialorder %v7289_v46, %v2406_v6  ;;  %2459 = vmax.xlane.f32.xlu1 %v2458_v19  ;;  %v7304_v0 = vld [vmem:[#allocation41_spill] sm:$0xff]  ;;  %v7305_v6 = vld [vmem:[#allocation42_spill] sm:$0xff] }
 0xa72   :  { %v3581_v37 = vsel %vm2489_vm2, 1.0, %v7266_v35  ;;  %v3582_v60 = vsel %vm2490_vm8, 1.0, %v7266_v35  ;;  %vm3643_vm11 = vmpackc.low %vm2490_vm8, %vm2488_vm5  ;;  %v2239_v20 = vpop.xlane.xlu0 %2238 }
 0xa73   :  { %v6715_v47 = vadd.f32 %v3582_v60, %v3581_v37  ;;  %vm3645_vm13 = vmpackc.low %vm2489_vm2, %vm2487_vm14  ;;  %vm2303_vm15 = vcmp.ge.f32.partialorder %v6528_v27, %v2239_v20  ;;  %vm2304_vm0 = vcmp.ge.f32.partialorder %v6531_v57, %v2239_v20  ;;  %3644 = vmatprep.mubr.msk.bf16.mxu1 %vm3643_vm11, %v7269_v25  ;;  %v38_v37 = vld [vmem:[%s6969_s3 + $0x10] sm:$0xff]  ;;  %v39_v60 = vld [vmem:[%s6969_s3 + $0x18] sm:$0xff] }
 0xa74   :  { %v2367_v55 = vsel %vm2303_vm15, -1e+30, %v6528_v27  ;;  %v2368_v50 = vsel %vm2304_vm0, -1e+30, %v6531_v57  ;;  %3646 = vmatmul.mubr.msk.bf16.gmra.mrb[84].mxu1 %vm3645_vm13, %v7269_v25  ;;  %v2242_v44 = vpop.xlane.xlu1 %2241  ;;  %v3029_v20 = vpack.c.bf16 %v39_v60, %v38_v37 }
 0xa75   :  { %v2461_v53 = vmax.f32 %v2367_v55, %v2368_v50  ;;  %vm2305_vm1 = vcmp.ge.f32.partialorder %v6538_v23, %v2242_v44  ;;  %vm2306_vm3 = vcmp.ge.f32.partialorder %v6541_v21, %v2242_v44  ;;  %v41_v55 = vld [vmem:[%s6969_s3 + $0x28] sm:$0xff]  ;;  %v42_v44 = vld [vmem:[%s6969_s3 + $0x30] sm:$0xff] }
 0xa76   :  { %v2369_v8 = vsel %vm2305_vm1, -1e+30, %v6538_v23  ;;  %v2370_v22 = vsel %vm2306_vm3, -1e+30, %v6541_v21  ;;  %v2409_v41 = vpop.xlane.xlu0 %2408 }
 0xa77   :  { %v2464_v51 = vmax.f32 %v2369_v8, %v2370_v22  ;;  %vm2491_vm4 = vcmp.ge.f32.partialorder %v7290_v54, %v2409_v41  ;;  %vm2492_vm6 = vcmp.ge.f32.partialorder %v7291_v26, %v2409_v41  ;;  %2462 = vmax.xlane.f32.xlu0 %v2461_v53  ;;  %v43_v53 = vld [vmem:[%s6969_s3 + $0x38] sm:$0xff]  ;;  %v44_v22 = vld [vmem:[%s6969_s3 + $0x40] sm:$0xff]  ;;  %v45_v41 = vld [vmem:[%s6969_s3 + $0x48] sm:$0xff] }
 0xa78   :  { %v3583_v27 = vsel %vm2491_vm4, 1.0, %v7266_v35  ;;  %v3584_v57 = vsel %vm2492_vm6, 1.0, %v7266_v35  ;;  %v2412_v42 = vpop.xlane.xlu1 %2411  ;;  %v3031_v8 = vpack.c.bf16 %v43_v53, %v42_v44  ;;  %v46_v54 = vld [vmem:[%s6969_s3 + $0x50] sm:$0xff]  ;;  %v47_v26 = vld [vmem:[%s6969_s3 + $0x58] sm:$0xff] }
 0xa79   :  { %v6733_v1 = vadd.f32 %v3584_v57, %v3583_v27  ;;  %vm2493_vm7 = vcmp.ge.f32.partialorder %v7292_v13, %v2412_v42  ;;  %vm2494_vm9 = vcmp.ge.f32.partialorder %v7293_v61, %v2412_v42  ;;  %2465 = vmax.xlane.f32.xlu1 %v2464_v51  ;;  %v3032_v51 = vpack.c.bf16 %v45_v41, %v44_v22  ;;  %v48_v57 = vld [vmem:[%s6969_s3 + $0x60] sm:$0xff]  ;;  %v49_v42 = vld [vmem:[%s6969_s3 + $0x68] sm:$0xff]  ;;  %v50_v13 = vld [vmem:[%s6969_s3 + $0x70] sm:$0xff] }
 0xa7a   :  { %v3585_v23 = vsel %vm2493_vm7, 1.0, %v7266_v35  ;;  %v3586_v21 = vsel %vm2494_vm9, 1.0, %v7266_v35  ;;  %vm3647_vm10 = vmpackc.low %vm2494_vm9, %vm2492_vm6  ;;  %v3033_v27 = vpack.c.bf16 %v47_v26, %v46_v54  ;;  %v51_v61 = vld [vmem:[%s6969_s3 + $0x78] sm:$0xff]  ;;  %v7323_v22 = vld [vmem:[#allocation60_spill] sm:$0xff] }
 0xa7b   :  { %v6739_v33 = vadd.f32 %v3586_v21, %v3585_v23  ;;  %vm3649_vm12 = vmpackc.low %vm2493_vm7, %vm2491_vm4  ;;  %2660 = vadd.xlane.f32.xlu0 %v6581_v36  ;;  %3648 = vmatprep.mubr.msk.bf16.mxu1 %vm3647_vm10, %v7269_v25  ;;  %v7296_v36 = vld [vmem:[#allocation33_spill] sm:$0xff]  ;;  %v3035_v23 = vpack.c.bf16 %v51_v61, %v50_v13 }
 0xa7c   :  { %3650 = vmatmul.mubr.msk.bf16.gmra.mrb[88].mxu1 %vm3649_vm12, %v7269_v25 }
 0xa7d   :  { %2663 = vadd.xlane.f32.xlu1 %v6587_v15 }
 0xa7e   :  { %v2415_v4 = vpop.xlane.xlu0 %2414 }
 0xa7f   :  { %vm2495_vm14 = vcmp.ge.f32.partialorder %v7294_v45, %v2415_v4  ;;  %vm2496_vm5 = vcmp.ge.f32.partialorder %v7295_v11, %v2415_v4  ;;  %2666 = vadd.xlane.f32.xlu0 %v6605_v30  ;;  %v7307_v4 = vld [vmem:[#allocation44_spill] sm:$0xff] }
 0xa80   :  { %v3587_v34 = vsel %vm2495_vm14, 1.0, %v7266_v35  ;;  %v3588_v32 = vsel %vm2496_vm5, 1.0, %v7266_v35  ;;  %v2418_v52 = vpop.xlane.xlu1 %2417 }
 0xa81   :  { %v2701_v16 = vadd.f32 %v3588_v32, %v3587_v34  ;;  %vm2497_vm2 = vcmp.ge.f32.partialorder %v7296_v36, %v2418_v52  ;;  %vm2498_vm8 = vcmp.ge.f32.partialorder %v7297_v62, %v2418_v52  ;;  %2669 = vadd.xlane.f32.xlu1 %v6611_v63  ;;  %v7308_v52 = vld [vmem:[#allocation45_spill] sm:$0xff] }
 0xa82   :  { %v3589_v15 = vsel %vm2497_vm2, 1.0, %v7266_v35  ;;  %v3590_v39 = vsel %vm2498_vm8, 1.0, %v7266_v35  ;;  %vm3651_vm11 = vmpackc.low %vm2498_vm8, %vm2496_vm5 }
 0xa83   :  { %v2704_v14 = vadd.f32 %v3590_v39, %v3589_v15  ;;  %vm3653_vm13 = vmpackc.low %vm2497_vm2, %vm2495_vm14  ;;  %2672 = vadd.xlane.f32.xlu0 %v6631_v9  ;;  %3652 = vmatprep.mubr.msk.bf16.mxu1 %vm3651_vm11, %v7269_v25  ;;  %v7300_v9 = vld [vmem:[#allocation37_spill] sm:$0xff] }
 0xa84   :  { %3654 = vmatmul.mubr.msk.bf16.gmra.mrb[92].mxu1 %vm3653_vm13, %v7269_v25 }
 0xa85   :  { %2675 = vadd.xlane.f32.xlu1 %v6637_v49 }
 0xa86   :  { %v2421_v30 = vpop.xlane.xlu0 %2420 }
 0xa87   :  { %vm2499_vm15 = vcmp.ge.f32.partialorder %v7298_v38, %v2421_v30  ;;  %vm2500_vm0 = vcmp.ge.f32.partialorder %v7299_v17, %v2421_v30  ;;  %2678 = vadd.xlane.f32.xlu0 %v6657_v2  ;;  %v7311_v30 = vld [vmem:[#allocation48_spill] sm:$0xff] }
 0xa88   :  { %v3591_v63 = vsel %vm2499_vm15, 1.0, %v7266_v35  ;;  %v3592_v28 = vsel %vm2500_vm0, 1.0, %v7266_v35  ;;  %v2424_v10 = vpop.xlane.xlu1 %2423 }
 0xa89   :  { %v2707_v56 = vadd.f32 %v3592_v28, %v3591_v63  ;;  %vm2501_vm1 = vcmp.ge.f32.partialorder %v7300_v9, %v2424_v10  ;;  %vm2502_vm3 = vcmp.ge.f32.partialorder %v7301_v48, %v2424_v10  ;;  %2681 = vadd.xlane.f32.xlu1 %v6663_v18  ;;  %v36_v18 = vld [vmem:[%s6969_s3] sm:$0xff]  ;;  %v7312_v10 = vld [vmem:[#allocation49_spill] sm:$0xff] }
 0xa8a   :  { %v3593_v49 = vsel %vm2501_vm1, 1.0, %v7266_v35  ;;  %v3594_v5 = vsel %vm2502_vm3, 1.0, %v7266_v35  ;;  %vm3655_vm4 = vmpackc.low %vm2502_vm3, %vm2500_vm0 }
 0xa8b   :  { %v2710_v29 = vadd.f32 %v3594_v5, %v3593_v49  ;;  %vm3657_vm6 = vmpackc.low %vm2501_vm1, %vm2499_vm15  ;;  %2684 = vadd.xlane.f32.xlu0 %v6683_v12  ;;  %3656 = vmatprep.mubr.msk.bf16.mxu1 %vm3655_vm4, %v7269_v25  ;;  %v37_v12 = vld [vmem:[%s6969_s3 + $0x8] sm:$0xff] }
 0xa8c   :  { %3658 = vmatmul.mubr.msk.bf16.gmra.mrb[96].mxu1 %vm3657_vm6, %v7269_v25  ;;  %v3028_v59 = vpack.c.bf16 %v37_v12, %v36_v18 }
 0xa8d   :  { %2687 = vadd.xlane.f32.xlu1 %v6689_v58 }
 0xa8e   :  { %v2427_v2 = vpop.xlane.xlu0 %2426  ;;  %4191 = vmatprep.subr.bf16.mxu1 %v3028_v59 }
 0xa8f   :  { %vm2503_vm7 = vcmp.ge.f32.partialorder %v7302_v3, %v2427_v2  ;;  %vm2504_vm9 = vcmp.ge.f32.partialorder %v7303_v24, %v2427_v2  ;;  %2690 = vadd.xlane.f32.xlu0 %v6709_v40  ;;  %4192 = vmatpush3.bf16.msra.mxu1 %v3028_v59  ;;  %v7315_v2 = vld [vmem:[#allocation52_spill] sm:$0xff] }
 0xa90   :  { %v3595_v19 = vsel %vm2503_vm7, 1.0, %v7266_v35  ;;  %v3596_v58 = vsel %vm2504_vm9, 1.0, %v7266_v35  ;;  %v2430_v31 = vpop.xlane.xlu1 %2429  ;;  %4193 = vmatprep.subr.bf16.mxu1 %v3029_v20 }
 0xa91   :  { %v2713_v43 = vadd.f32 %v3596_v58, %v3595_v19  ;;  %vm2505_vm10 = vcmp.ge.f32.partialorder %v7304_v0, %v2430_v31  ;;  %vm2506_vm12 = vcmp.ge.f32.partialorder %v7305_v6, %v2430_v31  ;;  %2693 = vadd.xlane.f32.xlu1 %v6715_v47  ;;  %v40_v47 = vld [vmem:[%s6969_s3 + $0x20] sm:$0xff]  ;;  %v7316_v19 = vld [vmem:[#allocation53_spill] sm:$0xff]  ;;  %v7317_v58 = vld [vmem:[#allocation54_spill] sm:$0xff] }
 0xa92   :  { %v3597_v40 = vsel %vm2505_vm10, 1.0, %v7266_v35  ;;  %v3598_v7 = vsel %vm2506_vm12, 1.0, %v7266_v35  ;;  %vm3659_vm14 = vmpackc.low %vm2506_vm12, %vm2504_vm9  ;;  %v3030_v50 = vpack.c.bf16 %v41_v55, %v40_v47  ;;  %v7318_v6 = vld [vmem:[#allocation55_spill] sm:$0xff]  ;;  %v7321_v47 = vld [vmem:[#allocation58_spill] sm:$0xff] }
 0xa93   :  { %v2716_v46 = vadd.f32 %v3598_v7, %v3597_v40  ;;  %vm3661_vm5 = vmpackc.low %vm2505_vm10, %vm2503_vm7  ;;  %2696 = vadd.xlane.f32.xlu0 %v6733_v1  ;;  %3660 = vmatprep.mubr.msk.bf16.mxu1 %vm3659_vm14, %v7269_v25  ;;  %v3034_v1 = vpack.c.bf16 %v49_v42, %v48_v57  ;;  %v7319_v40 = vld [vmem:[#allocation56_spill] sm:$0xff]  ;;  %v7325_v57 = vld [vmem:[#allocation62_spill] sm:$0xff] }
 0xa94   :  { %3662 = vmatmul.mubr.msk.bf16.gmra.mrb[100].mxu1 %vm3661_vm5, %v7269_v25 }
 0xa95   :  { %2699 = vadd.xlane.f32.xlu1 %v6739_v33  ;;  %4194 = vmatpush3.bf16.msra.mxu1 %v3029_v20  ;;  %v7306_v33 = vld [vmem:[#allocation43_spill] sm:$0xff]  ;;  %v7320_v20 = vld [vmem:[#allocation57_spill] sm:$0xff] }
 0xa96   :  { %4195 = vmatprep.subr.bf16.mxu1 %v3030_v50 }
 0xa97   :  { %2702 = vadd.xlane.f32.xlu0 %v2701_v16  ;;  %v7309_v16 = vld [vmem:[#allocation46_spill] sm:$0xff] }
 0xa99   :  { %2705 = vadd.xlane.f32.xlu1 %v2704_v14  ;;  %4196 = vmatpush3.bf16.msra.mxu1 %v3030_v50  ;;  %v7310_v14 = vld [vmem:[#allocation47_spill] sm:$0xff] }
 0xa9a   :  { %4197 = vmatprep.subr.bf16.mxu1 %v3031_v8 }
 0xa9b   :  { %2708 = vadd.xlane.f32.xlu0 %v2707_v56  ;;  %v7313_v56 = vld [vmem:[#allocation50_spill] sm:$0xff] }
 0xa9d   :  { %2711 = vadd.xlane.f32.xlu1 %v2710_v29  ;;  %4198 = vmatpush3.bf16.msra.mxu1 %v3031_v8  ;;  %v7314_v29 = vld [vmem:[#allocation51_spill] sm:$0xff] }
 0xa9e   :  { %4199 = vmatprep.subr.bf16.mxu1 %v3032_v51  ;;  %v7322_v8 = vld [vmem:[#allocation59_spill] sm:$0xff] }
 0xa9f   :  { %2714 = vadd.xlane.f32.xlu0 %v2713_v43 }
 0xaa1   :  { %2717 = vadd.xlane.f32.xlu1 %v2716_v46  ;;  %4200 = vmatpush3.bf16.msra.mxu1 %v3032_v51 }
 0xaa2   :  { %4201 = vmatprep.subr.bf16.mxu1 %v3033_v27 }
 0xaa5   :  { %4202 = vmatpush3.bf16.msra.mxu1 %v3033_v27  ;;  %v7324_v27 = vld [vmem:[#allocation61_spill] sm:$0xff] }
 0xaa6   :  { %4203 = vmatprep.subr.bf16.mxu1 %v3034_v1 }
 0xaa9   :  { %4204 = vmatpush3.bf16.msra.mxu1 %v3034_v1 }
 0xaaa   :  { %4205 = vmatprep.subr.bf16.mxu1 %v3035_v23 }
 0xaad   :  { %4206 = vmatpush3.bf16.msra.mxu1 %v3035_v23  ;;  %v7326_v23 = vld [vmem:[#allocation63_spill] sm:$0xff] }
 0xadc   :  { %v2433_v21 = vpop.xlane.xlu0 %2432 }
 0xadd   :  { %vm2507_vm2 = vcmp.ge.f32.partialorder %v7306_v33, %v2433_v21  ;;  %vm2508_vm8 = vcmp.ge.f32.partialorder %v7307_v4, %v2433_v21  ;;  %v7327_v21 = vld [vmem:[#allocation64_spill] sm:$0xff] }
 0xade   :  { %v3599_v45 = vsel %vm2507_vm2, 1.0, %v7266_v35  ;;  %v3600_v11 = vsel %vm2508_vm8, 1.0, %v7266_v35  ;;  %v2436_v34 = vpop.xlane.xlu1 %2435 }
 0xadf   :  { %v2719_v32 = vadd.f32 %v3600_v11, %v3599_v45  ;;  %vm2509_vm11 = vcmp.ge.f32.partialorder %v7308_v52, %v2436_v34  ;;  %vm2510_vm13 = vcmp.ge.f32.partialorder %v7309_v16, %v2436_v34  ;;  %v7328_v34 = vld [vmem:[#allocation65_spill] sm:$0xff] }
 0xae0   :  { %v3601_v36 = vsel %vm2509_vm11, 1.0, %v7266_v35  ;;  %v3602_v62 = vsel %vm2510_vm13, 1.0, %v7266_v35  ;;  %vm3663_vm15 = vmpackc.low %vm2510_vm13, %vm2508_vm8 }
 0xae1   :  { %v2722_v15 = vadd.f32 %v3602_v62, %v3601_v36  ;;  %vm3665_vm0 = vmpackc.low %vm2509_vm11, %vm2507_vm2  ;;  %2720 = vadd.xlane.f32.xlu0 %v2719_v32  ;;  %3664 = vmatprep.mubr.msk.bf16.mxu1 %vm3663_vm15, %v7269_v25  ;;  %v7329_v32 = vld [vmem:[#allocation66_spill] sm:$0xff] }
 0xae2   :  { %3666 = vmatmul.mubr.msk.bf16.gmra.mrb[104].mxu1 %vm3665_vm0, %v7269_v25 }
 0xae3   :  { %2723 = vadd.xlane.f32.xlu1 %v2722_v15 }
 0xae4   :  { %v2439_v39 = vpop.xlane.xlu0 %2438 }
 0xae5   :  { %vm2511_vm1 = vcmp.ge.f32.partialorder %v7310_v14, %v2439_v39  ;;  %vm2512_vm3 = vcmp.ge.f32.partialorder %v7311_v30, %v2439_v39 }
 0xae6   :  { %v3603_v38 = vsel %vm2511_vm1, 1.0, %v7266_v35  ;;  %v3604_v17 = vsel %vm2512_vm3, 1.0, %v7266_v35  ;;  %v2442_v63 = vpop.xlane.xlu1 %2441 }
 0xae7   :  { %v2725_v28 = vadd.f32 %v3604_v17, %v3603_v38  ;;  %vm2513_vm4 = vcmp.ge.f32.partialorder %v7312_v10, %v2442_v63  ;;  %vm2514_vm6 = vcmp.ge.f32.partialorder %v7313_v56, %v2442_v63 }
 0xae8   :  { %v3605_v9 = vsel %vm2513_vm4, 1.0, %v7266_v35  ;;  %v3606_v48 = vsel %vm2514_vm6, 1.0, %v7266_v35  ;;  %vm3667_vm7 = vmpackc.low %vm2514_vm6, %vm2512_vm3 }
 0xae9   :  { %v2728_v49 = vadd.f32 %v3606_v48, %v3605_v9  ;;  %vm3669_vm9 = vmpackc.low %vm2513_vm4, %vm2511_vm1  ;;  %2726 = vadd.xlane.f32.xlu0 %v2725_v28  ;;  %3668 = vmatprep.mubr.msk.bf16.mxu1 %vm3667_vm7, %v7269_v25 }
 0xaea   :  { %3670 = vmatmul.mubr.msk.bf16.gmra.mrb[108].mxu1 %vm3669_vm9, %v7269_v25 }
 0xaeb   :  { %2729 = vadd.xlane.f32.xlu1 %v2728_v49 }
 0xaec   :  { %v2445_v5 = vpop.xlane.xlu0 %2444 }
 0xaed   :  { %vm2515_vm10 = vcmp.ge.f32.partialorder %v7314_v29, %v2445_v5  ;;  %vm2516_vm12 = vcmp.ge.f32.partialorder %v7315_v2, %v2445_v5 }
 0xaee   :  { %v3607_v3 = vsel %vm2515_vm10, 1.0, %v7266_v35  ;;  %v3608_v24 = vsel %vm2516_vm12, 1.0, %v7266_v35  ;;  %v2448_v18 = vpop.xlane.xlu1 %2447 }
 0xaef   :  { %v2731_v12 = vadd.f32 %v3608_v24, %v3607_v3  ;;  %vm2517_vm14 = vcmp.ge.f32.partialorder %v7316_v19, %v2448_v18  ;;  %vm2518_vm5 = vcmp.ge.f32.partialorder %v7317_v58, %v2448_v18 }
 0xaf0   :  { %v3609_v31 = vsel %vm2517_vm14, 1.0, %v7266_v35  ;;  %v3610_v59 = vsel %vm2518_vm5, 1.0, %v7266_v35  ;;  %vm3671_vm2 = vmpackc.low %vm2518_vm5, %vm2516_vm12 }
 0xaf1   :  { %v2734_v43 = vadd.f32 %v3610_v59, %v3609_v31  ;;  %vm3673_vm8 = vmpackc.low %vm2517_vm14, %vm2515_vm10  ;;  %2732 = vadd.xlane.f32.xlu0 %v2731_v12  ;;  %3672 = vmatprep.mubr.msk.bf16.mxu1 %vm3671_vm2, %v7269_v25 }
 0xaf2   :  { %3674 = vmatmul.mubr.msk.bf16.gmra.mrb[112].mxu1 %vm3673_vm8, %v7269_v25 }
 0xaf3   :  { %2735 = vadd.xlane.f32.xlu1 %v2734_v43 }
 0xaf4   :  { %v2451_v0 = vpop.xlane.xlu0 %2450 }
 0xaf5   :  { %vm2519_vm11 = vcmp.ge.f32.partialorder %v7318_v6, %v2451_v0  ;;  %vm2520_vm13 = vcmp.ge.f32.partialorder %v7319_v40, %v2451_v0 }
 0xaf6   :  { %v3611_v7 = vsel %vm2519_vm11, 1.0, %v7266_v35  ;;  %v3612_v46 = vsel %vm2520_vm13, 1.0, %v7266_v35  ;;  %v2454_v37 = vpop.xlane.xlu1 %2453 }
 0xaf7   :  { %v2737_v60 = vadd.f32 %v3612_v46, %v3611_v7  ;;  %vm2521_vm15 = vcmp.ge.f32.partialorder %v7320_v20, %v2454_v37  ;;  %vm2522_vm0 = vcmp.ge.f32.partialorder %v7321_v47, %v2454_v37 }
 0xaf8   :  { %v3613_v55 = vsel %vm2521_vm15, 1.0, %v7266_v35  ;;  %v3614_v50 = vsel %vm2522_vm0, 1.0, %v7266_v35  ;;  %vm3675_vm1 = vmpackc.low %vm2522_vm0, %vm2520_vm13 }
 0xaf9   :  { %v2740_v44 = vadd.f32 %v3614_v50, %v3613_v55  ;;  %vm3677_vm3 = vmpackc.low %vm2521_vm15, %vm2519_vm11  ;;  %2738 = vadd.xlane.f32.xlu0 %v2737_v60  ;;  %3676 = vmatprep.mubr.msk.bf16.mxu1 %vm3675_vm1, %v7269_v25 }
 0xafa   :  { %3678 = vmatmul.mubr.msk.bf16.gmra.mrb[116].mxu1 %vm3677_vm3, %v7269_v25 }
 0xafb   :  { %2741 = vadd.xlane.f32.xlu1 %v2740_v44 }
 0xafc   :  { %v2457_v53 = vpop.xlane.xlu0 %2456 }
 0xafd   :  { %vm2523_vm4 = vcmp.ge.f32.partialorder %v7322_v8, %v2457_v53  ;;  %vm2524_vm6 = vcmp.ge.f32.partialorder %v7323_v22, %v2457_v53 }
 0xafe   :  { %v3615_v41 = vsel %vm2523_vm4, 1.0, %v7266_v35  ;;  %v3616_v51 = vsel %vm2524_vm6, 1.0, %v7266_v35  ;;  %v2460_v54 = vpop.xlane.xlu1 %2459 }
 0xaff   :  { %v2743_v26 = vadd.f32 %v3616_v51, %v3615_v41  ;;  %vm2525_vm7 = vcmp.ge.f32.partialorder %v7324_v27, %v2460_v54  ;;  %vm2526_vm9 = vcmp.ge.f32.partialorder %v7325_v57, %v2460_v54 }
 0xb00   :  { %v3617_v42 = vsel %vm2525_vm7, 1.0, %v7266_v35  ;;  %v3618_v1 = vsel %vm2526_vm9, 1.0, %v7266_v35  ;;  %vm3679_vm10 = vmpackc.low %vm2526_vm9, %vm2524_vm6 }
 0xb01   :  { %v2746_v13 = vadd.f32 %v3618_v1, %v3617_v42  ;;  %vm3681_vm12 = vmpackc.low %vm2525_vm7, %vm2523_vm4  ;;  %2744 = vadd.xlane.f32.xlu0 %v2743_v26  ;;  %3680 = vmatprep.mubr.msk.bf16.mxu1 %vm3679_vm10, %v7269_v25 }
 0xb02   :  { %3682 = vmatmul.mubr.msk.bf16.gmra.mrb[120].mxu1 %vm3681_vm12, %v7269_v25 }
 0xb03   :  { %2747 = vadd.xlane.f32.xlu1 %v2746_v13 }
 0xb04   :  { %v2463_v61 = vpop.xlane.xlu0 %2462 }
 0xb05   :  { %vm2527_vm14 = vcmp.ge.f32.partialorder %v7326_v23, %v2463_v61  ;;  %vm2528_vm5 = vcmp.ge.f32.partialorder %v7327_v21, %v2463_v61 }
 0xb06   :  { %v3619_v33 = vsel %vm2527_vm14, 1.0, %v7266_v35  ;;  %v3620_v4 = vsel %vm2528_vm5, 1.0, %v7266_v35  ;;  %v2466_v45 = vpop.xlane.xlu1 %2465 }
 0xb07   :  { %v2749_v11 = vadd.f32 %v3620_v4, %v3619_v33  ;;  %vm2529_vm2 = vcmp.ge.f32.partialorder %v7328_v34, %v2466_v45  ;;  %vm2530_vm8 = vcmp.ge.f32.partialorder %v7329_v32, %v2466_v45 }
 0xb08   :  { %v3621_v52 = vsel %vm2529_vm2, 1.0, %v7266_v35  ;;  %v3622_v16 = vsel %vm2530_vm8, 1.0, %v7266_v35  ;;  %vm3683_vm11 = vmpackc.low %vm2530_vm8, %vm2528_vm5  ;;  %v2661_v62 = vpop.xlane.xlu0 %2660 }
 0xb09   :  { %v2752_v36 = vadd.f32 %v3622_v16, %v3621_v52  ;;  %vm3685_vm13 = vmpackc.low %vm2529_vm2, %vm2527_vm14  ;;  %2750 = vadd.xlane.f32.xlu0 %v2749_v11  ;;  %3684 = vmatprep.mubr.msk.bf16.mxu1 %vm3683_vm11, %v7269_v25  ;;  %4369 = vrcp.f32 %v2661_v62 }
 0xb0a   :  { %3686 = vmatmul.mubr.msk.bf16.gmra.mrb[124].mxu1 %vm3685_vm13, %v7269_v25  ;;  %v2664_v15 = vpop.xlane.xlu1 %2663 }
 0xb0b   :  { %2753 = vadd.xlane.f32.xlu1 %v2752_v36  ;;  %4371 = vrcp.f32 %v2664_v15 }
 0xb0c   :  { %v2667_v39 = vpop.xlane.xlu0 %2666 }
 0xb0d   :  { %4373 = vrcp.f32 %v2667_v39 }
 0xb0e   :  { %v2670_v14 = vpop.xlane.xlu1 %2669 }
 0xb0f   :  { %4375 = vrcp.f32 %v2670_v14 }
 0xb10   :  { %v2673_v25 = vpop.xlane.xlu0 %2672 }
 0xb11   :  { %4377 = vrcp.f32 %v2673_v25 }
 0xb12   :  { %v2676_v49 = vpop.xlane.xlu1 %2675 }
 0xb13   :  { %v4370_v28 = vpop.eup %4369  ;;  %4379 = vrcp.f32 %v2676_v49 }
 0xb14   :  { %v2679_v43 = vpop.xlane.xlu0 %2678 }
 0xb15   :  { %v4372_v56 = vpop.eup %4371  ;;  %4381 = vrcp.f32 %v2679_v43 }
 0xb16   :  { %v2682_v0 = vpop.xlane.xlu1 %2681 }
 0xb17   :  { %v4374_v12 = vpop.eup %4373  ;;  %4383 = vrcp.f32 %v2682_v0 }
 0xb18   :  { %v2685_v53 = vpop.xlane.xlu0 %2684 }
 0xb19   :  { %v4376_v58 = vpop.eup %4375  ;;  %4385 = vrcp.f32 %v2685_v53 }
 0xb1a   :  { %v2688_v8 = vpop.xlane.xlu1 %2687 }
 0xb1b   :  { %v4378_v20 = vpop.eup %4377  ;;  %4387 = vrcp.f32 %v2688_v8 }
 0xb1c   :  { %v2691_v23 = vpop.xlane.xlu0 %2690 }
 0xb1d   :  { %v4380_v55 = vpop.eup %4379  ;;  %4389 = vrcp.f32 %v2691_v23 }
 0xb1e   :  { %v2694_v21 = vpop.xlane.xlu1 %2693 }
 0xb1f   :  { %v3847_v30 = vpop.f32.mrb[64].mxu1  ;;  %v4382_v57 = vpop.eup %4381  ;;  %4391 = vrcp.f32 %v2694_v21 }
 0xb20   :  { %v3848_v38 = vpop.f32.mrb[65].mxu1  ;;  %v2697_v39 = vpop.xlane.xlu0 %2696 }
 0xb21   :  { %v3849_v17 = vadd.f32 %v3848_v38, %v3847_v30  ;;  %v3850_v35 = vpop.f32.mrb[66].mxu1  ;;  %v4384_v1 = vpop.eup %4383  ;;  %4393 = vrcp.f32 %v2697_v39 }
 0xb22   :  { %v3851_v63 = vpop.f32.mrb[67].mxu1  ;;  %v2700_v14 = vpop.xlane.xlu1 %2699 }
 0xb23   :  { %v3852_v10 = vadd.f32 %v3851_v63, %v3850_v35  ;;  %v2980_v9 = vmul.f32 %v4370_v28, %v3849_v17  ;;  %v4386_v52 = vpop.eup %4385  ;;  %4395 = vrcp.f32 %v2700_v14 }
 0xb24   :  { %v2703_v49 = vpop.xlane.xlu0 %2702 }
 0xb25   :  { %v2981_v48 = vmul.f32 %v4372_v56, %v3852_v10  ;;  %v4388_v36 = vpop.eup %4387  ;;  %4397 = vrcp.f32 %v2703_v49 }
 0xb27   :  { %v3853_v5 = vpop.f32.mrb[68].mxu1  ;;  %v3012_v29 = vpack.c.bf16 %v2981_v48, %v2980_v9  ;;  %v4390_v10 = vpop.eup %4389 }
 0xb28   :  { %v3854_v2 = vpop.f32.mrb[69].mxu1  ;;  %v2709_v0 = vpop.xlane.xlu0 %2708 }
 0xb29   :  { %v3855_v3 = vadd.f32 %v3854_v2, %v3853_v5  ;;  %v3856_v24 = vpop.f32.mrb[70].mxu1  ;;  %4207 = vmatprep.mubr.bf16.mxu1 %v3012_v29  ;;  %v4392_v9 = vpop.eup %4391 }
 0xb2a   :  { %v3857_v18 = vpop.f32.mrb[71].mxu1  ;;  %v2706_v5 = vpop.xlane.xlu1 %2705 }
 0xb2b   :  { %v3858_v19 = vadd.f32 %v3857_v18, %v3856_v24  ;;  %v2982_v31 = vmul.f32 %v4374_v12, %v3855_v3  ;;  %4399 = vrcp.f32 %v2706_v5 }
 0xb2c   :  { %4401 = vrcp.f32 %v2709_v0  ;;  %v2715_v8 = vpop.xlane.xlu0 %2714 }
 0xb2d   :  { %v2983_v59 = vmul.f32 %v4376_v58, %v3858_v19  ;;  %v4394_v19 = vpop.eup %4393 }
 0xb2f   :  { %v3013_v6 = vpack.c.bf16 %v2983_v59, %v2982_v31  ;;  %v3859_v40 = vpop.f32.mrb[72].mxu1  ;;  %v4396_v31 = vpop.eup %4395 }
 0xb30   :  { %v3860_v7 = vpop.f32.mrb[73].mxu1 }
 0xb31   :  { %v3861_v46 = vadd.f32 %v3860_v7, %v3859_v40  ;;  %v3862_v37 = vpop.f32.mrb[74].mxu1  ;;  %4208 = vmatmul.mubr.bf16.vlgmr.msra.gmra.mrb[128].mxu1 %v3013_v6  ;;  %v2712_v6 = vpop.xlane.xlu1 %2711 }
 0xb32   :  { %v3863_v60 = vpop.f32.mrb[75].mxu1  ;;  %4403 = vrcp.f32 %v2712_v6 }
 0xb33   :  { %v3864_v47 = vadd.f32 %v3863_v60, %v3862_v37  ;;  %v2984_v50 = vmul.f32 %v4378_v20, %v3861_v46  ;;  %4405 = vrcp.f32 %v2715_v8 }
 0xb35   :  { %v2985_v44 = vmul.f32 %v4380_v55, %v3864_v47  ;;  %v4398_v47 = vpop.eup %4397 }
 0xb37   :  { %v3865_v22 = vpop.f32.mrb[76].mxu1  ;;  %v3014_v41 = vpack.c.bf16 %v2985_v44, %v2984_v50  ;;  %v4400_v50 = vpop.eup %4399 }
 0xb38   :  { %v3866_v51 = vpop.f32.mrb[77].mxu1 }
 0xb39   :  { %v3867_v54 = vadd.f32 %v3866_v51, %v3865_v22  ;;  %v3868_v26 = vpop.f32.mrb[78].mxu1  ;;  %4211 = vmatprep.mubr.bf16.mxu1 %v3014_v41  ;;  %v2718_v22 = vpop.xlane.xlu1 %2717 }
 0xb3a   :  { %v3869_v27 = vpop.f32.mrb[79].mxu1  ;;  %4407 = vrcp.f32 %v2718_v22 }
 0xb3b   :  { %v3870_v42 = vadd.f32 %v3869_v27, %v3868_v26  ;;  %v2986_v13 = vmul.f32 %v4382_v57, %v3867_v54 }
 0xb3d   :  { %v2987_v61 = vmul.f32 %v4384_v1, %v3870_v42  ;;  %v4402_v42 = vpop.eup %4401 }
 0xb3f   :  { %v3871_v33 = vpop.f32.mrb[80].mxu1  ;;  %v3015_v4 = vpack.c.bf16 %v2987_v61, %v2986_v13  ;;  %v4404_v13 = vpop.eup %4403 }
 0xb40   :  { %v3872_v45 = vpop.f32.mrb[81].mxu1 }
 0xb41   :  { %v3873_v11 = vadd.f32 %v3872_v45, %v3871_v33  ;;  %v3874_v34 = vpop.f32.mrb[82].mxu1  ;;  %4212 = vmatmul.mubr.bf16.gmra.mrb[132].mxu1 %v3015_v4 }
 0xb42   :  { %v3875_v32 = vpop.f32.mrb[83].mxu1 }
 0xb43   :  { %v3876_v16 = vadd.f32 %v3875_v32, %v3874_v34  ;;  %v2988_v62 = vmul.f32 %v4386_v52, %v3873_v11  ;;  %v4406_v32 = vpop.eup %4405 }
 0xb45   :  { %v2989_v15 = vmul.f32 %v4388_v36, %v3876_v16  ;;  %v4408_v16 = vpop.eup %4407 }
 0xb47   :  { %v3877_v30 = vpop.f32.mrb[84].mxu1  ;;  %v3016_v38 = vpack.c.bf16 %v2989_v15, %v2988_v62 }
 0xb48   :  { %v3878_v17 = vpop.f32.mrb[85].mxu1 }
 0xb49   :  { %v3879_v35 = vadd.f32 %v3878_v17, %v3877_v30  ;;  %v3880_v63 = vpop.f32.mrb[86].mxu1  ;;  %4215 = vmatprep.mubr.bf16.mxu1 %v3016_v38 }
 0xb4a   :  { %v3881_v28 = vpop.f32.mrb[87].mxu1 }
 0xb4b   :  { %v3882_v56 = vadd.f32 %v3881_v28, %v3880_v63  ;;  %v2990_v48 = vmul.f32 %v4390_v10, %v3879_v35 }
 0xb4d   :  { %v2991_v25 = vmul.f32 %v4392_v9, %v3882_v56 }
 0xb4f   :  { %v3883_v29 = vpop.f32.mrb[88].mxu1  ;;  %v3017_v2 = vpack.c.bf16 %v2991_v25, %v2990_v48 }
 0xb50   :  { %v3884_v3 = vpop.f32.mrb[89].mxu1 }
 0xb51   :  { %v3885_v24 = vadd.f32 %v3884_v3, %v3883_v29  ;;  %v3886_v18 = vpop.f32.mrb[90].mxu1  ;;  %4216 = vmatmul.mubr.bf16.gmra.mrb[136].mxu1 %v3017_v2 }
 0xb52   :  { %v3887_v12 = vpop.f32.mrb[91].mxu1 }
 0xb53   :  { %v3888_v58 = vadd.f32 %v3887_v12, %v3886_v18  ;;  %v2992_v59 = vmul.f32 %v4394_v19, %v3885_v24 }
 0xb55   :  { %v2993_v43 = vmul.f32 %v4396_v31, %v3888_v58 }
 0xb57   :  { %v3889_v40 = vpop.f32.mrb[92].mxu1  ;;  %v3018_v7 = vpack.c.bf16 %v2993_v43, %v2992_v59 }
 0xb58   :  { %v3890_v46 = vpop.f32.mrb[93].mxu1 }
 0xb59   :  { %v3891_v37 = vadd.f32 %v3890_v46, %v3889_v40  ;;  %v3892_v60 = vpop.f32.mrb[94].mxu1  ;;  %4219 = vmatprep.mubr.bf16.mxu1 %v3018_v7 }
 0xb5a   :  { %v3893_v20 = vpop.f32.mrb[95].mxu1 }
 0xb5b   :  { %v3894_v55 = vadd.f32 %v3893_v20, %v3892_v60  ;;  %v2994_v44 = vmul.f32 %v4398_v47, %v3891_v37 }
 0xb5d   :  { %v2995_v53 = vmul.f32 %v4400_v50, %v3894_v55 }
 0xb5f   :  { %v3895_v41 = vpop.f32.mrb[96].mxu1  ;;  %v3019_v51 = vpack.c.bf16 %v2995_v53, %v2994_v44 }
 0xb60   :  { %v3896_v54 = vpop.f32.mrb[97].mxu1 }
 0xb61   :  { %v3897_v26 = vadd.f32 %v3896_v54, %v3895_v41  ;;  %v3898_v27 = vpop.f32.mrb[98].mxu1  ;;  %4220 = vmatmul.mubr.bf16.gmra.mrb[140].mxu1 %v3019_v51 }
 0xb62   :  { %v3899_v57 = vpop.f32.mrb[99].mxu1 }
 0xb63   :  { %v3900_v1 = vadd.f32 %v3899_v57, %v3898_v27  ;;  %v2996_v61 = vmul.f32 %v4402_v42, %v3897_v26 }
 0xb65   :  { %v2997_v23 = vmul.f32 %v4404_v13, %v3900_v1 }
 0xb67   :  { %v3901_v21 = vpop.f32.mrb[100].mxu1  ;;  %v3020_v33 = vpack.c.bf16 %v2997_v23, %v2996_v61 }
 0xb68   :  { %v3902_v4 = vpop.f32.mrb[101].mxu1 }
 0xb69   :  { %v3903_v45 = vadd.f32 %v3902_v4, %v3901_v21  ;;  %v3904_v11 = vpop.f32.mrb[102].mxu1  ;;  %4223 = vmatprep.mubr.bf16.mxu1 %v3020_v33 }
 0xb6a   :  { %v3905_v34 = vpop.f32.mrb[103].mxu1 }
 0xb6b   :  { %v3906_v52 = vadd.f32 %v3905_v34, %v3904_v11  ;;  %v2998_v36 = vmul.f32 %v4406_v32, %v3903_v45 }
 0xb6d   :  { %v2999_v62 = vmul.f32 %v4408_v16, %v3906_v52 }
 0xb6e   :  { %v2721_v39 = vpop.xlane.xlu0 %2720 }
 0xb6f   :  { %v3021_v15 = vpack.c.bf16 %v2999_v62, %v2998_v36  ;;  %4409 = vrcp.f32 %v2721_v39 }
 0xb70   :  { %v2724_v14 = vpop.xlane.xlu1 %2723 }
 0xb71   :  { %4224 = vmatmul.mubr.bf16.gmra.mrb[144].mxu1 %v3021_v15  ;;  %4411 = vrcp.f32 %v2724_v14 }
 0xb76   :  { %v2727_v30 = vpop.xlane.xlu0 %2726 }
 0xb77   :  { %4413 = vrcp.f32 %v2727_v30 }
 0xb78   :  { %v2730_v38 = vpop.xlane.xlu1 %2729 }
 0xb79   :  { %4415 = vrcp.f32 %v2730_v38  ;;  %v4410_v56 = vpop.eup %4409 }
 0xb7b   :  { %v4412_v48 = vpop.eup %4411 }
 0xb7e   :  { %v2733_v5 = vpop.xlane.xlu0 %2732 }
 0xb7f   :  { %4417 = vrcp.f32 %v2733_v5 }
 0xb80   :  { %v2736_v29 = vpop.xlane.xlu1 %2735 }
 0xb81   :  { %4419 = vrcp.f32 %v2736_v29  ;;  %v4414_v58 = vpop.eup %4413 }
 0xb83   :  { %v4416_v59 = vpop.eup %4415 }
 0xb86   :  { %v2739_v6 = vpop.xlane.xlu0 %2738 }
 0xb87   :  { %4421 = vrcp.f32 %v2739_v6 }
 0xb88   :  { %v2742_v40 = vpop.xlane.xlu1 %2741 }
 0xb89   :  { %4423 = vrcp.f32 %v2742_v40  ;;  %v4418_v55 = vpop.eup %4417 }
 0xb8b   :  { %v4420_v44 = vpop.eup %4419 }
 0xb8e   :  { %v2745_v22 = vpop.xlane.xlu0 %2744 }
 0xb8f   :  { %4425 = vrcp.f32 %v2745_v22 }
 0xb90   :  { %v2748_v41 = vpop.xlane.xlu1 %2747 }
 0xb91   :  { %4427 = vrcp.f32 %v2748_v41  ;;  %v4422_v1 = vpop.eup %4421 }
 0xb93   :  { %v4424_v61 = vpop.eup %4423 }
 0xb96   :  { %v2751_v33 = vpop.xlane.xlu0 %2750 }
 0xb97   :  { %4429 = vrcp.f32 %v2751_v33 }
 0xb98   :  { %v2754_v4 = vpop.xlane.xlu1 %2753 }
 0xb99   :  { %4431 = vrcp.f32 %v2754_v4  ;;  %v4426_v36 = vpop.eup %4425 }
 0xb9b   :  { %v4428_v15 = vpop.eup %4427 }
 0xbb5   :  { %v3907_v17 = vpop.f32.mrb[104].mxu1 }
 0xbb6   :  { %v3908_v35 = vpop.f32.mrb[105].mxu1 }
 0xbb7   :  { %v3909_v63 = vadd.f32 %v3908_v35, %v3907_v17  ;;  %v3910_v28 = vpop.f32.mrb[106].mxu1 }
 0xbb8   :  { %v3911_v10 = vpop.f32.mrb[107].mxu1 }
 0xbb9   :  { %v3912_v9 = vadd.f32 %v3911_v10, %v3910_v28  ;;  %v3000_v25 = vmul.f32 %v4410_v56, %v3909_v63  ;;  %v4430_v10 = vpop.eup %4429 }
 0xbbb   :  { %v3001_v49 = vmul.f32 %v4412_v48, %v3912_v9  ;;  %v4432_v9 = vpop.eup %4431 }
 0xbbd   :  { %v3913_v2 = vpop.f32.mrb[108].mxu1  ;;  %v3022_v3 = vpack.c.bf16 %v3001_v49, %v3000_v25 }
 0xbbe   :  { %v3914_v24 = vpop.f32.mrb[109].mxu1 }
 0xbbf   :  { %v3915_v18 = vadd.f32 %v3914_v24, %v3913_v2  ;;  %v3916_v12 = vpop.f32.mrb[110].mxu1  ;;  %4227 = vmatprep.mubr.bf16.mxu1 %v3022_v3 }
 0xbc0   :  { %v3917_v19 = vpop.f32.mrb[111].mxu1 }
 0xbc1   :  { %v3918_v31 = vadd.f32 %v3917_v19, %v3916_v12  ;;  %v3002_v43 = vmul.f32 %v4414_v58, %v3915_v18 }
 0xbc3   :  { %v3003_v0 = vmul.f32 %v4416_v59, %v3918_v31 }
 0xbc5   :  { %v3919_v7 = vpop.f32.mrb[112].mxu1  ;;  %v3023_v46 = vpack.c.bf16 %v3003_v0, %v3002_v43 }
 0xbc6   :  { %v3920_v37 = vpop.f32.mrb[113].mxu1 }
 0xbc7   :  { %v3921_v60 = vadd.f32 %v3920_v37, %v3919_v7  ;;  %v3922_v20 = vpop.f32.mrb[114].mxu1  ;;  %4228 = vmatmul.mubr.bf16.gmra.mrb[148].mxu1 %v3023_v46 }
 0xbc8   :  { %v3923_v47 = vpop.f32.mrb[115].mxu1 }
 0xbc9   :  { %v3924_v50 = vadd.f32 %v3923_v47, %v3922_v20  ;;  %v3004_v53 = vmul.f32 %v4418_v55, %v3921_v60 }
 0xbcb   :  { %v3005_v8 = vmul.f32 %v4420_v44, %v3924_v50 }
 0xbcd   :  { %v3925_v51 = vpop.f32.mrb[116].mxu1  ;;  %v3024_v54 = vpack.c.bf16 %v3005_v8, %v3004_v53 }
 0xbce   :  { %v3926_v26 = vpop.f32.mrb[117].mxu1 }
 0xbcf   :  { %v3927_v27 = vadd.f32 %v3926_v26, %v3925_v51  ;;  %v3928_v57 = vpop.f32.mrb[118].mxu1  ;;  %4231 = vmatprep.mubr.bf16.mxu1 %v3024_v54 }
 0xbd0   :  { %v3929_v42 = vpop.f32.mrb[119].mxu1 }
 0xbd1   :  { %v3930_v13 = vadd.f32 %v3929_v42, %v3928_v57  ;;  %v3006_v23 = vmul.f32 %v4422_v1, %v3927_v27 }
 0xbd3   :  { %v3007_v21 = vmul.f32 %v4424_v61, %v3930_v13 }
 0xbd5   :  { %v3931_v45 = vpop.f32.mrb[120].mxu1  ;;  %v3025_v11 = vpack.c.bf16 %v3007_v21, %v3006_v23 }
 0xbd6   :  { %v3932_v34 = vpop.f32.mrb[121].mxu1 }
 0xbd7   :  { %v3933_v32 = vadd.f32 %v3932_v34, %v3931_v45  ;;  %v3934_v52 = vpop.f32.mrb[122].mxu1  ;;  %4232 = vmatmul.mubr.bf16.gmra.mrb[152].mxu1 %v3025_v11 }
 0xbd8   :  { %v3935_v16 = vpop.f32.mrb[123].mxu1 }
 0xbd9   :  { %v3936_v62 = vadd.f32 %v3935_v16, %v3934_v52  ;;  %v3008_v39 = vmul.f32 %v4426_v36, %v3933_v32 }
 0xbdb   :  { %v3009_v14 = vmul.f32 %v4428_v15, %v3936_v62 }
 0xbdd   :  { %v3937_v30 = vpop.f32.mrb[124].mxu1  ;;  %v3026_v38 = vpack.c.bf16 %v3009_v14, %v3008_v39 }
 0xbde   :  { %v3938_v17 = vpop.f32.mrb[125].mxu1 }
 0xbdf   :  { %v3939_v35 = vadd.f32 %v3938_v17, %v3937_v30  ;;  %v3940_v63 = vpop.f32.mrb[126].mxu1  ;;  %4235 = vmatprep.mubr.bf16.mxu1 %v3026_v38 }
 0xbe0   :  { %v3941_v28 = vpop.f32.mrb[127].mxu1 }
 0xbe1   :  { %v3942_v56 = vadd.f32 %v3941_v28, %v3940_v63  ;;  %v3010_v48 = vmul.f32 %v4430_v10, %v3939_v35 }
 0xbe3   :  { %v3011_v25 = vmul.f32 %v4432_v9, %v3942_v56 }
 0xbe5   :  { %v3027_v49 = vpack.c.bf16 %v3011_v25, %v3010_v48 }
 0xbe7   :  { %4236 = vmatmul.mubr.bf16.gmra.mrb[156].mxu1 %v3027_v49 }
 0xc04   :  { %v4209_v5 = vpop.f32.mrb[128].mxu1 }
 0xc05   :  { %v3070_v29 = vpop.f32.mrb[129].mxu1  ;;  %v3199_v3 = vmax.f32 %v4209_v5, 0.0 }
 0xc06   :  { %v4210_v2 = vpop.f32.mrb[130].mxu1  ;;  %v3197_v12 = vmax.f32 %v3070_v29, 0.0 }
 0xc07   :  { %v3200_v24 = vmax.f32 %v4210_v2, 0.0  ;;  %v3073_v18 = vpop.f32.mrb[131].mxu1 }
 0xc08   :  { %v3198_v19 = vmax.f32 %v3073_v18, 0.0 }
 0xc09   :  { %v6899_v58 = vpack.c.bf16 %v3200_v24, %v3199_v3 }
 0xc0a   :  { %v3358_v31 = vpack.c.bf16 %v3198_v19, %v3197_v12 }
 0xc0c   :  { %4287 = vmatprep.mubr.bf16.mxu1 %v3358_v31 }
 0xc14   :  { %v4213_v59 = vpop.f32.mrb[132].mxu1 }
 0xc15   :  { %v3086_v43 = vpop.f32.mrb[133].mxu1  ;;  %v3203_v6 = vmax.f32 %v4213_v59, 0.0 }
 0xc16   :  { %v4214_v0 = vpop.f32.mrb[134].mxu1  ;;  %v3201_v46 = vmax.f32 %v3086_v43, 0.0 }
 0xc17   :  { %v3204_v40 = vmax.f32 %v4214_v0, 0.0  ;;  %v3089_v7 = vpop.f32.mrb[135].mxu1 }
 0xc18   :  { %v3202_v37 = vmax.f32 %v3089_v7, 0.0 }
 0xc19   :  { %v6901_v60 = vpack.c.bf16 %v3204_v40, %v3203_v6 }
 0xc1a   :  { %v6903_v20 = vpack.c.bf16 %v3202_v37, %v3201_v46 }
 0xc24   :  { %v4217_v47 = vpop.f32.mrb[136].mxu1 }
 0xc25   :  { %v3102_v55 = vpop.f32.mrb[137].mxu1  ;;  %v3207_v44 = vmax.f32 %v4217_v47, 0.0 }
 0xc26   :  { %v4218_v50 = vpop.f32.mrb[138].mxu1  ;;  %v3205_v22 = vmax.f32 %v3102_v55, 0.0 }
 0xc27   :  { %v3208_v53 = vmax.f32 %v4218_v50, 0.0  ;;  %v3105_v8 = vpop.f32.mrb[139].mxu1 }
 0xc28   :  { %v3206_v41 = vmax.f32 %v3105_v8, 0.0 }
 0xc29   :  { %v6905_v51 = vpack.c.bf16 %v3208_v53, %v3207_v44 }
 0xc2a   :  { %v6907_v54 = vpack.c.bf16 %v3206_v41, %v3205_v22 }
 0xc34   :  { %v4221_v26 = vpop.f32.mrb[140].mxu1 }
 0xc35   :  { %v3118_v27 = vpop.f32.mrb[141].mxu1  ;;  %v3211_v42 = vmax.f32 %v4221_v26, 0.0 }
 0xc36   :  { %v4222_v57 = vpop.f32.mrb[142].mxu1  ;;  %v3209_v61 = vmax.f32 %v3118_v27, 0.0 }
 0xc37   :  { %v3212_v1 = vmax.f32 %v4222_v57, 0.0  ;;  %v3121_v13 = vpop.f32.mrb[143].mxu1 }
 0xc38   :  { %v3210_v23 = vmax.f32 %v3121_v13, 0.0 }
 0xc39   :  { %v6909_v21 = vpack.c.bf16 %v3212_v1, %v3211_v42 }
 0xc3a   :  { %v3364_v33 = vpack.c.bf16 %v3210_v23, %v3209_v61 }
 0xc44   :  { %v4225_v4 = vpop.f32.mrb[144].mxu1 }
 0xc45   :  { %v3134_v45 = vpop.f32.mrb[145].mxu1  ;;  %v3215_v34 = vmax.f32 %v4225_v4, 0.0 }
 0xc46   :  { %v4226_v11 = vpop.f32.mrb[146].mxu1  ;;  %v3213_v16 = vmax.f32 %v3134_v45, 0.0 }
 0xc47   :  { %v3216_v32 = vmax.f32 %v4226_v11, 0.0  ;;  %v3137_v52 = vpop.f32.mrb[147].mxu1 }
 0xc48   :  { %v3214_v36 = vmax.f32 %v3137_v52, 0.0 }
 0xc49   :  { %v3367_v62 = vpack.c.bf16 %v3216_v32, %v3215_v34 }
 0xc4a   :  { %v3366_v15 = vpack.c.bf16 %v3214_v36, %v3213_v16 }
 0xc4c   :  { %4271 = vmatprep.subr.bf16.mxu1 %v3366_v15 }
 0xc4d   :  { %4272 = vmatpush3.bf16.xpose.msra.mxu1 %v3366_v15 }
 0xc4e   :  { %4273 = vmatprep.subr.bf16.mxu1 %v3367_v62 }
 0xc55   :  { %4274 = vmatpush3.bf16.xpose.msra.mxu1 %v3367_v62 }
 0xc9a   :  { %v4229_v39 = vpop.f32.mrb[148].mxu1 }
 0xc9b   :  { %v3150_v14 = vpop.f32.mrb[149].mxu1  ;;  %v3219_v38 = vmax.f32 %v4229_v39, 0.0 }
 0xc9c   :  { %v4230_v30 = vpop.f32.mrb[150].mxu1  ;;  %v3217_v63 = vmax.f32 %v3150_v14, 0.0 }
 0xc9d   :  { %v3220_v17 = vmax.f32 %v4230_v30, 0.0  ;;  %v3153_v35 = vpop.f32.mrb[151].mxu1 }
 0xc9e   :  { %v3218_v28 = vmax.f32 %v3153_v35, 0.0 }
 0xc9f   :  { %v3369_v10 = vpack.c.bf16 %v3220_v17, %v3219_v38 }
 0xca0   :  { %v3368_v56 = vpack.c.bf16 %v3218_v28, %v3217_v63 }
 0xca2   :  { %4275 = vmatprep.subr.bf16.mxu1 %v3368_v56 }
 0xca3   :  { %4276 = vmatpush3.bf16.xpose.msra.mxu1 %v3368_v56 }
 0xca4   :  { %4277 = vmatprep.subr.bf16.mxu1 %v3369_v10 }
 0xcaa   :  { %v4233_v9 = vpop.f32.mrb[152].mxu1 }
 0xcab   :  { %v3166_v48 = vpop.f32.mrb[153].mxu1  ;;  %4278 = vmatpush3.bf16.xpose.msra.mxu1 %v3369_v10  ;;  %v3223_v49 = vmax.f32 %v4233_v9, 0.0 }
 0xcac   :  { %v4234_v25 = vpop.f32.mrb[154].mxu1  ;;  %v3221_v2 = vmax.f32 %v3166_v48, 0.0 }
 0xcad   :  { %v3224_v5 = vmax.f32 %v4234_v25, 0.0  ;;  %v3169_v29 = vpop.f32.mrb[155].mxu1 }
 0xcae   :  { %v3222_v3 = vmax.f32 %v3169_v29, 0.0 }
 0xcaf   :  { %v3371_v24 = vpack.c.bf16 %v3224_v5, %v3223_v49 }
 0xcb0   :  { %v3370_v18 = vpack.c.bf16 %v3222_v3, %v3221_v2 }
 0xcb2   :  { %4279 = vmatprep.subr.bf16.mxu1 %v3370_v18 }
 0xcb3   :  { %4280 = vmatpush3.bf16.xpose.msra.mxu1 %v3370_v18 }
 0xcb4   :  { %4281 = vmatprep.subr.bf16.mxu1 %v3371_v24 }
 0xcba   :  { %v4237_v12 = vpop.f32.mrb[156].mxu1 }
 0xcbb   :  { %v3182_v19 = vpop.f32.mrb[157].mxu1  ;;  %4282 = vmatpush3.bf16.xpose.msra.mxu1 %v3371_v24  ;;  %v3227_v59 = vmax.f32 %v4237_v12, 0.0 }
 0xcbc   :  { %v4238_v31 = vpop.f32.mrb[158].mxu1  ;;  %v3225_v6 = vmax.f32 %v3182_v19, 0.0 }
 0xcbd   :  { %v3228_v43 = vmax.f32 %v4238_v31, 0.0  ;;  %v3185_v0 = vpop.f32.mrb[159].mxu1 }
 0xcbe   :  { %v3226_v40 = vmax.f32 %v3185_v0, 0.0 }
 0xcbf   :  { %v3373_v7 = vpack.c.bf16 %v3228_v43, %v3227_v59 }
 0xcc0   :  { %v3372_v46 = vpack.c.bf16 %v3226_v40, %v3225_v6 }
 0xcc2   :  { %4283 = vmatprep.subr.bf16.mxu1 %v3372_v46 }
 0xcc3   :  { %4284 = vmatpush3.bf16.xpose.msra.mxu1 %v3372_v46 }
 0xcc4   :  { %4285 = vmatprep.subr.bf16.mxu1 %v3373_v7 }
 0xccb   :  { %4286 = vmatpush3.bf16.xpose.msra.mxu1 %v3373_v7 }
 0xcd2   :  { %4288 = vmatmul.mubr.bf16.vlgmr.msra.gmra.mrb[160].mxu1 %v6899_v58 }
 0xcd3   :  { %4291 = vmatprep.mubr.bf16.mxu1 %v6903_v20 }
 0xcda   :  { %4292 = vmatmul.mubr.bf16.gmra.mrb[164].mxu1 %v6901_v60 }
 0xcdb   :  { %4295 = vmatprep.mubr.bf16.mxu1 %v6907_v54 }
 0xce2   :  { %4296 = vmatmul.mubr.bf16.gmra.mrb[168].mxu1 %v6905_v51 }
 0xce3   :  { %4299 = vmatprep.mubr.bf16.mxu1 %v3364_v33 }
 0xcea   :  { %4300 = vmatmul.mubr.bf16.gmra.mrb[172].mxu1 %v6909_v21 }
 0xda5   :  { %v4289_v37 = vpop.f32.mrb[160].mxu1 }
 0xda6   :  { %3473 = vst [vmem:[%s6970_s5 + $0x10] sm:$0xff] %v4289_v37  ;;  %v3408_v47 = vpop.f32.mrb[161].mxu1 }
 0xda7   :  { %3471 = vst [vmem:[%s6970_s5] sm:$0xff] %v3408_v47  ;;  %v4290_v58 = vpop.f32.mrb[162].mxu1 }
 0xda8   :  { %3474 = vst [vmem:[%s6970_s5 + $0x18] sm:$0xff] %v4290_v58  ;;  %v3411_v60 = vpop.f32.mrb[163].mxu1 }
 0xda9   :  { %3472 = vst [vmem:[%s6970_s5 + $0x8] sm:$0xff] %v3411_v60 }
 0xdad   :  { %v4293_v20 = vpop.f32.mrb[164].mxu1 }
 0xdae   :  { %3477 = vst [vmem:[%s6970_s5 + $0x30] sm:$0xff] %v4293_v20  ;;  %v3424_v55 = vpop.f32.mrb[165].mxu1 }
 0xdaf   :  { %3475 = vst [vmem:[%s6970_s5 + $0x20] sm:$0xff] %v3424_v55  ;;  %v4294_v50 = vpop.f32.mrb[166].mxu1 }
 0xdb0   :  { %3478 = vst [vmem:[%s6970_s5 + $0x38] sm:$0xff] %v4294_v50  ;;  %v3427_v44 = vpop.f32.mrb[167].mxu1 }
 0xdb1   :  { %3476 = vst [vmem:[%s6970_s5 + $0x28] sm:$0xff] %v3427_v44 }
 0xdb5   :  { %v4297_v53 = vpop.f32.mrb[168].mxu1 }
 0xdb6   :  { %3481 = vst [vmem:[%s6970_s5 + $0x50] sm:$0xff] %v4297_v53  ;;  %v3440_v8 = vpop.f32.mrb[169].mxu1 }
 0xdb7   :  { %3479 = vst [vmem:[%s6970_s5 + $0x40] sm:$0xff] %v3440_v8  ;;  %v4298_v22 = vpop.f32.mrb[170].mxu1 }
 0xdb8   :  { %3482 = vst [vmem:[%s6970_s5 + $0x58] sm:$0xff] %v4298_v22  ;;  %v3443_v41 = vpop.f32.mrb[171].mxu1 }
 0xdb9   :  { %3480 = vst [vmem:[%s6970_s5 + $0x48] sm:$0xff] %v3443_v41 }
 0xdbd   :  { %v4301_v51 = vpop.f32.mrb[172].mxu1 }
 0xdbe   :  { %3485 = vst [vmem:[%s6970_s5 + $0x70] sm:$0xff] %v4301_v51  ;;  %v3456_v54 = vpop.f32.mrb[173].mxu1 }
 0xdbf   :  { %3483 = vst [vmem:[%s6970_s5 + $0x60] sm:$0xff] %v3456_v54  ;;  %v4302_v26 = vpop.f32.mrb[174].mxu1 }
 0xdc0   :  { %3486 = vst [vmem:[%s6970_s5 + $0x78] sm:$0xff] %v4302_v26  ;;  %v3459_v27 = vpop.f32.mrb[175].mxu1 }
 0xdc1   :  { %3484 = vst [vmem:[%s6970_s5 + $0x68] sm:$0xff] %v3459_v27 }

</bundles_post_ra>
